<compile_context>
chip_gen: v7x
topology: tpu7x:2x2x1
jax: 0.10.0
libtpu: 0.0.40
codegen_flags: <defaults>
</compile_context>

<pallas_src>
import functools

import jax
import jax.numpy as jnp
from jax.experimental import pallas as pl
from jax.experimental.pallas import tpu as pltpu

LANE = 128
SUBLANE = 8


# --------------------------- fused LSTM + MLP kernel ---------------------------
def _make_fused_kernel(T, B, H, L):
    """T, B, H, L are static Python ints (B is the padded batch)."""

    def kernel(*refs):
        # refs = [x_tm] + [w_ih, w_hh, bias]*L + [wt, bt, wp, bp, wr, br, wf, bf] + [out]
        x_ref = refs[0]                          # (T*B, F) time-major, flattened
        layer_refs = refs[1:1 + 3 * L]
        wt, bt, wp, bp, wr, br, wf, bf = refs[1 + 3 * L:-1]
        out_ref = refs[-1]                       # (B, 128) lane-dense output slab

        def recurrence(gx, whh):
            """gx: (T*B, 4H) precomputed input gates; whh: (H, 4H) value."""
            h = jnp.zeros((B, H), jnp.float32)
            c = jnp.zeros((B, H), jnp.float32)
            hs = []
            for t in range(T):                   # static unroll (T small)
                gates = gx[t * B:(t + 1) * B, :] + jnp.dot(
                    h, whh, preferred_element_type=jnp.float32)   # (B, 4H)
                sig = jax.nn.sigmoid(gates)      # one full-vreg EUP op
                th = jnp.tanh(gates)             # one full-vreg EUP op
                # PyTorch gate order: i, f, g, o
                c = sig[:, H:2 * H] * c + sig[:, 0:H] * th[:, 2 * H:3 * H]
                h = sig[:, 3 * H:4 * H] * jnp.tanh(c)
                hs.append(h)
            return hs

        seq = x_ref[...]                         # (T*B, F_in), time-major
        hs = None
        for l in range(L):
            w_ih = layer_refs[3 * l][...]
            w_hh = layer_refs[3 * l + 1][...]
            bias = layer_refs[3 * l + 2][...]
            # hoisted, time-independent input projection: one big matmul/layer
            gx = jnp.dot(seq, w_ih, preferred_element_type=jnp.float32) + bias
            hs = recurrence(gx, w_hh)
            if l + 1 < L:
                seq = jnp.concatenate(hs, axis=0)   # (T*B, H), stays in VMEM/regs

        h_last = hs[-1]                          # (B, H) == out[:, -1, :]

        def leaky(v):
            return jnp.where(v > 0, v, 0.01 * v)     # nn.LeakyReLU default slope

        z = leaky(jnp.dot(h_last, wt[...],
                          preferred_element_type=jnp.float32) + bt[...])   # tan_layer
        z = leaky(jnp.dot(z, wp[...],
                          preferred_element_type=jnp.float32) + bp[...])   # preFc
        z = jnp.maximum(jnp.dot(z, wr[...],
                                preferred_element_type=jnp.float32) + br[...], 0.0)  # rel
        y = jnp.dot(z, wf[...], preferred_element_type=jnp.float32) + bf[...]        # fc
        out_ref[...] = y.astype(out_ref.dtype)   # single full-width unmasked store

    return kernel


# ------------------------------- Full forward ---------------------------------
def lstm_model_forward(x, params):
    """x: (B, T, input_dim)  (batch_first, like the PyTorch module).  Returns (B, 1)."""
    B, T, F = x.shape
    H = params["lstm"][0]["w_hh"].shape[0]
    L = len(params["lstm"])
    O = params["w_fc"].shape[1]

    B_pad = max(SUBLANE, ((B + SUBLANE - 1) // SUBLANE) * SUBLANE)
    O_pad = LANE

    # Pad batch to the f32 sublane count, go time-major and flatten to 2-D.
    x_p = jnp.zeros((B_pad, T, F), jnp.float32).at[:B].set(x.astype(jnp.float32))
    x_tm = jnp.transpose(x_p, (1, 0, 2)).reshape(T * B_pad, F)

    # Lane-dense fc weights so the kernel's only HBM store is a full vst.
    w_fc = jnp.zeros((H, O_pad), jnp.float32).at[:, :O].set(params["w_fc"])
    b_fc = jnp.zeros((1, O_pad), jnp.float32).at[:, :O].set(params["b_fc"])

    flat = [x_tm]
    for layer in params["lstm"]:
        flat += [layer["w_ih"], layer["w_hh"], layer["bias"]]
    flat += [params["w_tan"], params["b_tan"],
             params["w_pre"], params["b_pre"],
             params["w_rel"], params["b_rel"],
             w_fc, b_fc]

    kernel = _make_fused_kernel(T, B_pad, H, L)
    vmem = pl.BlockSpec(memory_space=pltpu.MemorySpace.VMEM)
    out = pl.pallas_call(
        kernel,
        out_shape=jax.ShapeDtypeStruct((B_pad, O_pad), jnp.float32),
        in_specs=[vmem] * len(flat),
        out_specs=vmem,
    )(*flat)
    return out[:B, :O]


# ------------------------------ Parameter init --------------------------------
def init_params(key, input_dim, hidden_dim, layer_dim, output_dim):
    def uni(k, shape, bound):
        return jax.random.uniform(k, shape, jnp.float32, -bound, bound)

    bound = 1.0 / jnp.sqrt(hidden_dim)
    params = {"lstm": []}
    keys = jax.random.split(key, 4 * layer_dim + 8)
    ki = 0
    for l in range(layer_dim):
        in_dim = input_dim if l == 0 else hidden_dim
        w_ih = uni(keys[ki], (in_dim, 4 * hidden_dim), bound); ki += 1
        w_hh = uni(keys[ki], (hidden_dim, 4 * hidden_dim), bound); ki += 1
        b_ih = uni(keys[ki], (1, 4 * hidden_dim), bound); ki += 1
        b_hh = uni(keys[ki], (1, 4 * hidden_dim), bound); ki += 1
        params["lstm"].append({"w_ih": w_ih, "w_hh": w_hh, "bias": b_ih + b_hh})

    params["w_tan"] = uni(keys[ki], (hidden_dim, hidden_dim), bound); ki += 1
    params["b_tan"] = uni(keys[ki], (1, hidden_dim), bound); ki += 1
    params["w_pre"] = uni(keys[ki], (hidden_dim, hidden_dim), bound); ki += 1
    params["b_pre"] = uni(keys[ki], (1, hidden_dim), bound); ki += 1
    params["w_rel"] = uni(keys[ki], (hidden_dim, hidden_dim), bound); ki += 1
    params["b_rel"] = uni(keys[ki], (1, hidden_dim), bound); ki += 1
    params["w_fc"] = uni(keys[ki], (hidden_dim, output_dim), bound); ki += 1
    params["b_fc"] = uni(keys[ki], (1, output_dim), bound); ki += 1
    return params


# ----------------------------------- Main --------------------------------------
if __name__ == "__main__":
    B, T = 2, 8
    input_dim, hidden_dim, layer_dim, output_dim = 16, 32, 4, 1

    key = jax.random.PRNGKey(0)
    k_x, k_p = jax.random.split(key)
    x = jax.random.normal(k_x, (B, T, input_dim), jnp.float32)
    params = init_params(k_p, input_dim, hidden_dim, layer_dim, output_dim)

    fwd = jax.jit(functools.partial(lstm_model_forward, params=params))
    out = fwd(x)
    jax.block_until_ready(out)
    assert out.shape == (B, output_dim), out.shape
    print("KERNEL_OK")
</pallas_src>

<mosaic_0001>
module attributes {stable_mosaic.version = 11 : i64} {
  func.func @kernel(%arg0: memref<64x16xf32, #tpu.memory_space<vmem>>, %arg1: memref<16x128xf32, #tpu.memory_space<vmem>>, %arg2: memref<32x128xf32, #tpu.memory_space<vmem>>, %arg3: memref<1x128xf32, #tpu.memory_space<vmem>>, %arg4: memref<32x128xf32, #tpu.memory_space<vmem>>, %arg5: memref<32x128xf32, #tpu.memory_space<vmem>>, %arg6: memref<1x128xf32, #tpu.memory_space<vmem>>, %arg7: memref<32x128xf32, #tpu.memory_space<vmem>>, %arg8: memref<32x128xf32, #tpu.memory_space<vmem>>, %arg9: memref<1x128xf32, #tpu.memory_space<vmem>>, %arg10: memref<32x128xf32, #tpu.memory_space<vmem>>, %arg11: memref<32x128xf32, #tpu.memory_space<vmem>>, %arg12: memref<1x128xf32, #tpu.memory_space<vmem>>, %arg13: memref<32x32xf32, #tpu.memory_space<vmem>>, %arg14: memref<1x32xf32, #tpu.memory_space<vmem>>, %arg15: memref<32x32xf32, #tpu.memory_space<vmem>>, %arg16: memref<1x32xf32, #tpu.memory_space<vmem>>, %arg17: memref<32x32xf32, #tpu.memory_space<vmem>>, %arg18: memref<1x32xf32, #tpu.memory_space<vmem>>, %arg19: memref<32x128xf32, #tpu.memory_space<vmem>>, %arg20: memref<1x128xf32, #tpu.memory_space<vmem>>, %arg21: memref<8x128xf32, #tpu.memory_space<vmem>>) attributes {dimension_semantics = [], scalar_prefetch = 0 : i64, scratch_operands = 0 : i64, tpu.core_type = #tpu.core_type<tc>} {
    %c0 = arith.constant 0 : index
    %c0_0 = arith.constant 0 : index
    %0 = vector.load %arg0[%c0, %c0_0] : memref<64x16xf32, #tpu.memory_space<vmem>>, vector<64x16xf32>
    %c0_1 = arith.constant 0 : index
    %c0_2 = arith.constant 0 : index
    %1 = vector.load %arg1[%c0_1, %c0_2] : memref<16x128xf32, #tpu.memory_space<vmem>>, vector<16x128xf32>
    %c0_3 = arith.constant 0 : index
    %c0_4 = arith.constant 0 : index
    %2 = vector.load %arg2[%c0_3, %c0_4] : memref<32x128xf32, #tpu.memory_space<vmem>>, vector<32x128xf32>
    %c0_5 = arith.constant 0 : index
    %c0_6 = arith.constant 0 : index
    %3 = vector.load %arg3[%c0_5, %c0_6] : memref<1x128xf32, #tpu.memory_space<vmem>>, vector<1x128xf32>
    %cst = arith.constant dense<0.000000e+00> : vector<64x128xf32>
    %4 = tpu.matmul %0, %1, %cst {dimension_numbers = #tpu.dot_dimension_numbers<[1], [0], [0], [1], [0, 0, 1, 1], [], []>} : vector<64x16xf32>, vector<16x128xf32>, vector<64x128xf32> -> vector<64x128xf32>
    %5 = vector.broadcast %3 : vector<1x128xf32> to vector<64x128xf32>
    %6 = arith.addf %4, %5 : vector<64x128xf32>
    %cst_7 = arith.constant 0.000000e+00 : f32
    %7 = vector.broadcast %cst_7 : f32 to vector<8x32xf32>
    %cst_8 = arith.constant 0.000000e+00 : f32
    %8 = vector.broadcast %cst_8 : f32 to vector<8x32xf32>
    %9 = vector.extract_strided_slice %6 {offsets = [0, 0], sizes = [8, 128], strides = [1, 1]} : vector<64x128xf32> to vector<8x128xf32>
    %cst_9 = arith.constant dense<0.000000e+00> : vector<8x128xf32>
    %10 = tpu.matmul %7, %2, %cst_9 {dimension_numbers = #tpu.dot_dimension_numbers<[1], [0], [0], [1], [0, 0, 1, 1], [], []>} : vector<8x32xf32>, vector<32x128xf32>, vector<8x128xf32> -> vector<8x128xf32>
    %11 = arith.addf %9, %10 : vector<8x128xf32>
    %12 = arith.negf %11 : vector<8x128xf32>
    %13 = math.exp %12 : vector<8x128xf32>
    %cst_10 = arith.constant 1.000000e+00 : f32
    %14 = vector.broadcast %cst_10 : f32 to vector<8x128xf32>
    %15 = arith.addf %14, %13 : vector<8x128xf32>
    %16 = arith.divf %14, %15 : vector<8x128xf32>
    %17 = math.tanh %11 : vector<8x128xf32>
    %18 = vector.extract_strided_slice %16 {offsets = [0, 32], sizes = [8, 32], strides = [1, 1]} : vector<8x128xf32> to vector<8x32xf32>
    %19 = arith.mulf %18, %8 : vector<8x32xf32>
    %20 = vector.extract_strided_slice %16 {offsets = [0, 0], sizes = [8, 32], strides = [1, 1]} : vector<8x128xf32> to vector<8x32xf32>
    %21 = vector.extract_strided_slice %17 {offsets = [0, 64], sizes = [8, 32], strides = [1, 1]} : vector<8x128xf32> to vector<8x32xf32>
    %22 = arith.mulf %20, %21 : vector<8x32xf32>
    %23 = arith.addf %19, %22 : vector<8x32xf32>
    %24 = vector.extract_strided_slice %16 {offsets = [0, 96], sizes = [8, 32], strides = [1, 1]} : vector<8x128xf32> to vector<8x32xf32>
    %25 = math.tanh %23 : vector<8x32xf32>
    %26 = arith.mulf %24, %25 : vector<8x32xf32>
    %27 = vector.extract_strided_slice %6 {offsets = [8, 0], sizes = [8, 128], strides = [1, 1]} : vector<64x128xf32> to vector<8x128xf32>
    %cst_11 = arith.constant dense<0.000000e+00> : vector<8x128xf32>
    %28 = tpu.matmul %26, %2, %cst_11 {dimension_numbers = #tpu.dot_dimension_numbers<[1], [0], [0], [1], [0, 0, 1, 1], [], []>} : vector<8x32xf32>, vector<32x128xf32>, vector<8x128xf32> -> vector<8x128xf32>
    %29 = arith.addf %27, %28 : vector<8x128xf32>
    %30 = arith.negf %29 : vector<8x128xf32>
    %31 = math.exp %30 : vector<8x128xf32>
    %cst_12 = arith.constant 1.000000e+00 : f32
    %32 = vector.broadcast %cst_12 : f32 to vector<8x128xf32>
    %33 = arith.addf %32, %31 : vector<8x128xf32>
    %34 = arith.divf %32, %33 : vector<8x128xf32>
    %35 = math.tanh %29 : vector<8x128xf32>
    %36 = vector.extract_strided_slice %34 {offsets = [0, 32], sizes = [8, 32], strides = [1, 1]} : vector<8x128xf32> to vector<8x32xf32>
    %37 = arith.mulf %36, %23 : vector<8x32xf32>
    %38 = vector.extract_strided_slice %34 {offsets = [0, 0], sizes = [8, 32], strides = [1, 1]} : vector<8x128xf32> to vector<8x32xf32>
    %39 = vector.extract_strided_slice %35 {offsets = [0, 64], sizes = [8, 32], strides = [1, 1]} : vector<8x128xf32> to vector<8x32xf32>
    %40 = arith.mulf %38, %39 : vector<8x32xf32>
    %41 = arith.addf %37, %40 : vector<8x32xf32>
    %42 = vector.extract_strided_slice %34 {offsets = [0, 96], sizes = [8, 32], strides = [1, 1]} : vector<8x128xf32> to vector<8x32xf32>
    %43 = math.tanh %41 : vector<8x32xf32>
    %44 = arith.mulf %42, %43 : vector<8x32xf32>
    %45 = vector.extract_strided_slice %6 {offsets = [16, 0], sizes = [8, 128], strides = [1, 1]} : vector<64x128xf32> to vector<8x128xf32>
    %cst_13 = arith.constant dense<0.000000e+00> : vector<8x128xf32>
    %46 = tpu.matmul %44, %2, %cst_13 {dimension_numbers = #tpu.dot_dimension_numbers<[1], [0], [0], [1], [0, 0, 1, 1], [], []>} : vector<8x32xf32>, vector<32x128xf32>, vector<8x128xf32> -> vector<8x128xf32>
    %47 = arith.addf %45, %46 : vector<8x128xf32>
    %48 = arith.negf %47 : vector<8x128xf32>
    %49 = math.exp %48 : vector<8x128xf32>
    %cst_14 = arith.constant 1.000000e+00 : f32
    %50 = vector.broadcast %cst_14 : f32 to vector<8x128xf32>
    %51 = arith.addf %50, %49 : vector<8x128xf32>
    %52 = arith.divf %50, %51 : vector<8x128xf32>
    %53 = math.tanh %47 : vector<8x128xf32>
    %54 = vector.extract_strided_slice %52 {offsets = [0, 32], sizes = [8, 32], strides = [1, 1]} : vector<8x128xf32> to vector<8x32xf32>
    %55 = arith.mulf %54, %41 : vector<8x32xf32>
    %56 = vector.extract_strided_slice %52 {offsets = [0, 0], sizes = [8, 32], strides = [1, 1]} : vector<8x128xf32> to vector<8x32xf32>
    %57 = vector.extract_strided_slice %53 {offsets = [0, 64], sizes = [8, 32], strides = [1, 1]} : vector<8x128xf32> to vector<8x32xf32>
    %58 = arith.mulf %56, %57 : vector<8x32xf32>
    %59 = arith.addf %55, %58 : vector<8x32xf32>
    %60 = vector.extract_strided_slice %52 {offsets = [0, 96], sizes = [8, 32], strides = [1, 1]} : vector<8x128xf32> to vector<8x32xf32>
    %61 = math.tanh %59 : vector<8x32xf32>
    %62 = arith.mulf %60, %61 : vector<8x32xf32>
    %63 = vector.extract_strided_slice %6 {offsets = [24, 0], sizes = [8, 128], strides = [1, 1]} : vector<64x128xf32> to vector<8x128xf32>
    %cst_15 = arith.constant dense<0.000000e+00> : vector<8x128xf32>
    %64 = tpu.matmul %62, %2, %cst_15 {dimension_numbers = #tpu.dot_dimension_numbers<[1], [0], [0], [1], [0, 0, 1, 1], [], []>} : vector<8x32xf32>, vector<32x128xf32>, vector<8x128xf32> -> vector<8x128xf32>
    %65 = arith.addf %63, %64 : vector<8x128xf32>
    %66 = arith.negf %65 : vector<8x128xf32>
    %67 = math.exp %66 : vector<8x128xf32>
    %cst_16 = arith.constant 1.000000e+00 : f32
    %68 = vector.broadcast %cst_16 : f32 to vector<8x128xf32>
    %69 = arith.addf %68, %67 : vector<8x128xf32>
    %70 = arith.divf %68, %69 : vector<8x128xf32>
    %71 = math.tanh %65 : vector<8x128xf32>
    %72 = vector.extract_strided_slice %70 {offsets = [0, 32], sizes = [8, 32], strides = [1, 1]} : vector<8x128xf32> to vector<8x32xf32>
    %73 = arith.mulf %72, %59 : vector<8x32xf32>
    %74 = vector.extract_strided_slice %70 {offsets = [0, 0], sizes = [8, 32], strides = [1, 1]} : vector<8x128xf32> to vector<8x32xf32>
    %75 = vector.extract_strided_slice %71 {offsets = [0, 64], sizes = [8, 32], strides = [1, 1]} : vector<8x128xf32> to vector<8x32xf32>
    %76 = arith.mulf %74, %75 : vector<8x32xf32>
    %77 = arith.addf %73, %76 : vector<8x32xf32>
    %78 = vector.extract_strided_slice %70 {offsets = [0, 96], sizes = [8, 32], strides = [1, 1]} : vector<8x128xf32> to vector<8x32xf32>
    %79 = math.tanh %77 : vector<8x32xf32>
    %80 = arith.mulf %78, %79 : vector<8x32xf32>
    %81 = vector.extract_strided_slice %6 {offsets = [32, 0], sizes = [8, 128], strides = [1, 1]} : vector<64x128xf32> to vector<8x128xf32>
    %cst_17 = arith.constant dense<0.000000e+00> : vector<8x128xf32>
    %82 = tpu.matmul %80, %2, %cst_17 {dimension_numbers = #tpu.dot_dimension_numbers<[1], [0], [0], [1], [0, 0, 1, 1], [], []>} : vector<8x32xf32>, vector<32x128xf32>, vector<8x128xf32> -> vector<8x128xf32>
    %83 = arith.addf %81, %82 : vector<8x128xf32>
    %84 = arith.negf %83 : vector<8x128xf32>
    %85 = math.exp %84 : vector<8x128xf32>
    %cst_18 = arith.constant 1.000000e+00 : f32
    %86 = vector.broadcast %cst_18 : f32 to vector<8x128xf32>
    %87 = arith.addf %86, %85 : vector<8x128xf32>
    %88 = arith.divf %86, %87 : vector<8x128xf32>
    %89 = math.tanh %83 : vector<8x128xf32>
    %90 = vector.extract_strided_slice %88 {offsets = [0, 32], sizes = [8, 32], strides = [1, 1]} : vector<8x128xf32> to vector<8x32xf32>
    %91 = arith.mulf %90, %77 : vector<8x32xf32>
    %92 = vector.extract_strided_slice %88 {offsets = [0, 0], sizes = [8, 32], strides = [1, 1]} : vector<8x128xf32> to vector<8x32xf32>
    %93 = vector.extract_strided_slice %89 {offsets = [0, 64], sizes = [8, 32], strides = [1, 1]} : vector<8x128xf32> to vector<8x32xf32>
    %94 = arith.mulf %92, %93 : vector<8x32xf32>
    %95 = arith.addf %91, %94 : vector<8x32xf32>
    %96 = vector.extract_strided_slice %88 {offsets = [0, 96], sizes = [8, 32], strides = [1, 1]} : vector<8x128xf32> to vector<8x32xf32>
    %97 = math.tanh %95 : vector<8x32xf32>
    %98 = arith.mulf %96, %97 : vector<8x32xf32>
    %99 = vector.extract_strided_slice %6 {offsets = [40, 0], sizes = [8, 128], strides = [1, 1]} : vector<64x128xf32> to vector<8x128xf32>
    %cst_19 = arith.constant dense<0.000000e+00> : vector<8x128xf32>
    %100 = tpu.matmul %98, %2, %cst_19 {dimension_numbers = #tpu.dot_dimension_numbers<[1], [0], [0], [1], [0, 0, 1, 1], [], []>} : vector<8x32xf32>, vector<32x128xf32>, vector<8x128xf32> -> vector<8x128xf32>
    %101 = arith.addf %99, %100 : vector<8x128xf32>
    %102 = arith.negf %101 : vector<8x128xf32>
    %103 = math.exp %102 : vector<8x128xf32>
    %cst_20 = arith.constant 1.000000e+00 : f32
    %104 = vector.broadcast %cst_20 : f32 to vector<8x128xf32>
    %105 = arith.addf %104, %103 : vector<8x128xf32>
    %106 = arith.divf %104, %105 : vector<8x128xf32>
    %107 = math.tanh %101 : vector<8x128xf32>
    %108 = vector.extract_strided_slice %106 {offsets = [0, 32], sizes = [8, 32], strides = [1, 1]} : vector<8x128xf32> to vector<8x32xf32>
    %109 = arith.mulf %108, %95 : vector<8x32xf32>
    %110 = vector.extract_strided_slice %106 {offsets = [0, 0], sizes = [8, 32], strides = [1, 1]} : vector<8x128xf32> to vector<8x32xf32>
    %111 = vector.extract_strided_slice %107 {offsets = [0, 64], sizes = [8, 32], strides = [1, 1]} : vector<8x128xf32> to vector<8x32xf32>
    %112 = arith.mulf %110, %111 : vector<8x32xf32>
    %113 = arith.addf %109, %112 : vector<8x32xf32>
    %114 = vector.extract_strided_slice %106 {offsets = [0, 96], sizes = [8, 32], strides = [1, 1]} : vector<8x128xf32> to vector<8x32xf32>
    %115 = math.tanh %113 : vector<8x32xf32>
    %116 = arith.mulf %114, %115 : vector<8x32xf32>
    %117 = vector.extract_strided_slice %6 {offsets = [48, 0], sizes = [8, 128], strides = [1, 1]} : vector<64x128xf32> to vector<8x128xf32>
    %cst_21 = arith.constant dense<0.000000e+00> : vector<8x128xf32>
    %118 = tpu.matmul %116, %2, %cst_21 {dimension_numbers = #tpu.dot_dimension_numbers<[1], [0], [0], [1], [0, 0, 1, 1], [], []>} : vector<8x32xf32>, vector<32x128xf32>, vector<8x128xf32> -> vector<8x128xf32>
    %119 = arith.addf %117, %118 : vector<8x128xf32>
    %120 = arith.negf %119 : vector<8x128xf32>
    %121 = math.exp %120 : vector<8x128xf32>
    %cst_22 = arith.constant 1.000000e+00 : f32
    %122 = vector.broadcast %cst_22 : f32 to vector<8x128xf32>
    %123 = arith.addf %122, %121 : vector<8x128xf32>
    %124 = arith.divf %122, %123 : vector<8x128xf32>
    %125 = math.tanh %119 : vector<8x128xf32>
    %126 = vector.extract_strided_slice %124 {offsets = [0, 32], sizes = [8, 32], strides = [1, 1]} : vector<8x128xf32> to vector<8x32xf32>
    %127 = arith.mulf %126, %113 : vector<8x32xf32>
    %128 = vector.extract_strided_slice %124 {offsets = [0, 0], sizes = [8, 32], strides = [1, 1]} : vector<8x128xf32> to vector<8x32xf32>
    %129 = vector.extract_strided_slice %125 {offsets = [0, 64], sizes = [8, 32], strides = [1, 1]} : vector<8x128xf32> to vector<8x32xf32>
    %130 = arith.mulf %128, %129 : vector<8x32xf32>
    %131 = arith.addf %127, %130 : vector<8x32xf32>
    %132 = vector.extract_strided_slice %124 {offsets = [0, 96], sizes = [8, 32], strides = [1, 1]} : vector<8x128xf32> to vector<8x32xf32>
    %133 = math.tanh %131 : vector<8x32xf32>
    %134 = arith.mulf %132, %133 : vector<8x32xf32>
    %135 = vector.extract_strided_slice %6 {offsets = [56, 0], sizes = [8, 128], strides = [1, 1]} : vector<64x128xf32> to vector<8x128xf32>
    %cst_23 = arith.constant dense<0.000000e+00> : vector<8x128xf32>
    %136 = tpu.matmul %134, %2, %cst_23 {dimension_numbers = #tpu.dot_dimension_numbers<[1], [0], [0], [1], [0, 0, 1, 1], [], []>} : vector<8x32xf32>, vector<32x128xf32>, vector<8x128xf32> -> vector<8x128xf32>
    %137 = arith.addf %135, %136 : vector<8x128xf32>
    %138 = arith.negf %137 : vector<8x128xf32>
    %139 = math.exp %138 : vector<8x128xf32>
    %cst_24 = arith.constant 1.000000e+00 : f32
    %140 = vector.broadcast %cst_24 : f32 to vector<8x128xf32>
    %141 = arith.addf %140, %139 : vector<8x128xf32>
    %142 = arith.divf %140, %141 : vector<8x128xf32>
    %143 = math.tanh %137 : vector<8x128xf32>
    %144 = vector.extract_strided_slice %142 {offsets = [0, 32], sizes = [8, 32], strides = [1, 1]} : vector<8x128xf32> to vector<8x32xf32>
    %145 = arith.mulf %144, %131 : vector<8x32xf32>
    %146 = vector.extract_strided_slice %142 {offsets = [0, 0], sizes = [8, 32], strides = [1, 1]} : vector<8x128xf32> to vector<8x32xf32>
    %147 = vector.extract_strided_slice %143 {offsets = [0, 64], sizes = [8, 32], strides = [1, 1]} : vector<8x128xf32> to vector<8x32xf32>
    %148 = arith.mulf %146, %147 : vector<8x32xf32>
    %149 = arith.addf %145, %148 : vector<8x32xf32>
    %150 = vector.extract_strided_slice %142 {offsets = [0, 96], sizes = [8, 32], strides = [1, 1]} : vector<8x128xf32> to vector<8x32xf32>
    %151 = math.tanh %149 : vector<8x32xf32>
    %152 = arith.mulf %150, %151 : vector<8x32xf32>
    %153 = tpu.concatenate %26, %44, %62, %80, %98, %116, %134, %152 in 0 : vector<8x32xf32>, vector<8x32xf32>, vector<8x32xf32>, vector<8x32xf32>, vector<8x32xf32>, vector<8x32xf32>, vector<8x32xf32>, vector<8x32xf32> -> vector<64x32xf32>
    %c0_25 = arith.constant 0 : index
    %c0_26 = arith.constant 0 : index
    %154 = vector.load %arg4[%c0_25, %c0_26] : memref<32x128xf32, #tpu.memory_space<vmem>>, vector<32x128xf32>
    %c0_27 = arith.constant 0 : index
    %c0_28 = arith.constant 0 : index
    %155 = vector.load %arg5[%c0_27, %c0_28] : memref<32x128xf32, #tpu.memory_space<vmem>>, vector<32x128xf32>
    %c0_29 = arith.constant 0 : index
    %c0_30 = arith.constant 0 : index
    %156 = vector.load %arg6[%c0_29, %c0_30] : memref<1x128xf32, #tpu.memory_space<vmem>>, vector<1x128xf32>
    %cst_31 = arith.constant dense<0.000000e+00> : vector<64x128xf32>
    %157 = tpu.matmul %153, %154, %cst_31 {dimension_numbers = #tpu.dot_dimension_numbers<[1], [0], [0], [1], [0, 0, 1, 1], [], []>} : vector<64x32xf32>, vector<32x128xf32>, vector<64x128xf32> -> vector<64x128xf32>
    %158 = vector.broadcast %156 : vector<1x128xf32> to vector<64x128xf32>
    %159 = arith.addf %157, %158 : vector<64x128xf32>
    %cst_32 = arith.constant 0.000000e+00 : f32
    %160 = vector.broadcast %cst_32 : f32 to vector<8x32xf32>
    %cst_33 = arith.constant 0.000000e+00 : f32
    %161 = vector.broadcast %cst_33 : f32 to vector<8x32xf32>
    %162 = vector.extract_strided_slice %159 {offsets = [0, 0], sizes = [8, 128], strides = [1, 1]} : vector<64x128xf32> to vector<8x128xf32>
    %cst_34 = arith.constant dense<0.000000e+00> : vector<8x128xf32>
    %163 = tpu.matmul %160, %155, %cst_34 {dimension_numbers = #tpu.dot_dimension_numbers<[1], [0], [0], [1], [0, 0, 1, 1], [], []>} : vector<8x32xf32>, vector<32x128xf32>, vector<8x128xf32> -> vector<8x128xf32>
    %164 = arith.addf %162, %163 : vector<8x128xf32>
    %165 = arith.negf %164 : vector<8x128xf32>
    %166 = math.exp %165 : vector<8x128xf32>
    %cst_35 = arith.constant 1.000000e+00 : f32
    %167 = vector.broadcast %cst_35 : f32 to vector<8x128xf32>
    %168 = arith.addf %167, %166 : vector<8x128xf32>
    %169 = arith.divf %167, %168 : vector<8x128xf32>
    %170 = math.tanh %164 : vector<8x128xf32>
    %171 = vector.extract_strided_slice %169 {offsets = [0, 32], sizes = [8, 32], strides = [1, 1]} : vector<8x128xf32> to vector<8x32xf32>
    %172 = arith.mulf %171, %161 : vector<8x32xf32>
    %173 = vector.extract_strided_slice %169 {offsets = [0, 0], sizes = [8, 32], strides = [1, 1]} : vector<8x128xf32> to vector<8x32xf32>
    %174 = vector.extract_strided_slice %170 {offsets = [0, 64], sizes = [8, 32], strides = [1, 1]} : vector<8x128xf32> to vector<8x32xf32>
    %175 = arith.mulf %173, %174 : vector<8x32xf32>
    %176 = arith.addf %172, %175 : vector<8x32xf32>
    %177 = vector.extract_strided_slice %169 {offsets = [0, 96], sizes = [8, 32], strides = [1, 1]} : vector<8x128xf32> to vector<8x32xf32>
    %178 = math.tanh %176 : vector<8x32xf32>
    %179 = arith.mulf %177, %178 : vector<8x32xf32>
    %180 = vector.extract_strided_slice %159 {offsets = [8, 0], sizes = [8, 128], strides = [1, 1]} : vector<64x128xf32> to vector<8x128xf32>
    %cst_36 = arith.constant dense<0.000000e+00> : vector<8x128xf32>
    %181 = tpu.matmul %179, %155, %cst_36 {dimension_numbers = #tpu.dot_dimension_numbers<[1], [0], [0], [1], [0, 0, 1, 1], [], []>} : vector<8x32xf32>, vector<32x128xf32>, vector<8x128xf32> -> vector<8x128xf32>
    %182 = arith.addf %180, %181 : vector<8x128xf32>
    %183 = arith.negf %182 : vector<8x128xf32>
    %184 = math.exp %183 : vector<8x128xf32>
    %cst_37 = arith.constant 1.000000e+00 : f32
    %185 = vector.broadcast %cst_37 : f32 to vector<8x128xf32>
    %186 = arith.addf %185, %184 : vector<8x128xf32>
    %187 = arith.divf %185, %186 : vector<8x128xf32>
    %188 = math.tanh %182 : vector<8x128xf32>
    %189 = vector.extract_strided_slice %187 {offsets = [0, 32], sizes = [8, 32], strides = [1, 1]} : vector<8x128xf32> to vector<8x32xf32>
    %190 = arith.mulf %189, %176 : vector<8x32xf32>
    %191 = vector.extract_strided_slice %187 {offsets = [0, 0], sizes = [8, 32], strides = [1, 1]} : vector<8x128xf32> to vector<8x32xf32>
    %192 = vector.extract_strided_slice %188 {offsets = [0, 64], sizes = [8, 32], strides = [1, 1]} : vector<8x128xf32> to vector<8x32xf32>
    %193 = arith.mulf %191, %192 : vector<8x32xf32>
    %194 = arith.addf %190, %193 : vector<8x32xf32>
    %195 = vector.extract_strided_slice %187 {offsets = [0, 96], sizes = [8, 32], strides = [1, 1]} : vector<8x128xf32> to vector<8x32xf32>
    %196 = math.tanh %194 : vector<8x32xf32>
    %197 = arith.mulf %195, %196 : vector<8x32xf32>
    %198 = vector.extract_strided_slice %159 {offsets = [16, 0], sizes = [8, 128], strides = [1, 1]} : vector<64x128xf32> to vector<8x128xf32>
    %cst_38 = arith.constant dense<0.000000e+00> : vector<8x128xf32>
    %199 = tpu.matmul %197, %155, %cst_38 {dimension_numbers = #tpu.dot_dimension_numbers<[1], [0], [0], [1], [0, 0, 1, 1], [], []>} : vector<8x32xf32>, vector<32x128xf32>, vector<8x128xf32> -> vector<8x128xf32>
    %200 = arith.addf %198, %199 : vector<8x128xf32>
    %201 = arith.negf %200 : vector<8x128xf32>
    %202 = math.exp %201 : vector<8x128xf32>
    %cst_39 = arith.constant 1.000000e+00 : f32
    %203 = vector.broadcast %cst_39 : f32 to vector<8x128xf32>
    %204 = arith.addf %203, %202 : vector<8x128xf32>
    %205 = arith.divf %203, %204 : vector<8x128xf32>
    %206 = math.tanh %200 : vector<8x128xf32>
    %207 = vector.extract_strided_slice %205 {offsets = [0, 32], sizes = [8, 32], strides = [1, 1]} : vector<8x128xf32> to vector<8x32xf32>
    %208 = arith.mulf %207, %194 : vector<8x32xf32>
    %209 = vector.extract_strided_slice %205 {offsets = [0, 0], sizes = [8, 32], strides = [1, 1]} : vector<8x128xf32> to vector<8x32xf32>
    %210 = vector.extract_strided_slice %206 {offsets = [0, 64], sizes = [8, 32], strides = [1, 1]} : vector<8x128xf32> to vector<8x32xf32>
    %211 = arith.mulf %209, %210 : vector<8x32xf32>
    %212 = arith.addf %208, %211 : vector<8x32xf32>
    %213 = vector.extract_strided_slice %205 {offsets = [0, 96], sizes = [8, 32], strides = [1, 1]} : vector<8x128xf32> to vector<8x32xf32>
    %214 = math.tanh %212 : vector<8x32xf32>
    %215 = arith.mulf %213, %214 : vector<8x32xf32>
    %216 = vector.extract_strided_slice %159 {offsets = [24, 0], sizes = [8, 128], strides = [1, 1]} : vector<64x128xf32> to vector<8x128xf32>
    %cst_40 = arith.constant dense<0.000000e+00> : vector<8x128xf32>
    %217 = tpu.matmul %215, %155, %cst_40 {dimension_numbers = #tpu.dot_dimension_numbers<[1], [0], [0], [1], [0, 0, 1, 1], [], []>} : vector<8x32xf32>, vector<32x128xf32>, vector<8x128xf32> -> vector<8x128xf32>
    %218 = arith.addf %216, %217 : vector<8x128xf32>
    %219 = arith.negf %218 : vector<8x128xf32>
    %220 = math.exp %219 : vector<8x128xf32>
    %cst_41 = arith.constant 1.000000e+00 : f32
    %221 = vector.broadcast %cst_41 : f32 to vector<8x128xf32>
    %222 = arith.addf %221, %220 : vector<8x128xf32>
    %223 = arith.divf %221, %222 : vector<8x128xf32>
    %224 = math.tanh %218 : vector<8x128xf32>
    %225 = vector.extract_strided_slice %223 {offsets = [0, 32], sizes = [8, 32], strides = [1, 1]} : vector<8x128xf32> to vector<8x32xf32>
    %226 = arith.mulf %225, %212 : vector<8x32xf32>
    %227 = vector.extract_strided_slice %223 {offsets = [0, 0], sizes = [8, 32], strides = [1, 1]} : vector<8x128xf32> to vector<8x32xf32>
    %228 = vector.extract_strided_slice %224 {offsets = [0, 64], sizes = [8, 32], strides = [1, 1]} : vector<8x128xf32> to vector<8x32xf32>
    %229 = arith.mulf %227, %228 : vector<8x32xf32>
    %230 = arith.addf %226, %229 : vector<8x32xf32>
    %231 = vector.extract_strided_slice %223 {offsets = [0, 96], sizes = [8, 32], strides = [1, 1]} : vector<8x128xf32> to vector<8x32xf32>
    %232 = math.tanh %230 : vector<8x32xf32>
    %233 = arith.mulf %231, %232 : vector<8x32xf32>
    %234 = vector.extract_strided_slice %159 {offsets = [32, 0], sizes = [8, 128], strides = [1, 1]} : vector<64x128xf32> to vector<8x128xf32>
    %cst_42 = arith.constant dense<0.000000e+00> : vector<8x128xf32>
    %235 = tpu.matmul %233, %155, %cst_42 {dimension_numbers = #tpu.dot_dimension_numbers<[1], [0], [0], [1], [0, 0, 1, 1], [], []>} : vector<8x32xf32>, vector<32x128xf32>, vector<8x128xf32> -> vector<8x128xf32>
    %236 = arith.addf %234, %235 : vector<8x128xf32>
    %237 = arith.negf %236 : vector<8x128xf32>
    %238 = math.exp %237 : vector<8x128xf32>
    %cst_43 = arith.constant 1.000000e+00 : f32
    %239 = vector.broadcast %cst_43 : f32 to vector<8x128xf32>
    %240 = arith.addf %239, %238 : vector<8x128xf32>
    %241 = arith.divf %239, %240 : vector<8x128xf32>
    %242 = math.tanh %236 : vector<8x128xf32>
    %243 = vector.extract_strided_slice %241 {offsets = [0, 32], sizes = [8, 32], strides = [1, 1]} : vector<8x128xf32> to vector<8x32xf32>
    %244 = arith.mulf %243, %230 : vector<8x32xf32>
    %245 = vector.extract_strided_slice %241 {offsets = [0, 0], sizes = [8, 32], strides = [1, 1]} : vector<8x128xf32> to vector<8x32xf32>
    %246 = vector.extract_strided_slice %242 {offsets = [0, 64], sizes = [8, 32], strides = [1, 1]} : vector<8x128xf32> to vector<8x32xf32>
    %247 = arith.mulf %245, %246 : vector<8x32xf32>
    %248 = arith.addf %244, %247 : vector<8x32xf32>
    %249 = vector.extract_strided_slice %241 {offsets = [0, 96], sizes = [8, 32], strides = [1, 1]} : vector<8x128xf32> to vector<8x32xf32>
    %250 = math.tanh %248 : vector<8x32xf32>
    %251 = arith.mulf %249, %250 : vector<8x32xf32>
    %252 = vector.extract_strided_slice %159 {offsets = [40, 0], sizes = [8, 128], strides = [1, 1]} : vector<64x128xf32> to vector<8x128xf32>
    %cst_44 = arith.constant dense<0.000000e+00> : vector<8x128xf32>
    %253 = tpu.matmul %251, %155, %cst_44 {dimension_numbers = #tpu.dot_dimension_numbers<[1], [0], [0], [1], [0, 0, 1, 1], [], []>} : vector<8x32xf32>, vector<32x128xf32>, vector<8x128xf32> -> vector<8x128xf32>
    %254 = arith.addf %252, %253 : vector<8x128xf32>
    %255 = arith.negf %254 : vector<8x128xf32>
    %256 = math.exp %255 : vector<8x128xf32>
    %cst_45 = arith.constant 1.000000e+00 : f32
    %257 = vector.broadcast %cst_45 : f32 to vector<8x128xf32>
    %258 = arith.addf %257, %256 : vector<8x128xf32>
    %259 = arith.divf %257, %258 : vector<8x128xf32>
    %260 = math.tanh %254 : vector<8x128xf32>
    %261 = vector.extract_strided_slice %259 {offsets = [0, 32], sizes = [8, 32], strides = [1, 1]} : vector<8x128xf32> to vector<8x32xf32>
    %262 = arith.mulf %261, %248 : vector<8x32xf32>
    %263 = vector.extract_strided_slice %259 {offsets = [0, 0], sizes = [8, 32], strides = [1, 1]} : vector<8x128xf32> to vector<8x32xf32>
    %264 = vector.extract_strided_slice %260 {offsets = [0, 64], sizes = [8, 32], strides = [1, 1]} : vector<8x128xf32> to vector<8x32xf32>
    %265 = arith.mulf %263, %264 : vector<8x32xf32>
    %266 = arith.addf %262, %265 : vector<8x32xf32>
    %267 = vector.extract_strided_slice %259 {offsets = [0, 96], sizes = [8, 32], strides = [1, 1]} : vector<8x128xf32> to vector<8x32xf32>
    %268 = math.tanh %266 : vector<8x32xf32>
    %269 = arith.mulf %267, %268 : vector<8x32xf32>
    %270 = vector.extract_strided_slice %159 {offsets = [48, 0], sizes = [8, 128], strides = [1, 1]} : vector<64x128xf32> to vector<8x128xf32>
    %cst_46 = arith.constant dense<0.000000e+00> : vector<8x128xf32>
    %271 = tpu.matmul %269, %155, %cst_46 {dimension_numbers = #tpu.dot_dimension_numbers<[1], [0], [0], [1], [0, 0, 1, 1], [], []>} : vector<8x32xf32>, vector<32x128xf32>, vector<8x128xf32> -> vector<8x128xf32>
    %272 = arith.addf %270, %271 : vector<8x128xf32>
    %273 = arith.negf %272 : vector<8x128xf32>
    %274 = math.exp %273 : vector<8x128xf32>
    %cst_47 = arith.constant 1.000000e+00 : f32
    %275 = vector.broadcast %cst_47 : f32 to vector<8x128xf32>
    %276 = arith.addf %275, %274 : vector<8x128xf32>
    %277 = arith.divf %275, %276 : vector<8x128xf32>
    %278 = math.tanh %272 : vector<8x128xf32>
    %279 = vector.extract_strided_slice %277 {offsets = [0, 32], sizes = [8, 32], strides = [1, 1]} : vector<8x128xf32> to vector<8x32xf32>
    %280 = arith.mulf %279, %266 : vector<8x32xf32>
    %281 = vector.extract_strided_slice %277 {offsets = [0, 0], sizes = [8, 32], strides = [1, 1]} : vector<8x128xf32> to vector<8x32xf32>
    %282 = vector.extract_strided_slice %278 {offsets = [0, 64], sizes = [8, 32], strides = [1, 1]} : vector<8x128xf32> to vector<8x32xf32>
    %283 = arith.mulf %281, %282 : vector<8x32xf32>
    %284 = arith.addf %280, %283 : vector<8x32xf32>
    %285 = vector.extract_strided_slice %277 {offsets = [0, 96], sizes = [8, 32], strides = [1, 1]} : vector<8x128xf32> to vector<8x32xf32>
    %286 = math.tanh %284 : vector<8x32xf32>
    %287 = arith.mulf %285, %286 : vector<8x32xf32>
    %288 = vector.extract_strided_slice %159 {offsets = [56, 0], sizes = [8, 128], strides = [1, 1]} : vector<64x128xf32> to vector<8x128xf32>
    %cst_48 = arith.constant dense<0.000000e+00> : vector<8x128xf32>
    %289 = tpu.matmul %287, %155, %cst_48 {dimension_numbers = #tpu.dot_dimension_numbers<[1], [0], [0], [1], [0, 0, 1, 1], [], []>} : vector<8x32xf32>, vector<32x128xf32>, vector<8x128xf32> -> vector<8x128xf32>
    %290 = arith.addf %288, %289 : vector<8x128xf32>
    %291 = arith.negf %290 : vector<8x128xf32>
    %292 = math.exp %291 : vector<8x128xf32>
    %cst_49 = arith.constant 1.000000e+00 : f32
    %293 = vector.broadcast %cst_49 : f32 to vector<8x128xf32>
    %294 = arith.addf %293, %292 : vector<8x128xf32>
    %295 = arith.divf %293, %294 : vector<8x128xf32>
    %296 = math.tanh %290 : vector<8x128xf32>
    %297 = vector.extract_strided_slice %295 {offsets = [0, 32], sizes = [8, 32], strides = [1, 1]} : vector<8x128xf32> to vector<8x32xf32>
    %298 = arith.mulf %297, %284 : vector<8x32xf32>
    %299 = vector.extract_strided_slice %295 {offsets = [0, 0], sizes = [8, 32], strides = [1, 1]} : vector<8x128xf32> to vector<8x32xf32>
    %300 = vector.extract_strided_slice %296 {offsets = [0, 64], sizes = [8, 32], strides = [1, 1]} : vector<8x128xf32> to vector<8x32xf32>
    %301 = arith.mulf %299, %300 : vector<8x32xf32>
    %302 = arith.addf %298, %301 : vector<8x32xf32>
    %303 = vector.extract_strided_slice %295 {offsets = [0, 96], sizes = [8, 32], strides = [1, 1]} : vector<8x128xf32> to vector<8x32xf32>
    %304 = math.tanh %302 : vector<8x32xf32>
    %305 = arith.mulf %303, %304 : vector<8x32xf32>
    %306 = tpu.concatenate %179, %197, %215, %233, %251, %269, %287, %305 in 0 : vector<8x32xf32>, vector<8x32xf32>, vector<8x32xf32>, vector<8x32xf32>, vector<8x32xf32>, vector<8x32xf32>, vector<8x32xf32>, vector<8x32xf32> -> vector<64x32xf32>
    %c0_50 = arith.constant 0 : index
    %c0_51 = arith.constant 0 : index
    %307 = vector.load %arg7[%c0_50, %c0_51] : memref<32x128xf32, #tpu.memory_space<vmem>>, vector<32x128xf32>
    %c0_52 = arith.constant 0 : index
    %c0_53 = arith.constant 0 : index
    %308 = vector.load %arg8[%c0_52, %c0_53] : memref<32x128xf32, #tpu.memory_space<vmem>>, vector<32x128xf32>
    %c0_54 = arith.constant 0 : index
    %c0_55 = arith.constant 0 : index
    %309 = vector.load %arg9[%c0_54, %c0_55] : memref<1x128xf32, #tpu.memory_space<vmem>>, vector<1x128xf32>
    %cst_56 = arith.constant dense<0.000000e+00> : vector<64x128xf32>
    %310 = tpu.matmul %306, %307, %cst_56 {dimension_numbers = #tpu.dot_dimension_numbers<[1], [0], [0], [1], [0, 0, 1, 1], [], []>} : vector<64x32xf32>, vector<32x128xf32>, vector<64x128xf32> -> vector<64x128xf32>
    %311 = vector.broadcast %309 : vector<1x128xf32> to vector<64x128xf32>
    %312 = arith.addf %310, %311 : vector<64x128xf32>
    %cst_57 = arith.constant 0.000000e+00 : f32
    %313 = vector.broadcast %cst_57 : f32 to vector<8x32xf32>
    %cst_58 = arith.constant 0.000000e+00 : f32
    %314 = vector.broadcast %cst_58 : f32 to vector<8x32xf32>
    %315 = vector.extract_strided_slice %312 {offsets = [0, 0], sizes = [8, 128], strides = [1, 1]} : vector<64x128xf32> to vector<8x128xf32>
    %cst_59 = arith.constant dense<0.000000e+00> : vector<8x128xf32>
    %316 = tpu.matmul %313, %308, %cst_59 {dimension_numbers = #tpu.dot_dimension_numbers<[1], [0], [0], [1], [0, 0, 1, 1], [], []>} : vector<8x32xf32>, vector<32x128xf32>, vector<8x128xf32> -> vector<8x128xf32>
    %317 = arith.addf %315, %316 : vector<8x128xf32>
    %318 = arith.negf %317 : vector<8x128xf32>
    %319 = math.exp %318 : vector<8x128xf32>
    %cst_60 = arith.constant 1.000000e+00 : f32
    %320 = vector.broadcast %cst_60 : f32 to vector<8x128xf32>
    %321 = arith.addf %320, %319 : vector<8x128xf32>
    %322 = arith.divf %320, %321 : vector<8x128xf32>
    %323 = math.tanh %317 : vector<8x128xf32>
    %324 = vector.extract_strided_slice %322 {offsets = [0, 32], sizes = [8, 32], strides = [1, 1]} : vector<8x128xf32> to vector<8x32xf32>
    %325 = arith.mulf %324, %314 : vector<8x32xf32>
    %326 = vector.extract_strided_slice %322 {offsets = [0, 0], sizes = [8, 32], strides = [1, 1]} : vector<8x128xf32> to vector<8x32xf32>
    %327 = vector.extract_strided_slice %323 {offsets = [0, 64], sizes = [8, 32], strides = [1, 1]} : vector<8x128xf32> to vector<8x32xf32>
    %328 = arith.mulf %326, %327 : vector<8x32xf32>
    %329 = arith.addf %325, %328 : vector<8x32xf32>
    %330 = vector.extract_strided_slice %322 {offsets = [0, 96], sizes = [8, 32], strides = [1, 1]} : vector<8x128xf32> to vector<8x32xf32>
    %331 = math.tanh %329 : vector<8x32xf32>
    %332 = arith.mulf %330, %331 : vector<8x32xf32>
    %333 = vector.extract_strided_slice %312 {offsets = [8, 0], sizes = [8, 128], strides = [1, 1]} : vector<64x128xf32> to vector<8x128xf32>
    %cst_61 = arith.constant dense<0.000000e+00> : vector<8x128xf32>
    %334 = tpu.matmul %332, %308, %cst_61 {dimension_numbers = #tpu.dot_dimension_numbers<[1], [0], [0], [1], [0, 0, 1, 1], [], []>} : vector<8x32xf32>, vector<32x128xf32>, vector<8x128xf32> -> vector<8x128xf32>
    %335 = arith.addf %333, %334 : vector<8x128xf32>
    %336 = arith.negf %335 : vector<8x128xf32>
    %337 = math.exp %336 : vector<8x128xf32>
    %cst_62 = arith.constant 1.000000e+00 : f32
    %338 = vector.broadcast %cst_62 : f32 to vector<8x128xf32>
    %339 = arith.addf %338, %337 : vector<8x128xf32>
    %340 = arith.divf %338, %339 : vector<8x128xf32>
    %341 = math.tanh %335 : vector<8x128xf32>
    %342 = vector.extract_strided_slice %340 {offsets = [0, 32], sizes = [8, 32], strides = [1, 1]} : vector<8x128xf32> to vector<8x32xf32>
    %343 = arith.mulf %342, %329 : vector<8x32xf32>
    %344 = vector.extract_strided_slice %340 {offsets = [0, 0], sizes = [8, 32], strides = [1, 1]} : vector<8x128xf32> to vector<8x32xf32>
    %345 = vector.extract_strided_slice %341 {offsets = [0, 64], sizes = [8, 32], strides = [1, 1]} : vector<8x128xf32> to vector<8x32xf32>
    %346 = arith.mulf %344, %345 : vector<8x32xf32>
    %347 = arith.addf %343, %346 : vector<8x32xf32>
    %348 = vector.extract_strided_slice %340 {offsets = [0, 96], sizes = [8, 32], strides = [1, 1]} : vector<8x128xf32> to vector<8x32xf32>
    %349 = math.tanh %347 : vector<8x32xf32>
    %350 = arith.mulf %348, %349 : vector<8x32xf32>
    %351 = vector.extract_strided_slice %312 {offsets = [16, 0], sizes = [8, 128], strides = [1, 1]} : vector<64x128xf32> to vector<8x128xf32>
    %cst_63 = arith.constant dense<0.000000e+00> : vector<8x128xf32>
    %352 = tpu.matmul %350, %308, %cst_63 {dimension_numbers = #tpu.dot_dimension_numbers<[1], [0], [0], [1], [0, 0, 1, 1], [], []>} : vector<8x32xf32>, vector<32x128xf32>, vector<8x128xf32> -> vector<8x128xf32>
    %353 = arith.addf %351, %352 : vector<8x128xf32>
    %354 = arith.negf %353 : vector<8x128xf32>
    %355 = math.exp %354 : vector<8x128xf32>
    %cst_64 = arith.constant 1.000000e+00 : f32
    %356 = vector.broadcast %cst_64 : f32 to vector<8x128xf32>
    %357 = arith.addf %356, %355 : vector<8x128xf32>
    %358 = arith.divf %356, %357 : vector<8x128xf32>
    %359 = math.tanh %353 : vector<8x128xf32>
    %360 = vector.extract_strided_slice %358 {offsets = [0, 32], sizes = [8, 32], strides = [1, 1]} : vector<8x128xf32> to vector<8x32xf32>
    %361 = arith.mulf %360, %347 : vector<8x32xf32>
    %362 = vector.extract_strided_slice %358 {offsets = [0, 0], sizes = [8, 32], strides = [1, 1]} : vector<8x128xf32> to vector<8x32xf32>
    %363 = vector.extract_strided_slice %359 {offsets = [0, 64], sizes = [8, 32], strides = [1, 1]} : vector<8x128xf32> to vector<8x32xf32>
    %364 = arith.mulf %362, %363 : vector<8x32xf32>
    %365 = arith.addf %361, %364 : vector<8x32xf32>
    %366 = vector.extract_strided_slice %358 {offsets = [0, 96], sizes = [8, 32], strides = [1, 1]} : vector<8x128xf32> to vector<8x32xf32>
    %367 = math.tanh %365 : vector<8x32xf32>
    %368 = arith.mulf %366, %367 : vector<8x32xf32>
    %369 = vector.extract_strided_slice %312 {offsets = [24, 0], sizes = [8, 128], strides = [1, 1]} : vector<64x128xf32> to vector<8x128xf32>
    %cst_65 = arith.constant dense<0.000000e+00> : vector<8x128xf32>
    %370 = tpu.matmul %368, %308, %cst_65 {dimension_numbers = #tpu.dot_dimension_numbers<[1], [0], [0], [1], [0, 0, 1, 1], [], []>} : vector<8x32xf32>, vector<32x128xf32>, vector<8x128xf32> -> vector<8x128xf32>
    %371 = arith.addf %369, %370 : vector<8x128xf32>
    %372 = arith.negf %371 : vector<8x128xf32>
    %373 = math.exp %372 : vector<8x128xf32>
    %cst_66 = arith.constant 1.000000e+00 : f32
    %374 = vector.broadcast %cst_66 : f32 to vector<8x128xf32>
    %375 = arith.addf %374, %373 : vector<8x128xf32>
    %376 = arith.divf %374, %375 : vector<8x128xf32>
    %377 = math.tanh %371 : vector<8x128xf32>
    %378 = vector.extract_strided_slice %376 {offsets = [0, 32], sizes = [8, 32], strides = [1, 1]} : vector<8x128xf32> to vector<8x32xf32>
    %379 = arith.mulf %378, %365 : vector<8x32xf32>
    %380 = vector.extract_strided_slice %376 {offsets = [0, 0], sizes = [8, 32], strides = [1, 1]} : vector<8x128xf32> to vector<8x32xf32>
    %381 = vector.extract_strided_slice %377 {offsets = [0, 64], sizes = [8, 32], strides = [1, 1]} : vector<8x128xf32> to vector<8x32xf32>
    %382 = arith.mulf %380, %381 : vector<8x32xf32>
    %383 = arith.addf %379, %382 : vector<8x32xf32>
    %384 = vector.extract_strided_slice %376 {offsets = [0, 96], sizes = [8, 32], strides = [1, 1]} : vector<8x128xf32> to vector<8x32xf32>
    %385 = math.tanh %383 : vector<8x32xf32>
    %386 = arith.mulf %384, %385 : vector<8x32xf32>
    %387 = vector.extract_strided_slice %312 {offsets = [32, 0], sizes = [8, 128], strides = [1, 1]} : vector<64x128xf32> to vector<8x128xf32>
    %cst_67 = arith.constant dense<0.000000e+00> : vector<8x128xf32>
    %388 = tpu.matmul %386, %308, %cst_67 {dimension_numbers = #tpu.dot_dimension_numbers<[1], [0], [0], [1], [0, 0, 1, 1], [], []>} : vector<8x32xf32>, vector<32x128xf32>, vector<8x128xf32> -> vector<8x128xf32>
    %389 = arith.addf %387, %388 : vector<8x128xf32>
    %390 = arith.negf %389 : vector<8x128xf32>
    %391 = math.exp %390 : vector<8x128xf32>
    %cst_68 = arith.constant 1.000000e+00 : f32
    %392 = vector.broadcast %cst_68 : f32 to vector<8x128xf32>
    %393 = arith.addf %392, %391 : vector<8x128xf32>
    %394 = arith.divf %392, %393 : vector<8x128xf32>
    %395 = math.tanh %389 : vector<8x128xf32>
    %396 = vector.extract_strided_slice %394 {offsets = [0, 32], sizes = [8, 32], strides = [1, 1]} : vector<8x128xf32> to vector<8x32xf32>
    %397 = arith.mulf %396, %383 : vector<8x32xf32>
    %398 = vector.extract_strided_slice %394 {offsets = [0, 0], sizes = [8, 32], strides = [1, 1]} : vector<8x128xf32> to vector<8x32xf32>
    %399 = vector.extract_strided_slice %395 {offsets = [0, 64], sizes = [8, 32], strides = [1, 1]} : vector<8x128xf32> to vector<8x32xf32>
    %400 = arith.mulf %398, %399 : vector<8x32xf32>
    %401 = arith.addf %397, %400 : vector<8x32xf32>
    %402 = vector.extract_strided_slice %394 {offsets = [0, 96], sizes = [8, 32], strides = [1, 1]} : vector<8x128xf32> to vector<8x32xf32>
    %403 = math.tanh %401 : vector<8x32xf32>
    %404 = arith.mulf %402, %403 : vector<8x32xf32>
    %405 = vector.extract_strided_slice %312 {offsets = [40, 0], sizes = [8, 128], strides = [1, 1]} : vector<64x128xf32> to vector<8x128xf32>
    %cst_69 = arith.constant dense<0.000000e+00> : vector<8x128xf32>
    %406 = tpu.matmul %404, %308, %cst_69 {dimension_numbers = #tpu.dot_dimension_numbers<[1], [0], [0], [1], [0, 0, 1, 1], [], []>} : vector<8x32xf32>, vector<32x128xf32>, vector<8x128xf32> -> vector<8x128xf32>
    %407 = arith.addf %405, %406 : vector<8x128xf32>
    %408 = arith.negf %407 : vector<8x128xf32>
    %409 = math.exp %408 : vector<8x128xf32>
    %cst_70 = arith.constant 1.000000e+00 : f32
    %410 = vector.broadcast %cst_70 : f32 to vector<8x128xf32>
    %411 = arith.addf %410, %409 : vector<8x128xf32>
    %412 = arith.divf %410, %411 : vector<8x128xf32>
    %413 = math.tanh %407 : vector<8x128xf32>
    %414 = vector.extract_strided_slice %412 {offsets = [0, 32], sizes = [8, 32], strides = [1, 1]} : vector<8x128xf32> to vector<8x32xf32>
    %415 = arith.mulf %414, %401 : vector<8x32xf32>
    %416 = vector.extract_strided_slice %412 {offsets = [0, 0], sizes = [8, 32], strides = [1, 1]} : vector<8x128xf32> to vector<8x32xf32>
    %417 = vector.extract_strided_slice %413 {offsets = [0, 64], sizes = [8, 32], strides = [1, 1]} : vector<8x128xf32> to vector<8x32xf32>
    %418 = arith.mulf %416, %417 : vector<8x32xf32>
    %419 = arith.addf %415, %418 : vector<8x32xf32>
    %420 = vector.extract_strided_slice %412 {offsets = [0, 96], sizes = [8, 32], strides = [1, 1]} : vector<8x128xf32> to vector<8x32xf32>
    %421 = math.tanh %419 : vector<8x32xf32>
    %422 = arith.mulf %420, %421 : vector<8x32xf32>
    %423 = vector.extract_strided_slice %312 {offsets = [48, 0], sizes = [8, 128], strides = [1, 1]} : vector<64x128xf32> to vector<8x128xf32>
    %cst_71 = arith.constant dense<0.000000e+00> : vector<8x128xf32>
    %424 = tpu.matmul %422, %308, %cst_71 {dimension_numbers = #tpu.dot_dimension_numbers<[1], [0], [0], [1], [0, 0, 1, 1], [], []>} : vector<8x32xf32>, vector<32x128xf32>, vector<8x128xf32> -> vector<8x128xf32>
    %425 = arith.addf %423, %424 : vector<8x128xf32>
    %426 = arith.negf %425 : vector<8x128xf32>
    %427 = math.exp %426 : vector<8x128xf32>
    %cst_72 = arith.constant 1.000000e+00 : f32
    %428 = vector.broadcast %cst_72 : f32 to vector<8x128xf32>
    %429 = arith.addf %428, %427 : vector<8x128xf32>
    %430 = arith.divf %428, %429 : vector<8x128xf32>
    %431 = math.tanh %425 : vector<8x128xf32>
    %432 = vector.extract_strided_slice %430 {offsets = [0, 32], sizes = [8, 32], strides = [1, 1]} : vector<8x128xf32> to vector<8x32xf32>
    %433 = arith.mulf %432, %419 : vector<8x32xf32>
    %434 = vector.extract_strided_slice %430 {offsets = [0, 0], sizes = [8, 32], strides = [1, 1]} : vector<8x128xf32> to vector<8x32xf32>
    %435 = vector.extract_strided_slice %431 {offsets = [0, 64], sizes = [8, 32], strides = [1, 1]} : vector<8x128xf32> to vector<8x32xf32>
    %436 = arith.mulf %434, %435 : vector<8x32xf32>
    %437 = arith.addf %433, %436 : vector<8x32xf32>
    %438 = vector.extract_strided_slice %430 {offsets = [0, 96], sizes = [8, 32], strides = [1, 1]} : vector<8x128xf32> to vector<8x32xf32>
    %439 = math.tanh %437 : vector<8x32xf32>
    %440 = arith.mulf %438, %439 : vector<8x32xf32>
    %441 = vector.extract_strided_slice %312 {offsets = [56, 0], sizes = [8, 128], strides = [1, 1]} : vector<64x128xf32> to vector<8x128xf32>
    %cst_73 = arith.constant dense<0.000000e+00> : vector<8x128xf32>
    %442 = tpu.matmul %440, %308, %cst_73 {dimension_numbers = #tpu.dot_dimension_numbers<[1], [0], [0], [1], [0, 0, 1, 1], [], []>} : vector<8x32xf32>, vector<32x128xf32>, vector<8x128xf32> -> vector<8x128xf32>
    %443 = arith.addf %441, %442 : vector<8x128xf32>
    %444 = arith.negf %443 : vector<8x128xf32>
    %445 = math.exp %444 : vector<8x128xf32>
    %cst_74 = arith.constant 1.000000e+00 : f32
    %446 = vector.broadcast %cst_74 : f32 to vector<8x128xf32>
    %447 = arith.addf %446, %445 : vector<8x128xf32>
    %448 = arith.divf %446, %447 : vector<8x128xf32>
    %449 = math.tanh %443 : vector<8x128xf32>
    %450 = vector.extract_strided_slice %448 {offsets = [0, 32], sizes = [8, 32], strides = [1, 1]} : vector<8x128xf32> to vector<8x32xf32>
    %451 = arith.mulf %450, %437 : vector<8x32xf32>
    %452 = vector.extract_strided_slice %448 {offsets = [0, 0], sizes = [8, 32], strides = [1, 1]} : vector<8x128xf32> to vector<8x32xf32>
    %453 = vector.extract_strided_slice %449 {offsets = [0, 64], sizes = [8, 32], strides = [1, 1]} : vector<8x128xf32> to vector<8x32xf32>
    %454 = arith.mulf %452, %453 : vector<8x32xf32>
    %455 = arith.addf %451, %454 : vector<8x32xf32>
    %456 = vector.extract_strided_slice %448 {offsets = [0, 96], sizes = [8, 32], strides = [1, 1]} : vector<8x128xf32> to vector<8x32xf32>
    %457 = math.tanh %455 : vector<8x32xf32>
    %458 = arith.mulf %456, %457 : vector<8x32xf32>
    %459 = tpu.concatenate %332, %350, %368, %386, %404, %422, %440, %458 in 0 : vector<8x32xf32>, vector<8x32xf32>, vector<8x32xf32>, vector<8x32xf32>, vector<8x32xf32>, vector<8x32xf32>, vector<8x32xf32>, vector<8x32xf32> -> vector<64x32xf32>
    %c0_75 = arith.constant 0 : index
    %c0_76 = arith.constant 0 : index
    %460 = vector.load %arg10[%c0_75, %c0_76] : memref<32x128xf32, #tpu.memory_space<vmem>>, vector<32x128xf32>
    %c0_77 = arith.constant 0 : index
    %c0_78 = arith.constant 0 : index
    %461 = vector.load %arg11[%c0_77, %c0_78] : memref<32x128xf32, #tpu.memory_space<vmem>>, vector<32x128xf32>
    %c0_79 = arith.constant 0 : index
    %c0_80 = arith.constant 0 : index
    %462 = vector.load %arg12[%c0_79, %c0_80] : memref<1x128xf32, #tpu.memory_space<vmem>>, vector<1x128xf32>
    %cst_81 = arith.constant dense<0.000000e+00> : vector<64x128xf32>
    %463 = tpu.matmul %459, %460, %cst_81 {dimension_numbers = #tpu.dot_dimension_numbers<[1], [0], [0], [1], [0, 0, 1, 1], [], []>} : vector<64x32xf32>, vector<32x128xf32>, vector<64x128xf32> -> vector<64x128xf32>
    %464 = vector.broadcast %462 : vector<1x128xf32> to vector<64x128xf32>
    %465 = arith.addf %463, %464 : vector<64x128xf32>
    %cst_82 = arith.constant 0.000000e+00 : f32
    %466 = vector.broadcast %cst_82 : f32 to vector<8x32xf32>
    %cst_83 = arith.constant 0.000000e+00 : f32
    %467 = vector.broadcast %cst_83 : f32 to vector<8x32xf32>
    %468 = vector.extract_strided_slice %465 {offsets = [0, 0], sizes = [8, 128], strides = [1, 1]} : vector<64x128xf32> to vector<8x128xf32>
    %cst_84 = arith.constant dense<0.000000e+00> : vector<8x128xf32>
    %469 = tpu.matmul %466, %461, %cst_84 {dimension_numbers = #tpu.dot_dimension_numbers<[1], [0], [0], [1], [0, 0, 1, 1], [], []>} : vector<8x32xf32>, vector<32x128xf32>, vector<8x128xf32> -> vector<8x128xf32>
    %470 = arith.addf %468, %469 : vector<8x128xf32>
    %471 = arith.negf %470 : vector<8x128xf32>
    %472 = math.exp %471 : vector<8x128xf32>
    %cst_85 = arith.constant 1.000000e+00 : f32
    %473 = vector.broadcast %cst_85 : f32 to vector<8x128xf32>
    %474 = arith.addf %473, %472 : vector<8x128xf32>
    %475 = arith.divf %473, %474 : vector<8x128xf32>
    %476 = math.tanh %470 : vector<8x128xf32>
    %477 = vector.extract_strided_slice %475 {offsets = [0, 32], sizes = [8, 32], strides = [1, 1]} : vector<8x128xf32> to vector<8x32xf32>
    %478 = arith.mulf %477, %467 : vector<8x32xf32>
    %479 = vector.extract_strided_slice %475 {offsets = [0, 0], sizes = [8, 32], strides = [1, 1]} : vector<8x128xf32> to vector<8x32xf32>
    %480 = vector.extract_strided_slice %476 {offsets = [0, 64], sizes = [8, 32], strides = [1, 1]} : vector<8x128xf32> to vector<8x32xf32>
    %481 = arith.mulf %479, %480 : vector<8x32xf32>
    %482 = arith.addf %478, %481 : vector<8x32xf32>
    %483 = vector.extract_strided_slice %475 {offsets = [0, 96], sizes = [8, 32], strides = [1, 1]} : vector<8x128xf32> to vector<8x32xf32>
    %484 = math.tanh %482 : vector<8x32xf32>
    %485 = arith.mulf %483, %484 : vector<8x32xf32>
    %486 = vector.extract_strided_slice %465 {offsets = [8, 0], sizes = [8, 128], strides = [1, 1]} : vector<64x128xf32> to vector<8x128xf32>
    %cst_86 = arith.constant dense<0.000000e+00> : vector<8x128xf32>
    %487 = tpu.matmul %485, %461, %cst_86 {dimension_numbers = #tpu.dot_dimension_numbers<[1], [0], [0], [1], [0, 0, 1, 1], [], []>} : vector<8x32xf32>, vector<32x128xf32>, vector<8x128xf32> -> vector<8x128xf32>
    %488 = arith.addf %486, %487 : vector<8x128xf32>
    %489 = arith.negf %488 : vector<8x128xf32>
    %490 = math.exp %489 : vector<8x128xf32>
    %cst_87 = arith.constant 1.000000e+00 : f32
    %491 = vector.broadcast %cst_87 : f32 to vector<8x128xf32>
    %492 = arith.addf %491, %490 : vector<8x128xf32>
    %493 = arith.divf %491, %492 : vector<8x128xf32>
    %494 = math.tanh %488 : vector<8x128xf32>
    %495 = vector.extract_strided_slice %493 {offsets = [0, 32], sizes = [8, 32], strides = [1, 1]} : vector<8x128xf32> to vector<8x32xf32>
    %496 = arith.mulf %495, %482 : vector<8x32xf32>
    %497 = vector.extract_strided_slice %493 {offsets = [0, 0], sizes = [8, 32], strides = [1, 1]} : vector<8x128xf32> to vector<8x32xf32>
    %498 = vector.extract_strided_slice %494 {offsets = [0, 64], sizes = [8, 32], strides = [1, 1]} : vector<8x128xf32> to vector<8x32xf32>
    %499 = arith.mulf %497, %498 : vector<8x32xf32>
    %500 = arith.addf %496, %499 : vector<8x32xf32>
    %501 = vector.extract_strided_slice %493 {offsets = [0, 96], sizes = [8, 32], strides = [1, 1]} : vector<8x128xf32> to vector<8x32xf32>
    %502 = math.tanh %500 : vector<8x32xf32>
    %503 = arith.mulf %501, %502 : vector<8x32xf32>
    %504 = vector.extract_strided_slice %465 {offsets = [16, 0], sizes = [8, 128], strides = [1, 1]} : vector<64x128xf32> to vector<8x128xf32>
    %cst_88 = arith.constant dense<0.000000e+00> : vector<8x128xf32>
    %505 = tpu.matmul %503, %461, %cst_88 {dimension_numbers = #tpu.dot_dimension_numbers<[1], [0], [0], [1], [0, 0, 1, 1], [], []>} : vector<8x32xf32>, vector<32x128xf32>, vector<8x128xf32> -> vector<8x128xf32>
    %506 = arith.addf %504, %505 : vector<8x128xf32>
    %507 = arith.negf %506 : vector<8x128xf32>
    %508 = math.exp %507 : vector<8x128xf32>
    %cst_89 = arith.constant 1.000000e+00 : f32
    %509 = vector.broadcast %cst_89 : f32 to vector<8x128xf32>
    %510 = arith.addf %509, %508 : vector<8x128xf32>
    %511 = arith.divf %509, %510 : vector<8x128xf32>
    %512 = math.tanh %506 : vector<8x128xf32>
    %513 = vector.extract_strided_slice %511 {offsets = [0, 32], sizes = [8, 32], strides = [1, 1]} : vector<8x128xf32> to vector<8x32xf32>
    %514 = arith.mulf %513, %500 : vector<8x32xf32>
    %515 = vector.extract_strided_slice %511 {offsets = [0, 0], sizes = [8, 32], strides = [1, 1]} : vector<8x128xf32> to vector<8x32xf32>
    %516 = vector.extract_strided_slice %512 {offsets = [0, 64], sizes = [8, 32], strides = [1, 1]} : vector<8x128xf32> to vector<8x32xf32>
    %517 = arith.mulf %515, %516 : vector<8x32xf32>
    %518 = arith.addf %514, %517 : vector<8x32xf32>
    %519 = vector.extract_strided_slice %511 {offsets = [0, 96], sizes = [8, 32], strides = [1, 1]} : vector<8x128xf32> to vector<8x32xf32>
    %520 = math.tanh %518 : vector<8x32xf32>
    %521 = arith.mulf %519, %520 : vector<8x32xf32>
    %522 = vector.extract_strided_slice %465 {offsets = [24, 0], sizes = [8, 128], strides = [1, 1]} : vector<64x128xf32> to vector<8x128xf32>
    %cst_90 = arith.constant dense<0.000000e+00> : vector<8x128xf32>
    %523 = tpu.matmul %521, %461, %cst_90 {dimension_numbers = #tpu.dot_dimension_numbers<[1], [0], [0], [1], [0, 0, 1, 1], [], []>} : vector<8x32xf32>, vector<32x128xf32>, vector<8x128xf32> -> vector<8x128xf32>
    %524 = arith.addf %522, %523 : vector<8x128xf32>
    %525 = arith.negf %524 : vector<8x128xf32>
    %526 = math.exp %525 : vector<8x128xf32>
    %cst_91 = arith.constant 1.000000e+00 : f32
    %527 = vector.broadcast %cst_91 : f32 to vector<8x128xf32>
    %528 = arith.addf %527, %526 : vector<8x128xf32>
    %529 = arith.divf %527, %528 : vector<8x128xf32>
    %530 = math.tanh %524 : vector<8x128xf32>
    %531 = vector.extract_strided_slice %529 {offsets = [0, 32], sizes = [8, 32], strides = [1, 1]} : vector<8x128xf32> to vector<8x32xf32>
    %532 = arith.mulf %531, %518 : vector<8x32xf32>
    %533 = vector.extract_strided_slice %529 {offsets = [0, 0], sizes = [8, 32], strides = [1, 1]} : vector<8x128xf32> to vector<8x32xf32>
    %534 = vector.extract_strided_slice %530 {offsets = [0, 64], sizes = [8, 32], strides = [1, 1]} : vector<8x128xf32> to vector<8x32xf32>
    %535 = arith.mulf %533, %534 : vector<8x32xf32>
    %536 = arith.addf %532, %535 : vector<8x32xf32>
    %537 = vector.extract_strided_slice %529 {offsets = [0, 96], sizes = [8, 32], strides = [1, 1]} : vector<8x128xf32> to vector<8x32xf32>
    %538 = math.tanh %536 : vector<8x32xf32>
    %539 = arith.mulf %537, %538 : vector<8x32xf32>
    %540 = vector.extract_strided_slice %465 {offsets = [32, 0], sizes = [8, 128], strides = [1, 1]} : vector<64x128xf32> to vector<8x128xf32>
    %cst_92 = arith.constant dense<0.000000e+00> : vector<8x128xf32>
    %541 = tpu.matmul %539, %461, %cst_92 {dimension_numbers = #tpu.dot_dimension_numbers<[1], [0], [0], [1], [0, 0, 1, 1], [], []>} : vector<8x32xf32>, vector<32x128xf32>, vector<8x128xf32> -> vector<8x128xf32>
    %542 = arith.addf %540, %541 : vector<8x128xf32>
    %543 = arith.negf %542 : vector<8x128xf32>
    %544 = math.exp %543 : vector<8x128xf32>
    %cst_93 = arith.constant 1.000000e+00 : f32
    %545 = vector.broadcast %cst_93 : f32 to vector<8x128xf32>
    %546 = arith.addf %545, %544 : vector<8x128xf32>
    %547 = arith.divf %545, %546 : vector<8x128xf32>
    %548 = math.tanh %542 : vector<8x128xf32>
    %549 = vector.extract_strided_slice %547 {offsets = [0, 32], sizes = [8, 32], strides = [1, 1]} : vector<8x128xf32> to vector<8x32xf32>
    %550 = arith.mulf %549, %536 : vector<8x32xf32>
    %551 = vector.extract_strided_slice %547 {offsets = [0, 0], sizes = [8, 32], strides = [1, 1]} : vector<8x128xf32> to vector<8x32xf32>
    %552 = vector.extract_strided_slice %548 {offsets = [0, 64], sizes = [8, 32], strides = [1, 1]} : vector<8x128xf32> to vector<8x32xf32>
    %553 = arith.mulf %551, %552 : vector<8x32xf32>
    %554 = arith.addf %550, %553 : vector<8x32xf32>
    %555 = vector.extract_strided_slice %547 {offsets = [0, 96], sizes = [8, 32], strides = [1, 1]} : vector<8x128xf32> to vector<8x32xf32>
    %556 = math.tanh %554 : vector<8x32xf32>
    %557 = arith.mulf %555, %556 : vector<8x32xf32>
    %558 = vector.extract_strided_slice %465 {offsets = [40, 0], sizes = [8, 128], strides = [1, 1]} : vector<64x128xf32> to vector<8x128xf32>
    %cst_94 = arith.constant dense<0.000000e+00> : vector<8x128xf32>
    %559 = tpu.matmul %557, %461, %cst_94 {dimension_numbers = #tpu.dot_dimension_numbers<[1], [0], [0], [1], [0, 0, 1, 1], [], []>} : vector<8x32xf32>, vector<32x128xf32>, vector<8x128xf32> -> vector<8x128xf32>
    %560 = arith.addf %558, %559 : vector<8x128xf32>
    %561 = arith.negf %560 : vector<8x128xf32>
    %562 = math.exp %561 : vector<8x128xf32>
    %cst_95 = arith.constant 1.000000e+00 : f32
    %563 = vector.broadcast %cst_95 : f32 to vector<8x128xf32>
    %564 = arith.addf %563, %562 : vector<8x128xf32>
    %565 = arith.divf %563, %564 : vector<8x128xf32>
    %566 = math.tanh %560 : vector<8x128xf32>
    %567 = vector.extract_strided_slice %565 {offsets = [0, 32], sizes = [8, 32], strides = [1, 1]} : vector<8x128xf32> to vector<8x32xf32>
    %568 = arith.mulf %567, %554 : vector<8x32xf32>
    %569 = vector.extract_strided_slice %565 {offsets = [0, 0], sizes = [8, 32], strides = [1, 1]} : vector<8x128xf32> to vector<8x32xf32>
    %570 = vector.extract_strided_slice %566 {offsets = [0, 64], sizes = [8, 32], strides = [1, 1]} : vector<8x128xf32> to vector<8x32xf32>
    %571 = arith.mulf %569, %570 : vector<8x32xf32>
    %572 = arith.addf %568, %571 : vector<8x32xf32>
    %573 = vector.extract_strided_slice %565 {offsets = [0, 96], sizes = [8, 32], strides = [1, 1]} : vector<8x128xf32> to vector<8x32xf32>
    %574 = math.tanh %572 : vector<8x32xf32>
    %575 = arith.mulf %573, %574 : vector<8x32xf32>
    %576 = vector.extract_strided_slice %465 {offsets = [48, 0], sizes = [8, 128], strides = [1, 1]} : vector<64x128xf32> to vector<8x128xf32>
    %cst_96 = arith.constant dense<0.000000e+00> : vector<8x128xf32>
    %577 = tpu.matmul %575, %461, %cst_96 {dimension_numbers = #tpu.dot_dimension_numbers<[1], [0], [0], [1], [0, 0, 1, 1], [], []>} : vector<8x32xf32>, vector<32x128xf32>, vector<8x128xf32> -> vector<8x128xf32>
    %578 = arith.addf %576, %577 : vector<8x128xf32>
    %579 = arith.negf %578 : vector<8x128xf32>
    %580 = math.exp %579 : vector<8x128xf32>
    %cst_97 = arith.constant 1.000000e+00 : f32
    %581 = vector.broadcast %cst_97 : f32 to vector<8x128xf32>
    %582 = arith.addf %581, %580 : vector<8x128xf32>
    %583 = arith.divf %581, %582 : vector<8x128xf32>
    %584 = math.tanh %578 : vector<8x128xf32>
    %585 = vector.extract_strided_slice %583 {offsets = [0, 32], sizes = [8, 32], strides = [1, 1]} : vector<8x128xf32> to vector<8x32xf32>
    %586 = arith.mulf %585, %572 : vector<8x32xf32>
    %587 = vector.extract_strided_slice %583 {offsets = [0, 0], sizes = [8, 32], strides = [1, 1]} : vector<8x128xf32> to vector<8x32xf32>
    %588 = vector.extract_strided_slice %584 {offsets = [0, 64], sizes = [8, 32], strides = [1, 1]} : vector<8x128xf32> to vector<8x32xf32>
    %589 = arith.mulf %587, %588 : vector<8x32xf32>
    %590 = arith.addf %586, %589 : vector<8x32xf32>
    %591 = vector.extract_strided_slice %583 {offsets = [0, 96], sizes = [8, 32], strides = [1, 1]} : vector<8x128xf32> to vector<8x32xf32>
    %592 = math.tanh %590 : vector<8x32xf32>
    %593 = arith.mulf %591, %592 : vector<8x32xf32>
    %594 = vector.extract_strided_slice %465 {offsets = [56, 0], sizes = [8, 128], strides = [1, 1]} : vector<64x128xf32> to vector<8x128xf32>
    %cst_98 = arith.constant dense<0.000000e+00> : vector<8x128xf32>
    %595 = tpu.matmul %593, %461, %cst_98 {dimension_numbers = #tpu.dot_dimension_numbers<[1], [0], [0], [1], [0, 0, 1, 1], [], []>} : vector<8x32xf32>, vector<32x128xf32>, vector<8x128xf32> -> vector<8x128xf32>
    %596 = arith.addf %594, %595 : vector<8x128xf32>
    %597 = arith.negf %596 : vector<8x128xf32>
    %598 = math.exp %597 : vector<8x128xf32>
    %cst_99 = arith.constant 1.000000e+00 : f32
    %599 = vector.broadcast %cst_99 : f32 to vector<8x128xf32>
    %600 = arith.addf %599, %598 : vector<8x128xf32>
    %601 = arith.divf %599, %600 : vector<8x128xf32>
    %602 = math.tanh %596 : vector<8x128xf32>
    %603 = vector.extract_strided_slice %601 {offsets = [0, 32], sizes = [8, 32], strides = [1, 1]} : vector<8x128xf32> to vector<8x32xf32>
    %604 = arith.mulf %603, %590 : vector<8x32xf32>
    %605 = vector.extract_strided_slice %601 {offsets = [0, 0], sizes = [8, 32], strides = [1, 1]} : vector<8x128xf32> to vector<8x32xf32>
    %606 = vector.extract_strided_slice %602 {offsets = [0, 64], sizes = [8, 32], strides = [1, 1]} : vector<8x128xf32> to vector<8x32xf32>
    %607 = arith.mulf %605, %606 : vector<8x32xf32>
    %608 = arith.addf %604, %607 : vector<8x32xf32>
    %609 = vector.extract_strided_slice %601 {offsets = [0, 96], sizes = [8, 32], strides = [1, 1]} : vector<8x128xf32> to vector<8x32xf32>
    %610 = math.tanh %608 : vector<8x32xf32>
    %611 = arith.mulf %609, %610 : vector<8x32xf32>
    %c0_100 = arith.constant 0 : index
    %c0_101 = arith.constant 0 : index
    %612 = vector.load %arg13[%c0_100, %c0_101] : memref<32x32xf32, #tpu.memory_space<vmem>>, vector<32x32xf32>
    %cst_102 = arith.constant dense<0.000000e+00> : vector<8x32xf32>
    %613 = tpu.matmul %611, %612, %cst_102 {dimension_numbers = #tpu.dot_dimension_numbers<[1], [0], [0], [1], [0, 0, 1, 1], [], []>} : vector<8x32xf32>, vector<32x32xf32>, vector<8x32xf32> -> vector<8x32xf32>
    %c0_103 = arith.constant 0 : index
    %c0_104 = arith.constant 0 : index
    %614 = vector.load %arg14[%c0_103, %c0_104] : memref<1x32xf32, #tpu.memory_space<vmem>>, vector<1x32xf32>
    %615 = vector.broadcast %614 : vector<1x32xf32> to vector<8x32xf32>
    %616 = arith.addf %613, %615 : vector<8x32xf32>
    %cst_105 = arith.constant 0.000000e+00 : f32
    %617 = vector.broadcast %cst_105 : f32 to vector<8x32xf32>
    %618 = arith.cmpf ogt, %616, %617 : vector<8x32xf32>
    %cst_106 = arith.constant 0.00999999977 : f32
    %619 = vector.broadcast %cst_106 : f32 to vector<8x32xf32>
    %620 = arith.mulf %619, %616 : vector<8x32xf32>
    %621 = arith.select %618, %616, %620 : vector<8x32xi1>, vector<8x32xf32>
    %c0_107 = arith.constant 0 : index
    %c0_108 = arith.constant 0 : index
    %622 = vector.load %arg15[%c0_107, %c0_108] : memref<32x32xf32, #tpu.memory_space<vmem>>, vector<32x32xf32>
    %cst_109 = arith.constant dense<0.000000e+00> : vector<8x32xf32>
    %623 = tpu.matmul %621, %622, %cst_109 {dimension_numbers = #tpu.dot_dimension_numbers<[1], [0], [0], [1], [0, 0, 1, 1], [], []>} : vector<8x32xf32>, vector<32x32xf32>, vector<8x32xf32> -> vector<8x32xf32>
    %c0_110 = arith.constant 0 : index
    %c0_111 = arith.constant 0 : index
    %624 = vector.load %arg16[%c0_110, %c0_111] : memref<1x32xf32, #tpu.memory_space<vmem>>, vector<1x32xf32>
    %625 = vector.broadcast %624 : vector<1x32xf32> to vector<8x32xf32>
    %626 = arith.addf %623, %625 : vector<8x32xf32>
    %cst_112 = arith.constant 0.000000e+00 : f32
    %627 = vector.broadcast %cst_112 : f32 to vector<8x32xf32>
    %628 = arith.cmpf ogt, %626, %627 : vector<8x32xf32>
    %cst_113 = arith.constant 0.00999999977 : f32
    %629 = vector.broadcast %cst_113 : f32 to vector<8x32xf32>
    %630 = arith.mulf %629, %626 : vector<8x32xf32>
    %631 = arith.select %628, %626, %630 : vector<8x32xi1>, vector<8x32xf32>
    %c0_114 = arith.constant 0 : index
    %c0_115 = arith.constant 0 : index
    %632 = vector.load %arg17[%c0_114, %c0_115] : memref<32x32xf32, #tpu.memory_space<vmem>>, vector<32x32xf32>
    %cst_116 = arith.constant dense<0.000000e+00> : vector<8x32xf32>
    %633 = tpu.matmul %631, %632, %cst_116 {dimension_numbers = #tpu.dot_dimension_numbers<[1], [0], [0], [1], [0, 0, 1, 1], [], []>} : vector<8x32xf32>, vector<32x32xf32>, vector<8x32xf32> -> vector<8x32xf32>
    %c0_117 = arith.constant 0 : index
    %c0_118 = arith.constant 0 : index
    %634 = vector.load %arg18[%c0_117, %c0_118] : memref<1x32xf32, #tpu.memory_space<vmem>>, vector<1x32xf32>
    %635 = vector.broadcast %634 : vector<1x32xf32> to vector<8x32xf32>
    %636 = arith.addf %633, %635 : vector<8x32xf32>
    %cst_119 = arith.constant 0.000000e+00 : f32
    %637 = vector.broadcast %cst_119 : f32 to vector<8x32xf32>
    %638 = arith.maximumf %636, %637 : vector<8x32xf32>
    %c0_120 = arith.constant 0 : index
    %c0_121 = arith.constant 0 : index
    %639 = vector.load %arg19[%c0_120, %c0_121] : memref<32x128xf32, #tpu.memory_space<vmem>>, vector<32x128xf32>
    %cst_122 = arith.constant dense<0.000000e+00> : vector<8x128xf32>
    %640 = tpu.matmul %638, %639, %cst_122 {dimension_numbers = #tpu.dot_dimension_numbers<[1], [0], [0], [1], [0, 0, 1, 1], [], []>} : vector<8x32xf32>, vector<32x128xf32>, vector<8x128xf32> -> vector<8x128xf32>
    %c0_123 = arith.constant 0 : index
    %c0_124 = arith.constant 0 : index
    %641 = vector.load %arg20[%c0_123, %c0_124] : memref<1x128xf32, #tpu.memory_space<vmem>>, vector<1x128xf32>
    %642 = vector.broadcast %641 : vector<1x128xf32> to vector<8x128xf32>
    %643 = arith.addf %640, %642 : vector<8x128xf32>
    %c0_125 = arith.constant 0 : index
    %c0_126 = arith.constant 0 : index
    %644 = vector.load %arg21[%c0_125, %c0_126] : memref<8x128xf32, #tpu.memory_space<vmem>>, vector<8x128xf32>
    tpu.vector_store %arg21[%c0_125, %c0_126], %643 {strides = array<i32>} : memref<8x128xf32, #tpu.memory_space<vmem>>, vector<8x128xf32>,
    return
  }
}

</mosaic_0001>

<bundles_post_ra>
// kernel: lstm_model_forward.1
= control target key start
LH: loop header
LB: loop body
LE: loop exit
PB: predicated region body
PF: predicated region fallthrough
CT: control target
= control target key end

     0   :  { %s6430_s0 = inlined_call_operand.vmem [shape: f32[64,16], index: 0, kind: input, shape index: {}]   ;;  %s6431_s1 = inlined_call_operand.vmem [shape: f32[16,128], index: 1, kind: input, shape index: {}]   ;;  %s6432_s2 = inlined_call_operand.vmem [shape: f32[32,128], index: 2, kind: input, shape index: {}]   ;;  %s6433_s3 = inlined_call_operand.vmem [shape: f32[1,128], index: 3, kind: input, shape index: {}]   ;;  %s6434_s4 = inlined_call_operand.vmem [shape: f32[32,128], index: 4, kind: input, shape index: {}]   ;;  %s6435_s5 = inlined_call_operand.vmem [shape: f32[32,128], index: 5, kind: input, shape index: {}]   ;;  %s6436_s6 = inlined_call_operand.vmem [shape: f32[1,128], index: 6, kind: input, shape index: {}]   ;;  %s6437_s7 = inlined_call_operand.vmem [shape: f32[32,128], index: 7, kind: input, shape index: {}]   ;;  %s6438_s8 = inlined_call_operand.vmem [shape: f32[32,128], index: 8, kind: input, shape index: {}]   ;;  %s6439_s9 = inlined_call_operand.vmem [shape: f32[1,128], index: 9, kind: input, shape index: {}]   ;;  %s6440_s10 = inlined_call_operand.vmem [shape: f32[32,128], index: 10, kind: input, shape index: {}]   ;;  %s6441_s11 = inlined_call_operand.vmem [shape: f32[32,128], index: 11, kind: input, shape index: {}]   ;;  %s6442_s12 = inlined_call_operand.vmem [shape: f32[1,128], index: 12, kind: input, shape index: {}]   ;;  %s6443_s13 = inlined_call_operand.vmem [shape: f32[32,32], index: 13, kind: input, shape index: {}]   ;;  %s6444_s14 = inlined_call_operand.vmem [shape: f32[1,32], index: 14, kind: input, shape index: {}]   ;;  %s6445_s15 = inlined_call_operand.vmem [shape: f32[32,32], index: 15, kind: input, shape index: {}]   ;;  %s6446_s16 = inlined_call_operand.hbm [shape: f32[1,32], index: 16, kind: input, shape index: {}]   ;;  %s6447_s17 = inlined_call_operand.vmem [shape: f32[32,32], index: 17, kind: input, shape index: {}]   ;;  %s6448_s18 = inlined_call_operand.hbm [shape: f32[1,32], index: 18, kind: input, shape index: {}]   ;;  %s6449_s19 = inlined_call_operand.vmem [shape: f32[32,128], index: 19, kind: input, shape index: {}]   ;;  %s6450_s20 = inlined_call_operand.vmem [shape: f32[1,128], index: 20, kind: input, shape index: {}]   ;;  %s6451_s21 = inlined_call_operand.vmem [shape: f32[8,128], index: 21, kind: output, shape index: {}]  }
   0x1   :  { %6457 = sst [smem:[#allocation8_spill]] %s6430_s0 }
   0x2   :  { %6458 = sst [smem:[#allocation9_spill]] %s6431_s1 }
   0x3   :  { %6459 = sst [smem:[#allocation10_spill]] %s6432_s2 }
   0x4   :  { %6460 = sst [smem:[#allocation11_spill]] %s6433_s3 }
   0x5   :  { %6461 = sst [smem:[#allocation12_spill]] %s6434_s4 }
   0x6   :  { %6462 = sst [smem:[#allocation13_spill]] %s6435_s5 }
   0x7   :  { %26 = vsyncpa [#allocation3], 0 }
   0x8   :  { %27 = vsyncpa [#allocation5], 0  ;;  %s5511_s2 = smov [#allocation2]   ;;  %s5512_s26 = smov [#allocation4]  }
   0x9   :  { %s66_s25 = sshll.u32 %s5511_s2, 4  ;;  %s78_s27 = sshll.u32 %s5512_s26, 4  ;;  %s67_s25 = int_to_ptr.vmem [resolvable:$true] %s66_s25  ;;  %s79_s27 = int_to_ptr.vmem [resolvable:$true] %s78_s27 }
   0xa   :  { %s5463_s29 = scalar_lea.hbm %s6446_s16, 16 }
   0xb   :  { %p5464_p0 = scmp.ne.s32.totalorder %s6446_s16, %s5463_s29  ;;  %p5467_p1 = scmp.lt.u32.totalorder %s5463_s29, %s6446_s16 }
   0xd   :  { %p5469_p2 = pnand %p5467_p1, %p5464_p0 }
   0xf   :  { %5472 = shalt.err (!%p5469_p2)
}
  0x10   :  { %s5473_s22 = scalar_lea.vmem %s67_s25, 16  ;;  %s5477_s23 = scalar_lea.vmem %s67_s25, 32 }
  0x11   :  { %p5474_p3 = scmp.ne.s32.totalorder %s67_s25, %s5473_s22  ;;  %p5478_p4 = scmp.lt.s32.totalorder %s67_s25, %s67_s25 }
  0x12   :  { %p5479_p5 = scmp.lt.s32.totalorder %s5477_s23, %s5473_s22 }
  0x14   :  { %p5480_p6 = por %p5479_p5, %p5478_p4 }
  0x16   :  { %p5481_p7 = pnand %p5480_p6, %p5474_p3 }
  0x18   :  { %5484 = shalt.err (!%p5481_p7)
}
  0x19   :  { %69 = dma.hbm_to_vmem [thread:$0]  %s6446_s16, 16, %s67_s25, [#allocation3]  }
  0x1a   :  { %s5485_s3 = scalar_lea.hbm %s6448_s18, 16 }
  0x1b   :  { %p5486_p8 = scmp.ne.s32.totalorder %s6448_s18, %s5485_s3  ;;  %p5489_p9 = scmp.lt.u32.totalorder %s5485_s3, %s6448_s18 }
  0x1d   :  { %p5491_p10 = pnand %p5489_p9, %p5486_p8 }
  0x1f   :  { %5494 = shalt.err (!%p5491_p10)
}
  0x20   :  { %s5495_s30 = scalar_lea.vmem %s79_s27, 16  ;;  %s5499_s5 = scalar_lea.vmem %s79_s27, 32 }
  0x21   :  { %p5496_p11 = scmp.ne.s32.totalorder %s79_s27, %s5495_s30  ;;  %p5500_p12 = scmp.lt.s32.totalorder %s79_s27, %s79_s27 }
  0x22   :  { %p5501_p13 = scmp.lt.s32.totalorder %s5499_s5, %s5495_s30 }
  0x24   :  { %p5502_p0 = por %p5501_p13, %p5500_p12 }
  0x26   :  { %p5503_p1 = pnand %p5502_p0, %p5496_p11 }
  0x28   :  { %5506 = shalt.err (!%p5503_p1)
}
  0x29   :  { %81 = dma.hbm_to_vmem [thread:$0]  %s6448_s18, 16, %s79_s27, [#allocation5]  }
  0x2a   :  { %5507 = dma.done.wait [#allocation3], 16  }
  0x2b   :  { %5508 = vsyncadd [#allocation3], 4294967280 }
  0x2c   :  { %5509 = dma.done.wait [#allocation5], 16  }
  0x2d   :  { %5510 = vsyncadd [#allocation5], 4294967280  ;;  %v5513_v0 = vmov 0.0|0.0   ;;  %vm5514_vm0 = vmmov 0   ;;  %v5515_v1 = vmov 0.0   ;;  %vm113_vm1 = vcmask 130048  }
  0x2e   :  { %4960 = vmatprep.subr.bf16.mxu1 %v5513_v0  ;;  %4508 = vmatprep.mubr.msk.f32.mxu1 %vm5514_vm0, %v5515_v1  ;;  %s6463_s1 = sld [smem:[#allocation9_spill]]  ;;  %s6464_s26 = sld [smem:[#allocation10_spill]]  ;;  %vm243_vm2 = vcmask 261120  }
  0x2f   :  { %s6465_s4 = sld [smem:[#allocation8_spill]]  ;;  %s6466_s2 = sld [smem:[#allocation11_spill]] }
  0x30   :  { %s5516_s18 = smov 64   ;;  %s5517_s27 = smov 32  }
  0x31   :  { %s6468_s25 = sld [smem:[#allocation13_spill]] }
  0x34   :  { %v100_v2 = vld [vmem:[%s6463_s1] sm:$0xff]  ;;  %v101_v3 = vld [vmem:[%s6463_s1 + $0x8] sm:$0xff]  ;;  %v104_v9 = vld [vmem:[%s6464_s26 + $0x10] sm:$0xff] }
  0x35   :  { %v102_v4 = vld [vmem:[%s6464_s26] sm:$0xff]  ;;  %v4956_v5 = vpack.c.bf16 %v101_v3, %v100_v2  ;;  %v103_v6 = vld [vmem:[%s6464_s26 + $0x8] sm:$0xff]  ;;  %v105_v10 = vld [vmem:[%s6464_s26 + $0x18] sm:$0xff] }
  0x36   :  { %v92_v7 = vld [vmem:[%s6465_s4] sm:$0xff]  ;;  %v5670_v8 = vpack.c.bf16 %v103_v6, %v102_v4  ;;  %v93_v11 = vld [vmem:[%s6465_s4 + $0x8] sm:$0xff]  ;;  %v5683_v12 = vpack.c.bf16 %v105_v10, %v104_v9  ;;  %v94_v48 = vld [vmem:[%s6465_s4 + $0x10] sm:$0xff] }
  0x37   :  { %4488 = vmatprep.mubr.msk.f32.mxu0 %vm113_vm1, %v92_v7  ;;  %4957 = vmatprep.subr.bf16.mxu0 %v4956_v5  ;;  %v5704_v13 = vld [vmem:[%s6466_s2] ss:$0 sm:$0xff]  ;;  %v95_v49 = vld [vmem:[%s6465_s4 + $0x18] sm:$0xff]  ;;  %v97_v51 = vld [vmem:[%s6465_s4 + $0x28] sm:$0xff]  ;;  %s6467_s2 = sld [smem:[#allocation12_spill]] }
  0x38   :  { %4962 = vmatpush3.bf16.msra.mxu1 %v5670_v8  ;;  %4959 = vmatpush3.bf16.msra.mxu0 %v4956_v5  ;;  %v96_v50 = vld [vmem:[%s6465_s4 + $0x20] sm:$0xff]  ;;  %v98_v52 = vld [vmem:[%s6465_s4 + $0x30] sm:$0xff]  ;;  %v99_v53 = vld [vmem:[%s6465_s4 + $0x38] sm:$0xff] }
  0x39   :  { %4963 = vmatprep.subr.bf16.mxu1 %v5513_v0  ;;  %4972 = vmatprep.subr.bf16.mxu0 %v5513_v0 }
  0x3b   :  { %4489 = vmatmul.mubr.msk.f32.vlgmr.msra.gmra.mrb[0].mxu0 %vm113_vm1, %v93_v11 }
  0x3c   :  { %4965 = vmatpush3.bf16.msra.mxu1 %v5683_v12  ;;  %4974 = vmatpush3.bf16.msra.mxu0 %v5670_v8 }
  0x3d   :  { %4966 = vmatprep.subr.bf16.mxu1 %v5513_v0  ;;  %4975 = vmatprep.subr.bf16.mxu0 %v5513_v0 }
  0x3e   :  { %4491 = vmatprep.mubr.msk.f32.mxu0 %vm113_vm1, %v94_v48 }
  0x3f   :  { %4509 = vmatmul.mubr.f32.vlgmr.msra.gmra.mrb[0].mxu1 %v5515_v1  ;;  %4492 = vmatmul.mubr.msk.f32.gmra.mrb[2].mxu0 %vm113_vm1, %v95_v49 }
  0x40   :  { %4968 = vmatpush3.bf16.msra.mxu1 %v5670_v8  ;;  %4519 = vmatprep.mubr.msk.f32.mxu1 %vm5514_vm0, %v5515_v1 }
  0x41   :  { %4969 = vmatprep.subr.bf16.mxu1 %v5513_v0  ;;  %4977 = vmatpush3.bf16.msra.mxu0 %v5683_v12 }
  0x42   :  { %4984 = vmatprep.subr.bf16.mxu0 %v5513_v0  ;;  %4494 = vmatprep.mubr.msk.f32.mxu0 %vm113_vm1, %v96_v50 }
  0x43   :  { %4495 = vmatmul.mubr.msk.f32.gmra.mrb[4].mxu0 %vm113_vm1, %v97_v51 }
  0x44   :  { %4971 = vmatpush3.bf16.msra.mxu1 %v5683_v12  ;;  %4497 = vmatprep.mubr.msk.f32.mxu0 %vm113_vm1, %v98_v52 }
  0x45   :  { %4978 = vmatprep.subr.bf16.mxu1 %v5513_v0 }
  0x47   :  { %4498 = vmatmul.mubr.msk.f32.gmra.mrb[6].mxu0 %vm113_vm1, %v99_v53 }
  0x48   :  { %4530 = vmatprep.mubr.msk.f32.mxu0 %vm5514_vm0, %v5515_v1 }
 0x10e   :  { %v4490_v14 = vpop.f32.mrb[0].mxu0 }
 0x10f   :  { %v204_v15 = vpop.f32.mrb[1].mxu0  ;;  %v210_v34 = vadd.f32 %v4490_v14, %v5704_v13 }
 0x110   :  { %v205_v16 = vadd.f32 %v5704_v13, %v204_v15 }
 0x112   :  { %v313_v17 = vpop.f32.mrb[0].mxu1  ;;  %v4493_v57 = vpop.f32.mrb[2].mxu0 }
 0x113   :  { %v317_v18 = vadd.f32 %v313_v17, %v205_v16  ;;  %v4510_v19 = vpop.f32.mrb[1].mxu1  ;;  %v214_v58 = vpop.f32.mrb[3].mxu0 }
 0x114   :  { %v215_v2 = vadd.f32 %v5704_v13, %v214_v58 }
 0x115   :  { %5207 = vtanh.f32 %v317_v18  ;;  %v4163_v21 = vmul.f32 -1.442695, %v317_v18 }
 0x116   :  { %v5752_v59 = vpop.f32.mrb[4].mxu0 }
 0x117   :  { %5209 = vpow2.f32 %v4163_v21  ;;  %v5754_v60 = vpop.f32.mrb[5].mxu0 }
 0x11a   :  { %v5756_v61 = vpop.f32.mrb[6].mxu0 }
 0x11b   :  { %v5758_v62 = vpop.f32.mrb[7].mxu0 }
 0x11f   :  { %v5208_v20 = vpop.eup %5207 }
 0x120   :  { %327 = vrot.lane.b32.xlu0 %v5208_v20, %s5516_s18 }
 0x121   :  { %v5210_v22 = vpop.eup %5209 }
 0x122   :  { %v321_v23 = vadd.f32 1.0, %v5210_v22 }
 0x124   :  { %5211 = vrcp.f32 %v321_v23  ;;  %v220_v23 = vadd.f32 %v4493_v57, %v5704_v13 }
 0x12e   :  { %v5212_v24 = vpop.eup %5211 }
 0x12f   :  { %v325_v27 = vmul.f32 0.0, %v5212_v24 }
 0x192   :  { %v328_v25 = vpop.permute.xlu0 %327 }
 0x193   :  { %v330_v26 = vmul.f32 %v5212_v24, %v328_v25 }
 0x195   :  { %332 = vrot.lane.b32.xlu0 %v330_v26, %s5517_s27 }
 0x207   :  { %v333_v28 = vpop.permute.xlu0 %332 }
 0x208   :  { %v335_v29 = vadd.f32 %v333_v28, %v325_v27 }
 0x20a   :  { %5213 = vtanh.f32 %v335_v29 }
 0x214   :  { %v5214_v30 = vpop.eup %5213 }
 0x215   :  { %338 = vrot.lane.b32.xlu1 %v5214_v30, %s5516_s18 }
 0x287   :  { %v339_v31 = vpop.permute.xlu1 %338 }
 0x288   :  { %v341_v32 = vmul.f32 %v5212_v24, %v339_v31 }
 0x28a   :  { %343 = vrot.lane.b32.xlu1 %v341_v32, %s5517_s27 }
 0x2fc   :  { %v5711_v33 = vpop.permute.xlu1 %343 }
 0x2fd   :  { %4520 = vmatmul.mubr.msk.f32.vlgmr.msra.gmra.mrb[2].mxu1 %vm243_vm2, %v5711_v33 }
 0x2fe   :  { %4980 = vmatpush3.bf16.msra.mxu1 %v5670_v8  ;;  %4541 = vmatprep.mubr.msk.f32.mxu1 %vm5514_vm0, %v5515_v1 }
 0x2ff   :  { %4981 = vmatprep.subr.bf16.mxu1 %v5513_v0 }
 0x302   :  { %4983 = vmatpush3.bf16.msra.mxu1 %v5683_v12 }
 0x303   :  { %4990 = vmatprep.subr.bf16.mxu1 %v5513_v0 }
 0x3d0   :  { %v413_v35 = vpop.f32.mrb[2].mxu1 }
 0x3d1   :  { %v417_v36 = vadd.f32 %v413_v35, %v210_v34  ;;  %v4521_v37 = vpop.f32.mrb[3].mxu1 }
 0x3d3   :  { %5215 = vtanh.f32 %v417_v36  ;;  %v4165_v39 = vmul.f32 -1.442695, %v417_v36 }
 0x3d5   :  { %5217 = vpow2.f32 %v4165_v39 }
 0x3dd   :  { %v5216_v38 = vpop.eup %5215 }
 0x3de   :  { %427 = vrot.lane.b32.xlu0 %v5216_v38, %s5516_s18 }
 0x3df   :  { %v5218_v40 = vpop.eup %5217 }
 0x3e0   :  { %v421_v41 = vadd.f32 1.0, %v5218_v40 }
 0x3e2   :  { %5219 = vrcp.f32 %v421_v41 }
 0x3ec   :  { %v5220_v42 = vpop.eup %5219 }
 0x3ed   :  { %v425_v45 = vmul.f32 %v5220_v42, %v335_v29 }
 0x450   :  { %v428_v43 = vpop.permute.xlu0 %427 }
 0x451   :  { %v430_v44 = vmul.f32 %v5220_v42, %v428_v43 }
 0x453   :  { %432 = vrot.lane.b32.xlu1 %v430_v44, %s5517_s27 }
 0x4c5   :  { %v433_v46 = vpop.permute.xlu1 %432 }
 0x4c6   :  { %v435_v47 = vadd.f32 %v433_v46, %v425_v45 }
 0x4c8   :  { %5221 = vtanh.f32 %v435_v47 }
 0x4d2   :  { %v5222_v54 = vpop.eup %5221 }
 0x4d3   :  { %438 = vrot.lane.b32.xlu0 %v5222_v54, %s5516_s18 }
 0x545   :  { %v439_v55 = vpop.permute.xlu0 %438 }
 0x546   :  { %v441_v56 = vmul.f32 %v5220_v42, %v439_v55  ;;  %v225_v42 = vadd.f32 %v5704_v13, %v5754_v60 }
 0x548   :  { %443 = vrot.lane.b32.xlu1 %v441_v56, %s5517_s27 }
 0x5ba   :  { %v5760_v63 = vpop.permute.xlu1 %443 }
 0x5bb   :  { %4531 = vmatmul.mubr.msk.f32.vlgmr.msra.gmra.mrb[8].mxu0 %vm243_vm2, %v5760_v63 }
 0x5bc   :  { %4986 = vmatpush3.bf16.msra.mxu0 %v5670_v8  ;;  %4552 = vmatprep.mubr.msk.f32.mxu0 %vm5514_vm0, %v5515_v1 }
 0x5bd   :  { %4987 = vmatprep.subr.bf16.mxu0 %v5513_v0 }
 0x5c0   :  { %4989 = vmatpush3.bf16.msra.mxu0 %v5683_v12 }
 0x5c1   :  { %4996 = vmatprep.subr.bf16.mxu0 %v5513_v0 }
 0x68e   :  { %v513_v3 = vpop.f32.mrb[8].mxu0 }
 0x68f   :  { %v517_v4 = vadd.f32 %v513_v3, %v215_v2  ;;  %v4532_v5 = vpop.f32.mrb[9].mxu0  ;;  %v230_v2 = vadd.f32 %v5752_v59, %v5704_v13 }
 0x691   :  { %5223 = vtanh.f32 %v517_v4  ;;  %v4167_v7 = vmul.f32 -1.442695, %v517_v4 }
 0x693   :  { %5225 = vpow2.f32 %v4167_v7 }
 0x69b   :  { %v5224_v6 = vpop.eup %5223 }
 0x69c   :  { %527 = vrot.lane.b32.xlu0 %v5224_v6, %s5516_s18 }
 0x69d   :  { %v5226_v9 = vpop.eup %5225 }
 0x69e   :  { %v521_v10 = vadd.f32 1.0, %v5226_v9 }
 0x6a0   :  { %5227 = vrcp.f32 %v521_v10 }
 0x6aa   :  { %v5228_v11 = vpop.eup %5227 }
 0x6ab   :  { %v525_v16 = vmul.f32 %v5228_v11, %v435_v47 }
 0x70e   :  { %v528_v14 = vpop.permute.xlu0 %527 }
 0x70f   :  { %v530_v15 = vmul.f32 %v5228_v11, %v528_v14 }
 0x711   :  { %532 = vrot.lane.b32.xlu1 %v530_v15, %s5517_s27 }
 0x783   :  { %v533_v17 = vpop.permute.xlu1 %532 }
 0x784   :  { %v535_v18 = vadd.f32 %v533_v17, %v525_v16  ;;  %v1042_v16 = vld [vmem:[%s6467_s2] sm:$0xff]  ;;  %v1043_v17 = vld [vmem:[%s6467_s2 + $0x8] sm:$0xff] }
 0x786   :  { %5229 = vtanh.f32 %v535_v18 }
 0x790   :  { %v5230_v19 = vpop.eup %5229 }
 0x791   :  { %538 = vrot.lane.b32.xlu0 %v5230_v19, %s5516_s18 }
 0x803   :  { %v539_v20 = vpop.permute.xlu0 %538 }
 0x804   :  { %v541_v21 = vmul.f32 %v5228_v11, %v539_v20 }
 0x806   :  { %543 = vrot.lane.b32.xlu1 %v541_v21, %s5517_s27 }
 0x878   :  { %v5775_v22 = vpop.permute.xlu1 %543 }
 0x879   :  { %4542 = vmatmul.mubr.msk.f32.vlgmr.msra.gmra.mrb[4].mxu1 %vm243_vm2, %v5775_v22 }
 0x87a   :  { %4992 = vmatpush3.bf16.msra.mxu1 %v5670_v8  ;;  %4563 = vmatprep.mubr.msk.f32.mxu1 %vm5514_vm0, %v5515_v1 }
 0x87b   :  { %4993 = vmatprep.subr.bf16.mxu1 %v5513_v0 }
 0x87e   :  { %4995 = vmatpush3.bf16.msra.mxu1 %v5683_v12 }
 0x87f   :  { %5002 = vmatprep.subr.bf16.mxu1 %v5513_v0 }
 0x94c   :  { %v613_v24 = vpop.f32.mrb[4].mxu1 }
 0x94d   :  { %v617_v25 = vadd.f32 %v613_v24, %v220_v23  ;;  %v4543_v26 = vpop.f32.mrb[5].mxu1  ;;  %v1044_v23 = vld [vmem:[%s6467_s2 + $0x10] sm:$0xff]  ;;  %v1045_v24 = vld [vmem:[%s6467_s2 + $0x18] sm:$0xff] }
 0x94f   :  { %5231 = vtanh.f32 %v617_v25  ;;  %v4169_v28 = vmul.f32 -1.442695, %v617_v25  ;;  %v5012_v25 = vpack.c.bf16 %v1045_v24, %v1044_v23 }
 0x951   :  { %5233 = vpow2.f32 %v4169_v28 }
 0x959   :  { %v5232_v27 = vpop.eup %5231 }
 0x95a   :  { %627 = vrot.lane.b32.xlu0 %v5232_v27, %s5516_s18 }
 0x95b   :  { %v5234_v29 = vpop.eup %5233 }
 0x95c   :  { %v621_v30 = vadd.f32 1.0, %v5234_v29 }
 0x95e   :  { %5235 = vrcp.f32 %v621_v30 }
 0x968   :  { %v5236_v31 = vpop.eup %5235 }
 0x969   :  { %v625_v35 = vmul.f32 %v5236_v31, %v535_v18  ;;  %v5008_v18 = vpack.c.bf16 %v1043_v17, %v1042_v16 }
 0x9cc   :  { %v628_v32 = vpop.permute.xlu0 %627 }
 0x9cd   :  { %v630_v34 = vmul.f32 %v5236_v31, %v628_v32 }
 0x9cf   :  { %632 = vrot.lane.b32.xlu1 %v630_v34, %s5517_s27 }
 0xa41   :  { %v633_v36 = vpop.permute.xlu1 %632 }
 0xa42   :  { %v635_v37 = vadd.f32 %v633_v36, %v625_v35 }
 0xa44   :  { %5237 = vtanh.f32 %v635_v37 }
 0xa4e   :  { %v5238_v38 = vpop.eup %5237 }
 0xa4f   :  { %638 = vrot.lane.b32.xlu0 %v5238_v38, %s5516_s18 }
 0xac1   :  { %v639_v39 = vpop.permute.xlu0 %638 }
 0xac2   :  { %v641_v40 = vmul.f32 %v5236_v31, %v639_v39 }
 0xac4   :  { %643 = vrot.lane.b32.xlu1 %v641_v40, %s5517_s27 }
 0xb36   :  { %v5790_v41 = vpop.permute.xlu1 %643 }
 0xb37   :  { %4553 = vmatmul.mubr.msk.f32.vlgmr.msra.gmra.mrb[10].mxu0 %vm243_vm2, %v5790_v41 }
 0xb38   :  { %4998 = vmatpush3.bf16.msra.mxu0 %v5670_v8  ;;  %4574 = vmatprep.mubr.msk.f32.mxu0 %vm5514_vm0, %v5515_v1 }
 0xb39   :  { %4999 = vmatprep.subr.bf16.mxu0 %v5513_v0 }
 0xb3c   :  { %5001 = vmatpush3.bf16.msra.mxu0 %v5683_v12 }
 0xb3d   :  { %5009 = vmatprep.subr.bf16.mxu0 %v5008_v18 }
 0xc0a   :  { %v713_v43 = vpop.f32.mrb[10].mxu0 }
 0xc0b   :  { %v717_v44 = vadd.f32 %v713_v43, %v225_v42  ;;  %v4554_v45 = vpop.f32.mrb[11].mxu0 }
 0xc0c   :  { %v1046_v45 = vld [vmem:[%s6468_s25] sm:$0xff] }
 0xc0d   :  { %5239 = vtanh.f32 %v717_v44  ;;  %v4171_v47 = vmul.f32 -1.442695, %v717_v44 }
 0xc0f   :  { %5241 = vpow2.f32 %v4171_v47 }
 0xc17   :  { %v5240_v46 = vpop.eup %5239 }
 0xc18   :  { %727 = vrot.lane.b32.xlu0 %v5240_v46, %s5516_s18  ;;  %v1047_v46 = vld [vmem:[%s6468_s25 + $0x8] sm:$0xff] }
 0xc19   :  { %v5242_v48 = vpop.eup %5241  ;;  %v5866_v47 = vpack.c.bf16 %v1047_v46, %v1046_v45 }
 0xc1a   :  { %v721_v49 = vadd.f32 1.0, %v5242_v48  ;;  %v1048_v48 = vld [vmem:[%s6468_s25 + $0x10] sm:$0xff] }
 0xc1c   :  { %5243 = vrcp.f32 %v721_v49  ;;  %v1049_v49 = vld [vmem:[%s6468_s25 + $0x18] sm:$0xff] }
 0xc26   :  { %v5244_v50 = vpop.eup %5243 }
 0xc27   :  { %v725_v53 = vmul.f32 %v5244_v50, %v635_v37 }
 0xc8a   :  { %v728_v51 = vpop.permute.xlu0 %727 }
 0xc8b   :  { %v730_v52 = vmul.f32 %v5244_v50, %v728_v51 }
 0xc8d   :  { %732 = vrot.lane.b32.xlu1 %v730_v52, %s5517_s27 }
 0xcff   :  { %v733_v54 = vpop.permute.xlu1 %732 }
 0xd00   :  { %v735_v55 = vadd.f32 %v733_v54, %v725_v53  ;;  %v240_v54 = vadd.f32 %v5756_v61, %v5704_v13 }
 0xd02   :  { %5245 = vtanh.f32 %v735_v55 }
 0xd0c   :  { %v5246_v56 = vpop.eup %5245 }
 0xd0d   :  { %738 = vrot.lane.b32.xlu0 %v5246_v56, %s5516_s18 }
 0xd7f   :  { %v739_v57 = vpop.permute.xlu0 %738 }
 0xd80   :  { %v741_v58 = vmul.f32 %v5244_v50, %v739_v57  ;;  %v5876_v50 = vpack.c.bf16 %v1049_v49, %v1048_v48 }
 0xd82   :  { %743 = vrot.lane.b32.xlu1 %v741_v58, %s5517_s27  ;;  %v5901_v58 = vld [vmem:[%s6436_s6] ss:$0 sm:$0xff] }
 0xdf4   :  { %v744_v60 = vpop.permute.xlu1 %743 }
 0xdf5   :  { %4564 = vmatmul.mubr.msk.f32.vlgmr.msra.gmra.mrb[6].mxu1 %vm243_vm2, %v744_v60 }
 0xdf6   :  { %5004 = vmatpush3.bf16.msra.mxu1 %v5670_v8  ;;  %4585 = vmatprep.mubr.msk.f32.mxu1 %vm5514_vm0, %v5515_v1 }
 0xdf7   :  { %5005 = vmatprep.subr.bf16.mxu1 %v5513_v0 }
 0xdfa   :  { %5007 = vmatpush3.bf16.msra.mxu1 %v5683_v12 }
 0xdfb   :  { %5016 = vmatprep.subr.bf16.mxu1 %v5513_v0 }
 0xec8   :  { %v813_v3 = vpop.f32.mrb[6].mxu1 }
 0xec9   :  { %v817_v4 = vadd.f32 %v813_v3, %v230_v2  ;;  %v4565_v5 = vpop.f32.mrb[7].mxu1 }
 0xecb   :  { %5247 = vtanh.f32 %v817_v4  ;;  %v4173_v8 = vmul.f32 -1.442695, %v817_v4 }
 0xecd   :  { %5249 = vpow2.f32 %v4173_v8 }
 0xed5   :  { %v5248_v6 = vpop.eup %5247 }
 0xed6   :  { %827 = vrot.lane.b32.xlu0 %v5248_v6, %s5516_s18 }
 0xed7   :  { %v5250_v7 = vpop.eup %5249 }
 0xed8   :  { %v821_v9 = vadd.f32 1.0, %v5250_v7 }
 0xeda   :  { %5251 = vrcp.f32 %v821_v9 }
 0xee4   :  { %v5252_v10 = vpop.eup %5251 }
 0xee5   :  { %v825_v14 = vmul.f32 %v5252_v10, %v735_v55 }
 0xf48   :  { %v828_v11 = vpop.permute.xlu0 %827 }
 0xf49   :  { %v830_v12 = vmul.f32 %v5252_v10, %v828_v11 }
 0xf4b   :  { %832 = vrot.lane.b32.xlu1 %v830_v12, %s5517_s27 }
 0xfbd   :  { %v833_v15 = vpop.permute.xlu1 %832 }
 0xfbe   :  { %v835_v59 = vadd.f32 %v833_v15, %v825_v14 }
 0xfc0   :  { %5253 = vtanh.f32 %v835_v59 }
 0xfca   :  { %v5254_v19 = vpop.eup %5253 }
 0xfcb   :  { %838 = vrot.lane.b32.xlu0 %v5254_v19, %s5516_s18 }
0x103d   :  { %v839_v20 = vpop.permute.xlu0 %838 }
0x103e   :  { %v841_v21 = vmul.f32 %v5252_v10, %v839_v20 }
0x1040   :  { %843 = vrot.lane.b32.xlu1 %v841_v21, %s5517_s27 }
0x10b2   :  { %v844_v26 = vpop.permute.xlu1 %843 }
0x10b3   :  { %4575 = vmatmul.mubr.msk.f32.vlgmr.msra.gmra.mrb[12].mxu0 %vm243_vm2, %v844_v26 }
0x10b4   :  { %5011 = vmatpush3.bf16.msra.mxu0 %v5008_v18  ;;  %4596 = vmatprep.mubr.msk.f32.mxu0 %vm243_vm2, %v5711_v33  ;;  %v235_v33 = vadd.f32 %v5704_v13, %v5758_v62 }
0x10b5   :  { %5013 = vmatprep.subr.bf16.mxu0 %v5012_v25 }
0x10b8   :  { %5015 = vmatpush3.bf16.msra.mxu0 %v5012_v25 }
0x10b9   :  { %5028 = vmatprep.subr.bf16.mxu0 %v5513_v0 }
0x10bb   :  { %4597 = vmatmul.mubr.msk.f32.vlgmr.msra.gmra.mrb[14].mxu0 %vm243_vm2, %v5760_v63 }
0x10bc   :  { %4599 = vmatprep.mubr.msk.f32.mxu0 %vm243_vm2, %v5775_v22  ;;  %5030 = vmatpush3.bf16.msra.mxu0 %v5866_v47 }
0x10bd   :  { %5031 = vmatprep.subr.bf16.mxu0 %v5513_v0 }
0x10bf   :  { %4600 = vmatmul.mubr.msk.f32.gmra.mrb[16].mxu0 %vm243_vm2, %v5790_v41 }
0x10c0   :  { %4602 = vmatprep.mubr.msk.f32.mxu0 %vm243_vm2, %v744_v60  ;;  %5033 = vmatpush3.bf16.msra.mxu0 %v5876_v50 }
0x10c1   :  { %5040 = vmatprep.subr.bf16.mxu0 %v5513_v0 }
0x10c3   :  { %4603 = vmatmul.mubr.msk.f32.gmra.mrb[18].mxu0 %vm243_vm2, %v844_v26 }
0x1186   :  { %v913_v27 = vpop.f32.mrb[12].mxu0 }
0x1187   :  { %v917_v28 = vadd.f32 %v913_v27, %v235_v33  ;;  %v4576_v29 = vpop.f32.mrb[13].mxu0 }
0x1189   :  { %5255 = vtanh.f32 %v917_v28  ;;  %v4175_v36 = vmul.f32 -1.442695, %v917_v28 }
0x118b   :  { %5257 = vpow2.f32 %v4175_v36 }
0x118e   :  { %v5844_v30 = vpop.f32.mrb[14].mxu0 }
0x118f   :  { %v1128_v63 = vpop.f32.mrb[15].mxu0 }
0x1190   :  { %v1129_v60 = vadd.f32 %v5901_v58, %v1128_v63  ;;  %v1134_v63 = vadd.f32 %v5844_v30, %v5901_v58 }
0x1192   :  { %v5846_v31 = vpop.f32.mrb[16].mxu0 }
0x1193   :  { %v5256_v22 = vpop.eup %5255  ;;  %v5848_v32 = vpop.f32.mrb[17].mxu0 }
0x1194   :  { %927 = vrot.lane.b32.xlu0 %v5256_v22, %s5516_s18 }
0x1195   :  { %v5258_v62 = vpop.eup %5257 }
0x1196   :  { %v5851_v34 = vpop.f32.mrb[18].mxu0  ;;  %v921_v37 = vadd.f32 1.0, %v5258_v62 }
0x1197   :  { %v5853_v35 = vpop.f32.mrb[19].mxu0 }
0x1198   :  { %5259 = vrcp.f32 %v921_v37 }
0x11a2   :  { %v5260_v38 = vpop.eup %5259 }
0x11a3   :  { %v925_v41 = vmul.f32 %v5260_v38, %v835_v59 }
0x1206   :  { %v928_v39 = vpop.permute.xlu0 %927 }
0x1207   :  { %v930_v40 = vmul.f32 %v5260_v38, %v928_v39 }
0x1209   :  { %932 = vrot.lane.b32.xlu1 %v930_v40, %s5517_s27 }
0x127b   :  { %v933_v42 = vpop.permute.xlu1 %932 }
0x127c   :  { %v5856_v43 = vadd.f32 %v933_v42, %v925_v41 }
0x127e   :  { %5261 = vtanh.f32 %v5856_v43 }
0x1288   :  { %v5262_v44 = vpop.eup %5261 }
0x1289   :  { %938 = vrot.lane.b32.xlu0 %v5262_v44, %s5516_s18 }
0x12fb   :  { %v939_v51 = vpop.permute.xlu0 %938 }
0x12fc   :  { %v941_v52 = vmul.f32 %v5260_v38, %v939_v51 }
0x12fe   :  { %943 = vrot.lane.b32.xlu1 %v941_v52, %s5517_s27 }
0x1370   :  { %v944_v53 = vpop.permute.xlu1 %943 }
0x1371   :  { %4586 = vmatmul.mubr.msk.f32.vlgmr.msra.gmra.mrb[8].mxu1 %vm243_vm2, %v944_v53  ;;  %4605 = vmatprep.mubr.msk.f32.mxu0 %vm243_vm2, %v944_v53 }
0x1372   :  { %5018 = vmatpush3.bf16.msra.mxu1 %v5866_v47  ;;  %4616 = vmatprep.mubr.msk.f32.mxu1 %vm5514_vm0, %v5515_v1 }
0x1373   :  { %5019 = vmatprep.subr.bf16.mxu1 %v5513_v0 }
0x1376   :  { %5021 = vmatpush3.bf16.msra.mxu1 %v5876_v50 }
0x1377   :  { %5022 = vmatprep.subr.bf16.mxu1 %v5513_v0 }
0x1379   :  { %4617 = vmatmul.mubr.f32.vlgmr.msra.gmra.mrb[10].mxu1 %v5515_v1 }
0x137a   :  { %5024 = vmatpush3.bf16.msra.mxu1 %v5866_v47  ;;  %4627 = vmatprep.mubr.msk.f32.mxu1 %vm5514_vm0, %v5515_v1 }
0x137b   :  { %5025 = vmatprep.subr.bf16.mxu1 %v5513_v0 }
0x137e   :  { %5027 = vmatpush3.bf16.msra.mxu1 %v5876_v50 }
0x137f   :  { %5034 = vmatprep.subr.bf16.mxu1 %v5513_v0 }
0x1444   :  { %v1013_v55 = vpop.f32.mrb[8].mxu1 }
0x1445   :  { %v1017_v56 = vadd.f32 %v1013_v55, %v240_v54  ;;  %v4587_v57 = vpop.f32.mrb[9].mxu1  ;;  %v1139_v55 = vadd.f32 %v5901_v58, %v5848_v32 }
0x1447   :  { %v4177_v59 = vmul.f32 -1.442695, %v1017_v56 }
0x144c   :  { %v1233_v2 = vpop.f32.mrb[10].mxu1 }
0x144d   :  { %v1237_v3 = vadd.f32 %v1233_v2, %v1129_v60  ;;  %v4618_v4 = vpop.f32.mrb[11].mxu1 }
0x144f   :  { %5263 = vtanh.f32 %v1237_v3  ;;  %v4187_v6 = vmul.f32 -1.442695, %v1237_v3 }
0x1451   :  { %5265 = vpow2.f32 %v4187_v6 }
0x1459   :  { %v5264_v5 = vpop.eup %5263 }
0x145a   :  { %1247 = vrot.lane.b32.xlu0 %v5264_v5, %s5516_s18 }
0x145b   :  { %v5266_v13 = vpop.eup %5265 }
0x145c   :  { %v1241_v61 = vadd.f32 1.0, %v5266_v13 }
0x145e   :  { %5267 = vrcp.f32 %v1241_v61 }
0x1468   :  { %v5268_v8 = vpop.eup %5267 }
0x1469   :  { %v1245_v10 = vmul.f32 0.0, %v5268_v8 }
0x14cc   :  { %v1248_v7 = vpop.permute.xlu0 %1247 }
0x14cd   :  { %v1250_v9 = vmul.f32 %v5268_v8, %v1248_v7 }
0x14cf   :  { %1252 = vrot.lane.b32.xlu1 %v1250_v9, %s5517_s27 }
0x1541   :  { %v1253_v11 = vpop.permute.xlu1 %1252 }
0x1542   :  { %v1255_v12 = vadd.f32 %v1253_v11, %v1245_v10 }
0x1544   :  { %5269 = vtanh.f32 %v1255_v12 }
0x1545   :  { %5271 = vtanh.f32 %v1017_v56 }
0x1546   :  { %5273 = vpow2.f32 %v4177_v59 }
0x154e   :  { %v5270_v14 = vpop.eup %5269 }
0x154f   :  { %1258 = vrot.lane.b32.xlu0 %v5270_v14, %s5516_s18  ;;  %v5272_v15 = vpop.eup %5271  ;;  %v1144_v14 = vadd.f32 %v5846_v31, %v5901_v58 }
0x1550   :  { %v5274_v16 = vpop.eup %5273 }
0x1551   :  { %v1021_v17 = vadd.f32 1.0, %v5274_v16 }
0x1553   :  { %1027 = vrot.lane.b32.xlu0 %v5272_v15, %s5516_s18  ;;  %5275 = vrcp.f32 %v1021_v17 }
0x155d   :  { %v5276_v20 = vpop.eup %5275 }
0x155e   :  { %v1025_v25 = vmul.f32 %v5276_v20, %v5856_v43 }
0x15c1   :  { %v1259_v18 = vpop.permute.xlu0 %1258 }
0x15c2   :  { %v1261_v19 = vmul.f32 %v5268_v8, %v1259_v18 }
0x15c4   :  { %1263 = vrot.lane.b32.xlu1 %v1261_v19, %s5517_s27 }
0x15c5   :  { %v1028_v21 = vpop.permute.xlu0 %1027 }
0x15c6   :  { %v1030_v23 = vmul.f32 %v5276_v20, %v1028_v21 }
0x15c8   :  { %1032 = vrot.lane.b32.xlu0 %v1030_v23, %s5517_s27 }
0x1636   :  { %v5910_v24 = vpop.permute.xlu1 %1263 }
0x1637   :  { %4628 = vmatmul.mubr.msk.f32.vlgmr.msra.gmra.mrb[12].mxu1 %vm243_vm2, %v5910_v24 }
0x1638   :  { %5036 = vmatpush3.bf16.msra.mxu1 %v5866_v47  ;;  %4649 = vmatprep.mubr.msk.f32.mxu1 %vm5514_vm0, %v5515_v1 }
0x1639   :  { %5037 = vmatprep.subr.bf16.mxu1 %v5513_v0 }
0x163a   :  { %v1033_v26 = vpop.permute.xlu0 %1032 }
0x163b   :  { %v1035_v33 = vadd.f32 %v1033_v26, %v1025_v25 }
0x163c   :  { %5039 = vmatpush3.bf16.msra.mxu1 %v5876_v50 }
0x163d   :  { %5277 = vtanh.f32 %v1035_v33  ;;  %5046 = vmatprep.subr.bf16.mxu1 %v5513_v0 }
0x1647   :  { %v5278_v27 = vpop.eup %5277 }
0x1648   :  { %1038 = vrot.lane.b32.xlu0 %v5278_v27, %s5516_s18 }
0x16ba   :  { %v1039_v28 = vpop.permute.xlu0 %1038 }
0x16bb   :  { %v1041_v29 = vmul.f32 %v5276_v20, %v1039_v28 }
0x16bd   :  { %1058 = vrot.lane.b32.xlu0 %v1041_v29, %s5517_s27 }
0x170a   :  { %v1333_v22 = vpop.f32.mrb[12].mxu1 }
0x170b   :  { %v1337_v36 = vadd.f32 %v1333_v22, %v1134_v63  ;;  %v4629_v62 = vpop.f32.mrb[13].mxu1  ;;  %v1149_v22 = vadd.f32 %v5901_v58, %v5853_v35 }
0x170d   :  { %5279 = vtanh.f32 %v1337_v36  ;;  %v4189_v39 = vmul.f32 -1.442695, %v1337_v36 }
0x170f   :  { %5281 = vpow2.f32 %v4189_v39 }
0x1717   :  { %v5280_v37 = vpop.eup %5279 }
0x1718   :  { %1347 = vrot.lane.b32.xlu1 %v5280_v37, %s5516_s18 }
0x1719   :  { %v5282_v40 = vpop.eup %5281 }
0x171a   :  { %v1341_v41 = vadd.f32 1.0, %v5282_v40 }
0x171c   :  { %5283 = vrcp.f32 %v1341_v41 }
0x1726   :  { %v5284_v42 = vpop.eup %5283 }
0x1727   :  { %v1345_v44 = vmul.f32 %v5284_v42, %v1255_v12 }
0x172f   :  { %v1059_v38 = vpop.permute.xlu0 %1058 }
0x1730   :  { %4606 = vmatmul.mubr.msk.f32.gmra.mrb[20].mxu0 %vm243_vm2, %v1059_v38 }
0x1731   :  { %4638 = vmatprep.mubr.msk.f32.mxu0 %vm5514_vm0, %v5515_v1 }
0x178a   :  { %v1348_v30 = vpop.permute.xlu1 %1347 }
0x178b   :  { %v1350_v43 = vmul.f32 %v5284_v42, %v1348_v30 }
0x178d   :  { %1352 = vrot.lane.b32.xlu1 %v1350_v43, %s5517_s27 }
0x17ff   :  { %v1353_v45 = vpop.permute.xlu1 %1352 }
0x1800   :  { %v1355_v46 = vadd.f32 %v1353_v45, %v1345_v44 }
0x1802   :  { %5285 = vtanh.f32 %v1355_v46 }
0x1803   :  { %v5930_v48 = vpop.f32.mrb[20].mxu0 }
0x1804   :  { %v5932_v49 = vpop.f32.mrb[21].mxu0 }
0x180c   :  { %v5286_v51 = vpop.eup %5285 }
0x180d   :  { %1358 = vrot.lane.b32.xlu1 %v5286_v51, %s5516_s18 }
0x187f   :  { %v1359_v52 = vpop.permute.xlu1 %1358 }
0x1880   :  { %v1361_v53 = vmul.f32 %v5284_v42, %v1359_v52 }
0x1882   :  { %1363 = vrot.lane.b32.xlu1 %v1361_v53, %s5517_s27 }
0x18f4   :  { %v5936_v54 = vpop.permute.xlu1 %1363 }
0x18f5   :  { %4639 = vmatmul.mubr.msk.f32.vlgmr.msra.gmra.mrb[22].mxu0 %vm243_vm2, %v5936_v54 }
0x18f6   :  { %5042 = vmatpush3.bf16.msra.mxu0 %v5866_v47  ;;  %4660 = vmatprep.mubr.msk.f32.mxu0 %vm5514_vm0, %v5515_v1 }
0x18f7   :  { %5043 = vmatprep.subr.bf16.mxu0 %v5513_v0 }
0x18fa   :  { %5045 = vmatpush3.bf16.msra.mxu0 %v5876_v50 }
0x18fb   :  { %5052 = vmatprep.subr.bf16.mxu0 %v5513_v0 }
0x19c8   :  { %v1433_v56 = vpop.f32.mrb[22].mxu0 }
0x19c9   :  { %v1437_v57 = vadd.f32 %v1433_v56, %v1139_v55  ;;  %v4640_v60 = vpop.f32.mrb[23].mxu0  ;;  %v1154_v55 = vadd.f32 %v5851_v34, %v5901_v58 }
0x19cb   :  { %5287 = vtanh.f32 %v1437_v57  ;;  %v4191_v3 = vmul.f32 -1.442695, %v1437_v57 }
0x19cd   :  { %5289 = vpow2.f32 %v4191_v3 }
0x19d5   :  { %v5288_v2 = vpop.eup %5287 }
0x19d6   :  { %1447 = vrot.lane.b32.xlu0 %v5288_v2, %s5516_s18 }
0x19d7   :  { %v5290_v4 = vpop.eup %5289 }
0x19d8   :  { %v1441_v5 = vadd.f32 1.0, %v5290_v4 }
0x19da   :  { %5291 = vrcp.f32 %v1441_v5 }
0x19e4   :  { %v5292_v6 = vpop.eup %5291 }
0x19e5   :  { %v1445_v8 = vmul.f32 %v5292_v6, %v1355_v46 }
0x1a48   :  { %v1448_v13 = vpop.permute.xlu0 %1447 }
0x1a49   :  { %v1450_v61 = vmul.f32 %v5292_v6, %v1448_v13 }
0x1a4b   :  { %1452 = vrot.lane.b32.xlu1 %v1450_v61, %s5517_s27 }
0x1abd   :  { %v1453_v7 = vpop.permute.xlu1 %1452 }
0x1abe   :  { %v1455_v32 = vadd.f32 %v1453_v7, %v1445_v8  ;;  %v1962_v8 = vld [vmem:[%s6437_s7] sm:$0xff]  ;;  %v1963_v7 = vld [vmem:[%s6437_s7 + $0x8] sm:$0xff] }
0x1ac0   :  { %5293 = vtanh.f32 %v1455_v32 }
0x1aca   :  { %v5294_v9 = vpop.eup %5293 }
0x1acb   :  { %1458 = vrot.lane.b32.xlu0 %v5294_v9, %s5516_s18 }
0x1b3d   :  { %v1459_v10 = vpop.permute.xlu0 %1458 }
0x1b3e   :  { %v1461_v11 = vmul.f32 %v5292_v6, %v1459_v10 }
0x1b40   :  { %1463 = vrot.lane.b32.xlu1 %v1461_v11, %s5517_s27 }
0x1bb2   :  { %v5952_v12 = vpop.permute.xlu1 %1463 }
0x1bb3   :  { %4650 = vmatmul.mubr.msk.f32.vlgmr.msra.gmra.mrb[14].mxu1 %vm243_vm2, %v5952_v12 }
0x1bb4   :  { %5048 = vmatpush3.bf16.msra.mxu1 %v5866_v47  ;;  %4671 = vmatprep.mubr.msk.f32.mxu1 %vm5514_vm0, %v5515_v1 }
0x1bb5   :  { %5049 = vmatprep.subr.bf16.mxu1 %v5513_v0 }
0x1bb8   :  { %5051 = vmatpush3.bf16.msra.mxu1 %v5876_v50 }
0x1bb9   :  { %5058 = vmatprep.subr.bf16.mxu1 %v5513_v0 }
0x1c86   :  { %v1533_v15 = vpop.f32.mrb[14].mxu1 }
0x1c87   :  { %v1537_v59 = vadd.f32 %v1533_v15, %v1144_v14  ;;  %v4651_v16 = vpop.f32.mrb[15].mxu1  ;;  %v1964_v14 = vld [vmem:[%s6437_s7 + $0x10] sm:$0xff]  ;;  %v1965_v15 = vld [vmem:[%s6437_s7 + $0x18] sm:$0xff] }
0x1c89   :  { %5295 = vtanh.f32 %v1537_v59  ;;  %v4193_v18 = vmul.f32 -1.442695, %v1537_v59  ;;  %v5068_v59 = vpack.c.bf16 %v1965_v15, %v1964_v14 }
0x1c8b   :  { %5297 = vpow2.f32 %v4193_v18 }
0x1c93   :  { %v5296_v17 = vpop.eup %5295 }
0x1c94   :  { %1547 = vrot.lane.b32.xlu0 %v5296_v17, %s5516_s18 }
0x1c95   :  { %v5298_v19 = vpop.eup %5297 }
0x1c96   :  { %v1541_v20 = vadd.f32 1.0, %v5298_v19 }
0x1c98   :  { %5299 = vrcp.f32 %v1541_v20 }
0x1ca2   :  { %v5300_v21 = vpop.eup %5299 }
0x1ca3   :  { %v1545_v26 = vmul.f32 %v5300_v21, %v1455_v32  ;;  %v5064_v32 = vpack.c.bf16 %v1963_v7, %v1962_v8 }
0x1d06   :  { %v1548_v23 = vpop.permute.xlu0 %1547 }
0x1d07   :  { %v1550_v25 = vmul.f32 %v5300_v21, %v1548_v23 }
0x1d09   :  { %1552 = vrot.lane.b32.xlu1 %v1550_v25, %s5517_s27 }
0x1d7b   :  { %v1553_v33 = vpop.permute.xlu1 %1552 }
0x1d7c   :  { %v1555_v31 = vadd.f32 %v1553_v33, %v1545_v26 }
0x1d7e   :  { %5301 = vtanh.f32 %v1555_v31 }
0x1d88   :  { %v5302_v27 = vpop.eup %5301 }
0x1d89   :  { %1558 = vrot.lane.b32.xlu0 %v5302_v27, %s5516_s18 }
0x1dfb   :  { %v1559_v28 = vpop.permute.xlu0 %1558 }
0x1dfc   :  { %v1561_v29 = vmul.f32 %v5300_v21, %v1559_v28 }
0x1dfe   :  { %1563 = vrot.lane.b32.xlu1 %v1561_v29, %s5517_s27 }
0x1e70   :  { %v5968_v63 = vpop.permute.xlu1 %1563 }
0x1e71   :  { %4661 = vmatmul.mubr.msk.f32.vlgmr.msra.gmra.mrb[24].mxu0 %vm243_vm2, %v5968_v63 }
0x1e72   :  { %5054 = vmatpush3.bf16.msra.mxu0 %v5866_v47  ;;  %4682 = vmatprep.mubr.msk.f32.mxu0 %vm5514_vm0, %v5515_v1 }
0x1e73   :  { %5055 = vmatprep.subr.bf16.mxu0 %v5513_v0 }
0x1e76   :  { %5057 = vmatpush3.bf16.msra.mxu0 %v5876_v50 }
0x1e77   :  { %5065 = vmatprep.subr.bf16.mxu0 %v5064_v32 }
0x1f44   :  { %v1633_v36 = vpop.f32.mrb[24].mxu0 }
0x1f45   :  { %v1637_v62 = vadd.f32 %v1633_v36, %v1149_v22  ;;  %v4662_v37 = vpop.f32.mrb[25].mxu0 }
0x1f46   :  { %v1966_v37 = vld [vmem:[%s6438_s8] sm:$0xff] }
0x1f47   :  { %5303 = vtanh.f32 %v1637_v62  ;;  %v4195_v39 = vmul.f32 -1.442695, %v1637_v62 }
0x1f49   :  { %5305 = vpow2.f32 %v4195_v39 }
0x1f51   :  { %v5304_v38 = vpop.eup %5303 }
0x1f52   :  { %1647 = vrot.lane.b32.xlu0 %v5304_v38, %s5516_s18  ;;  %v1967_v38 = vld [vmem:[%s6438_s8 + $0x8] sm:$0xff] }
0x1f53   :  { %v5306_v40 = vpop.eup %5305  ;;  %v6044_v39 = vpack.c.bf16 %v1967_v38, %v1966_v37 }
0x1f54   :  { %v1641_v41 = vadd.f32 1.0, %v5306_v40  ;;  %v1968_v40 = vld [vmem:[%s6438_s8 + $0x10] sm:$0xff] }
0x1f56   :  { %5307 = vrcp.f32 %v1641_v41  ;;  %v1969_v41 = vld [vmem:[%s6438_s8 + $0x18] sm:$0xff] }
0x1f60   :  { %v5308_v42 = vpop.eup %5307 }
0x1f61   :  { %v1645_v44 = vmul.f32 %v5308_v42, %v1555_v31 }
0x1fc4   :  { %v1648_v30 = vpop.permute.xlu0 %1647 }
0x1fc5   :  { %v1650_v43 = vmul.f32 %v5308_v42, %v1648_v30 }
0x1fc7   :  { %1652 = vrot.lane.b32.xlu1 %v1650_v43, %s5517_s27 }
0x2039   :  { %v1653_v45 = vpop.permute.xlu1 %1652 }
0x203a   :  { %v1655_v35 = vadd.f32 %v1653_v45, %v1645_v44  ;;  %v1164_v45 = vadd.f32 %v5930_v48, %v5901_v58 }
0x203c   :  { %5309 = vtanh.f32 %v1655_v35 }
0x2046   :  { %v5310_v46 = vpop.eup %5309 }
0x2047   :  { %1658 = vrot.lane.b32.xlu0 %v5310_v46, %s5516_s18 }
0x20b9   :  { %v1659_v51 = vpop.permute.xlu0 %1658 }
0x20ba   :  { %v1661_v52 = vmul.f32 %v5308_v42, %v1659_v51  ;;  %v6054_v42 = vpack.c.bf16 %v1969_v41, %v1968_v40 }
0x20bc   :  { %1663 = vrot.lane.b32.xlu1 %v1661_v52, %s5517_s27  ;;  %v6079_v52 = vld [vmem:[%s6439_s9] ss:$0 sm:$0xff] }
0x212e   :  { %v1664_v53 = vpop.permute.xlu1 %1663 }
0x212f   :  { %4672 = vmatmul.mubr.msk.f32.vlgmr.msra.gmra.mrb[16].mxu1 %vm243_vm2, %v1664_v53 }
0x2130   :  { %5060 = vmatpush3.bf16.msra.mxu1 %v5866_v47  ;;  %4693 = vmatprep.mubr.msk.f32.mxu1 %vm5514_vm0, %v5515_v1 }
0x2131   :  { %5061 = vmatprep.subr.bf16.mxu1 %v5513_v0 }
0x2134   :  { %5063 = vmatpush3.bf16.msra.mxu1 %v5876_v50 }
0x2135   :  { %5072 = vmatprep.subr.bf16.mxu1 %v5513_v0 }
0x2202   :  { %v1733_v56 = vpop.f32.mrb[16].mxu1 }
0x2203   :  { %v1737_v57 = vadd.f32 %v1733_v56, %v1154_v55  ;;  %v4673_v60 = vpop.f32.mrb[17].mxu1 }
0x2205   :  { %5311 = vtanh.f32 %v1737_v57  ;;  %v4197_v47 = vmul.f32 -1.442695, %v1737_v57 }
0x2207   :  { %5313 = vpow2.f32 %v4197_v47 }
0x220f   :  { %v5312_v2 = vpop.eup %5311 }
0x2210   :  { %1747 = vrot.lane.b32.xlu0 %v5312_v2, %s5516_s18 }
0x2211   :  { %v5314_v3 = vpop.eup %5313 }
0x2212   :  { %v1741_v4 = vadd.f32 1.0, %v5314_v3 }
0x2214   :  { %5315 = vrcp.f32 %v1741_v4 }
0x221e   :  { %v5316_v5 = vpop.eup %5315 }
0x221f   :  { %v1745_v13 = vmul.f32 %v5316_v5, %v1655_v35 }
0x2282   :  { %v1748_v6 = vpop.permute.xlu0 %1747 }
0x2283   :  { %v1750_v50 = vmul.f32 %v5316_v5, %v1748_v6 }
0x2285   :  { %1752 = vrot.lane.b32.xlu1 %v1750_v50, %s5517_s27 }
0x22f7   :  { %v1753_v61 = vpop.permute.xlu1 %1752 }
0x22f8   :  { %v1755_v34 = vadd.f32 %v1753_v61, %v1745_v13 }
0x22fa   :  { %5317 = vtanh.f32 %v1755_v34 }
0x2304   :  { %v5318_v9 = vpop.eup %5317 }
0x2305   :  { %1758 = vrot.lane.b32.xlu0 %v5318_v9, %s5516_s18 }
0x2377   :  { %v1759_v10 = vpop.permute.xlu0 %1758 }
0x2378   :  { %v1761_v11 = vmul.f32 %v5316_v5, %v1759_v10 }
0x237a   :  { %1763 = vrot.lane.b32.xlu1 %v1761_v11, %s5517_s27 }
0x23ec   :  { %v1764_v16 = vpop.permute.xlu1 %1763 }
0x23ed   :  { %4683 = vmatmul.mubr.msk.f32.vlgmr.msra.gmra.mrb[26].mxu0 %vm243_vm2, %v1764_v16 }
0x23ee   :  { %5067 = vmatpush3.bf16.msra.mxu0 %v5064_v32  ;;  %4704 = vmatprep.mubr.msk.f32.mxu0 %vm243_vm2, %v5910_v24  ;;  %v1159_v24 = vadd.f32 %v5901_v58, %v5932_v49 }
0x23ef   :  { %5069 = vmatprep.subr.bf16.mxu0 %v5068_v59 }
0x23f2   :  { %5071 = vmatpush3.bf16.msra.mxu0 %v5068_v59 }
0x23f3   :  { %5084 = vmatprep.subr.bf16.mxu0 %v5513_v0 }
0x23f5   :  { %4705 = vmatmul.mubr.msk.f32.vlgmr.msra.gmra.mrb[28].mxu0 %vm243_vm2, %v5936_v54 }
0x23f6   :  { %4707 = vmatprep.mubr.msk.f32.mxu0 %vm243_vm2, %v5952_v12  ;;  %5086 = vmatpush3.bf16.msra.mxu0 %v6044_v39 }
0x23f7   :  { %5087 = vmatprep.subr.bf16.mxu0 %v5513_v0 }
0x23f9   :  { %4708 = vmatmul.mubr.msk.f32.gmra.mrb[30].mxu0 %vm243_vm2, %v5968_v63 }
0x23fa   :  { %4710 = vmatprep.mubr.msk.f32.mxu0 %vm243_vm2, %v1664_v53  ;;  %5089 = vmatpush3.bf16.msra.mxu0 %v6054_v42 }
0x23fb   :  { %5096 = vmatprep.subr.bf16.mxu0 %v5513_v0 }
0x23fd   :  { %4711 = vmatmul.mubr.msk.f32.gmra.mrb[32].mxu0 %vm243_vm2, %v1764_v16 }
0x24c0   :  { %v1833_v17 = vpop.f32.mrb[26].mxu0 }
0x24c1   :  { %v1837_v18 = vadd.f32 %v1833_v17, %v1159_v24  ;;  %v4684_v19 = vpop.f32.mrb[27].mxu0 }
0x24c3   :  { %5319 = vtanh.f32 %v1837_v18  ;;  %v4199_v33 = vmul.f32 -1.442695, %v1837_v18 }
0x24c5   :  { %5321 = vpow2.f32 %v4199_v33 }
0x24c8   :  { %v6022_v20 = vpop.f32.mrb[28].mxu0 }
0x24c9   :  { %v2048_v54 = vpop.f32.mrb[29].mxu0 }
0x24ca   :  { %v2049_v53 = vadd.f32 %v6079_v52, %v2048_v54  ;;  %v2054_v54 = vadd.f32 %v6022_v20, %v6079_v52 }
0x24cc   :  { %v6024_v21 = vpop.f32.mrb[30].mxu0 }
0x24cd   :  { %v5320_v12 = vpop.eup %5319  ;;  %v6026_v23 = vpop.f32.mrb[31].mxu0 }
0x24ce   :  { %1847 = vrot.lane.b32.xlu0 %v5320_v12, %s5516_s18 }
0x24cf   :  { %v5322_v49 = vpop.eup %5321 }
0x24d0   :  { %v6029_v25 = vpop.f32.mrb[32].mxu0  ;;  %v1841_v31 = vadd.f32 1.0, %v5322_v49 }
0x24d1   :  { %v6031_v26 = vpop.f32.mrb[33].mxu0 }
0x24d2   :  { %5323 = vrcp.f32 %v1841_v31 }
0x24dc   :  { %v5324_v27 = vpop.eup %5323 }
0x24dd   :  { %v1845_v63 = vmul.f32 %v5324_v27, %v1755_v34 }
0x2540   :  { %v1848_v28 = vpop.permute.xlu0 %1847 }
0x2541   :  { %v1850_v29 = vmul.f32 %v5324_v27, %v1848_v28 }
0x2543   :  { %1852 = vrot.lane.b32.xlu1 %v1850_v29, %s5517_s27 }
0x25b5   :  { %v1853_v22 = vpop.permute.xlu1 %1852 }
0x25b6   :  { %v6034_v36 = vadd.f32 %v1853_v22, %v1845_v63 }
0x25b8   :  { %5325 = vtanh.f32 %v6034_v36 }
0x25c2   :  { %v5326_v62 = vpop.eup %5325 }
0x25c3   :  { %1858 = vrot.lane.b32.xlu0 %v5326_v62, %s5516_s18 }
0x2635   :  { %v1859_v30 = vpop.permute.xlu0 %1858 }
0x2636   :  { %v1861_v43 = vmul.f32 %v5324_v27, %v1859_v30 }
0x2638   :  { %1863 = vrot.lane.b32.xlu1 %v1861_v43, %s5517_s27 }
0x26aa   :  { %v1864_v44 = vpop.permute.xlu1 %1863 }
0x26ab   :  { %4694 = vmatmul.mubr.msk.f32.vlgmr.msra.gmra.mrb[18].mxu1 %vm243_vm2, %v1864_v44  ;;  %4713 = vmatprep.mubr.msk.f32.mxu0 %vm243_vm2, %v1864_v44 }
0x26ac   :  { %5074 = vmatpush3.bf16.msra.mxu1 %v6044_v39  ;;  %4724 = vmatprep.mubr.msk.f32.mxu1 %vm5514_vm0, %v5515_v1 }
0x26ad   :  { %5075 = vmatprep.subr.bf16.mxu1 %v5513_v0 }
0x26b0   :  { %5077 = vmatpush3.bf16.msra.mxu1 %v6054_v42 }
0x26b1   :  { %5078 = vmatprep.subr.bf16.mxu1 %v5513_v0 }
0x26b3   :  { %4725 = vmatmul.mubr.f32.vlgmr.msra.gmra.mrb[20].mxu1 %v5515_v1 }
0x26b4   :  { %5080 = vmatpush3.bf16.msra.mxu1 %v6044_v39  ;;  %4735 = vmatprep.mubr.msk.f32.mxu1 %vm5514_vm0, %v5515_v1 }
0x26b5   :  { %5081 = vmatprep.subr.bf16.mxu1 %v5513_v0 }
0x26b8   :  { %5083 = vmatpush3.bf16.msra.mxu1 %v6054_v42 }
0x26b9   :  { %5090 = vmatprep.subr.bf16.mxu1 %v5513_v0 }
0x277e   :  { %v1933_v35 = vpop.f32.mrb[18].mxu1 }
0x277f   :  { %v1937_v46 = vadd.f32 %v1933_v35, %v1164_v45  ;;  %v4695_v51 = vpop.f32.mrb[19].mxu1  ;;  %v2059_v35 = vadd.f32 %v6079_v52, %v6026_v23 }
0x2781   :  { %v4201_v34 = vmul.f32 -1.442695, %v1937_v46 }
0x2786   :  { %v2153_v55 = vpop.f32.mrb[20].mxu1 }
0x2787   :  { %v2157_v56 = vadd.f32 %v2153_v55, %v2049_v53  ;;  %v4726_v57 = vpop.f32.mrb[21].mxu1 }
0x2789   :  { %5327 = vtanh.f32 %v2157_v56  ;;  %v4211_v2 = vmul.f32 -1.442695, %v2157_v56 }
0x278b   :  { %5329 = vpow2.f32 %v4211_v2 }
0x2793   :  { %v5328_v60 = vpop.eup %5327 }
0x2794   :  { %2167 = vrot.lane.b32.xlu0 %v5328_v60, %s5516_s18 }
0x2795   :  { %v5330_v58 = vpop.eup %5329 }
0x2796   :  { %v2161_v48 = vadd.f32 1.0, %v5330_v58 }
0x2798   :  { %5331 = vrcp.f32 %v2161_v48 }
0x27a2   :  { %v5332_v47 = vpop.eup %5331 }
0x27a3   :  { %v2165_v5 = vmul.f32 0.0, %v5332_v47 }
0x2806   :  { %v2168_v3 = vpop.permute.xlu0 %2167 }
0x2807   :  { %v2170_v4 = vmul.f32 %v5332_v47, %v2168_v3 }
0x2809   :  { %2172 = vrot.lane.b32.xlu1 %v2170_v4, %s5517_s27 }
0x287b   :  { %v2173_v6 = vpop.permute.xlu1 %2172 }
0x287c   :  { %v2175_v50 = vadd.f32 %v2173_v6, %v2165_v5 }
0x287e   :  { %5333 = vtanh.f32 %v2175_v50 }
0x287f   :  { %5335 = vtanh.f32 %v1937_v46 }
0x2880   :  { %5337 = vpow2.f32 %v4201_v34 }
0x2888   :  { %v5334_v13 = vpop.eup %5333 }
0x2889   :  { %2178 = vrot.lane.b32.xlu0 %v5334_v13, %s5516_s18  ;;  %v5336_v61 = vpop.eup %5335  ;;  %v2064_v13 = vadd.f32 %v6024_v21, %v6079_v52 }
0x288a   :  { %v5338_v8 = vpop.eup %5337 }
0x288b   :  { %v1941_v7 = vadd.f32 1.0, %v5338_v8 }
0x288d   :  { %1947 = vrot.lane.b32.xlu0 %v5336_v61, %s5516_s18  ;;  %5339 = vrcp.f32 %v1941_v7 }
0x2897   :  { %v5340_v10 = vpop.eup %5339 }
0x2898   :  { %v1945_v59 = vmul.f32 %v5340_v10, %v6034_v36 }
0x28fb   :  { %v2179_v32 = vpop.permute.xlu0 %2178 }
0x28fc   :  { %v2181_v9 = vmul.f32 %v5332_v47, %v2179_v32 }
0x28fe   :  { %2183 = vrot.lane.b32.xlu1 %v2181_v9, %s5517_s27 }
0x28ff   :  { %v1948_v11 = vpop.permute.xlu0 %1947 }
0x2900   :  { %v1950_v14 = vmul.f32 %v5340_v10, %v1948_v11 }
0x2902   :  { %1952 = vrot.lane.b32.xlu0 %v1950_v14, %s5517_s27 }
0x2970   :  { %v6088_v15 = vpop.permute.xlu1 %2183 }
0x2971   :  { %4736 = vmatmul.mubr.msk.f32.vlgmr.msra.gmra.mrb[22].mxu1 %vm243_vm2, %v6088_v15 }
0x2972   :  { %5092 = vmatpush3.bf16.msra.mxu1 %v6044_v39  ;;  %4757 = vmatprep.mubr.msk.f32.mxu1 %vm5514_vm0, %v5515_v1 }
0x2973   :  { %5093 = vmatprep.subr.bf16.mxu1 %v5513_v0 }
0x2974   :  { %v1953_v16 = vpop.permute.xlu0 %1952 }
0x2975   :  { %v1955_v24 = vadd.f32 %v1953_v16, %v1945_v59 }
0x2976   :  { %5095 = vmatpush3.bf16.msra.mxu1 %v6054_v42 }
0x2977   :  { %5341 = vtanh.f32 %v1955_v24  ;;  %5102 = vmatprep.subr.bf16.mxu1 %v5513_v0 }
0x2981   :  { %v5342_v17 = vpop.eup %5341 }
0x2982   :  { %1958 = vrot.lane.b32.xlu0 %v5342_v17, %s5516_s18 }
0x29f4   :  { %v1959_v18 = vpop.permute.xlu0 %1958 }
0x29f5   :  { %v1961_v19 = vmul.f32 %v5340_v10, %v1959_v18 }
0x29f7   :  { %1978 = vrot.lane.b32.xlu0 %v1961_v19, %s5517_s27 }
0x2a44   :  { %v2253_v12 = vpop.f32.mrb[22].mxu1 }
0x2a45   :  { %v2257_v33 = vadd.f32 %v2253_v12, %v2054_v54  ;;  %v4737_v49 = vpop.f32.mrb[23].mxu1  ;;  %v2069_v12 = vadd.f32 %v6079_v52, %v6031_v26 }
0x2a47   :  { %5343 = vtanh.f32 %v2257_v33  ;;  %v4213_v28 = vmul.f32 -1.442695, %v2257_v33 }
0x2a49   :  { %5345 = vpow2.f32 %v4213_v28 }
0x2a51   :  { %v5344_v31 = vpop.eup %5343 }
0x2a52   :  { %2267 = vrot.lane.b32.xlu1 %v5344_v31, %s5516_s18 }
0x2a53   :  { %v5346_v29 = vpop.eup %5345 }
0x2a54   :  { %v2261_v63 = vadd.f32 1.0, %v5346_v29 }
0x2a56   :  { %5347 = vrcp.f32 %v2261_v63 }
0x2a60   :  { %v5348_v22 = vpop.eup %5347 }
0x2a61   :  { %v2265_v62 = vmul.f32 %v5348_v22, %v2175_v50 }
0x2a69   :  { %v1979_v27 = vpop.permute.xlu0 %1978 }
0x2a6a   :  { %4714 = vmatmul.mubr.msk.f32.gmra.mrb[34].mxu0 %vm243_vm2, %v1979_v27 }
0x2a6b   :  { %4746 = vmatprep.mubr.msk.f32.mxu0 %vm5514_vm0, %v5515_v1 }
0x2ac4   :  { %v2268_v20 = vpop.permute.xlu1 %2267 }
0x2ac5   :  { %v2270_v36 = vmul.f32 %v5348_v22, %v2268_v20 }
0x2ac7   :  { %2272 = vrot.lane.b32.xlu1 %v2270_v36, %s5517_s27 }
0x2b39   :  { %v2273_v37 = vpop.permute.xlu1 %2272 }
0x2b3a   :  { %v2275_v38 = vadd.f32 %v2273_v37, %v2265_v62 }
0x2b3c   :  { %5349 = vtanh.f32 %v2275_v38 }
0x2b3d   :  { %v6108_v40 = vpop.f32.mrb[34].mxu0 }
0x2b3e   :  { %v6110_v41 = vpop.f32.mrb[35].mxu0 }
0x2b46   :  { %v5350_v30 = vpop.eup %5349 }
0x2b47   :  { %2278 = vrot.lane.b32.xlu1 %v5350_v30, %s5516_s18 }
0x2bb9   :  { %v2279_v43 = vpop.permute.xlu1 %2278 }
0x2bba   :  { %v2281_v44 = vmul.f32 %v5348_v22, %v2279_v43 }
0x2bbc   :  { %2283 = vrot.lane.b32.xlu1 %v2281_v44, %s5517_s27 }
0x2c2e   :  { %v6114_v45 = vpop.permute.xlu1 %2283 }
0x2c2f   :  { %4747 = vmatmul.mubr.msk.f32.vlgmr.msra.gmra.mrb[36].mxu0 %vm243_vm2, %v6114_v45 }
0x2c30   :  { %5098 = vmatpush3.bf16.msra.mxu0 %v6044_v39  ;;  %4768 = vmatprep.mubr.msk.f32.mxu0 %vm5514_vm0, %v5515_v1 }
0x2c31   :  { %5099 = vmatprep.subr.bf16.mxu0 %v5513_v0 }
0x2c34   :  { %5101 = vmatpush3.bf16.msra.mxu0 %v6054_v42 }
0x2c35   :  { %5108 = vmatprep.subr.bf16.mxu0 %v5513_v0 }
0x2d02   :  { %v2353_v46 = vpop.f32.mrb[36].mxu0 }
0x2d03   :  { %v2357_v51 = vadd.f32 %v2353_v46, %v2059_v35  ;;  %v4748_v53 = vpop.f32.mrb[37].mxu0  ;;  %v2074_v35 = vadd.f32 %v6029_v25, %v6079_v52 }
0x2d05   :  { %5351 = vtanh.f32 %v2357_v51  ;;  %v4215_v56 = vmul.f32 -1.442695, %v2357_v51 }
0x2d07   :  { %5353 = vpow2.f32 %v4215_v56 }
0x2d0f   :  { %v5352_v55 = vpop.eup %5351 }
0x2d10   :  { %2367 = vrot.lane.b32.xlu0 %v5352_v55, %s5516_s18 }
0x2d11   :  { %v5354_v57 = vpop.eup %5353 }
0x2d12   :  { %v2361_v60 = vadd.f32 1.0, %v5354_v57 }
0x2d14   :  { %5355 = vrcp.f32 %v2361_v60 }
0x2d1e   :  { %v5356_v2 = vpop.eup %5355 }
0x2d1f   :  { %v2365_v47 = vmul.f32 %v5356_v2, %v2275_v38 }
0x2d82   :  { %v2368_v58 = vpop.permute.xlu0 %2367 }
0x2d83   :  { %v2370_v48 = vmul.f32 %v5356_v2, %v2368_v58 }
0x2d85   :  { %2372 = vrot.lane.b32.xlu1 %v2370_v48, %s5517_s27 }
0x2df7   :  { %v2373_v3 = vpop.permute.xlu1 %2372 }
0x2df8   :  { %v2375_v23 = vadd.f32 %v2373_v3, %v2365_v47  ;;  %v2882_v47 = vld [vmem:[%s6440_s10] sm:$0xff]  ;;  %v2883_v3 = vld [vmem:[%s6440_s10 + $0x8] sm:$0xff] }
0x2dfa   :  { %5357 = vtanh.f32 %v2375_v23 }
0x2e04   :  { %v5358_v4 = vpop.eup %5357 }
0x2e05   :  { %2378 = vrot.lane.b32.xlu0 %v5358_v4, %s5516_s18 }
0x2e77   :  { %v2379_v5 = vpop.permute.xlu0 %2378 }
0x2e78   :  { %v2381_v6 = vmul.f32 %v5356_v2, %v2379_v5 }
0x2e7a   :  { %2383 = vrot.lane.b32.xlu1 %v2381_v6, %s5517_s27 }
0x2eec   :  { %v6130_v50 = vpop.permute.xlu1 %2383 }
0x2eed   :  { %4758 = vmatmul.mubr.msk.f32.vlgmr.msra.gmra.mrb[24].mxu1 %vm243_vm2, %v6130_v50 }
0x2eee   :  { %5104 = vmatpush3.bf16.msra.mxu1 %v6044_v39  ;;  %4779 = vmatprep.mubr.msk.f32.mxu1 %vm5514_vm0, %v5515_v1 }
0x2eef   :  { %5105 = vmatprep.subr.bf16.mxu1 %v5513_v0 }
0x2ef2   :  { %5107 = vmatpush3.bf16.msra.mxu1 %v6054_v42 }
0x2ef3   :  { %5114 = vmatprep.subr.bf16.mxu1 %v5513_v0 }
0x2fc0   :  { %v2453_v61 = vpop.f32.mrb[24].mxu1 }
0x2fc1   :  { %v2457_v34 = vadd.f32 %v2453_v61, %v2064_v13  ;;  %v4759_v8 = vpop.f32.mrb[25].mxu1  ;;  %v2884_v13 = vld [vmem:[%s6440_s10 + $0x10] sm:$0xff]  ;;  %v2885_v61 = vld [vmem:[%s6440_s10 + $0x18] sm:$0xff] }
0x2fc3   :  { %5359 = vtanh.f32 %v2457_v34  ;;  %v4217_v32 = vmul.f32 -1.442695, %v2457_v34  ;;  %v5124_v34 = vpack.c.bf16 %v2885_v61, %v2884_v13 }
0x2fc5   :  { %5361 = vpow2.f32 %v4217_v32 }
0x2fcd   :  { %v5360_v7 = vpop.eup %5359 }
0x2fce   :  { %2467 = vrot.lane.b32.xlu0 %v5360_v7, %s5516_s18 }
0x2fcf   :  { %v5362_v9 = vpop.eup %5361 }
0x2fd0   :  { %v2461_v10 = vadd.f32 1.0, %v5362_v9 }
0x2fd2   :  { %5363 = vrcp.f32 %v2461_v10 }
0x2fdc   :  { %v5364_v11 = vpop.eup %5363 }
0x2fdd   :  { %v2465_v16 = vmul.f32 %v5364_v11, %v2375_v23  ;;  %v5120_v23 = vpack.c.bf16 %v2883_v3, %v2882_v47 }
0x3040   :  { %v2468_v14 = vpop.permute.xlu0 %2467 }
0x3041   :  { %v2470_v59 = vmul.f32 %v5364_v11, %v2468_v14 }
0x3043   :  { %2472 = vrot.lane.b32.xlu1 %v2470_v59, %s5517_s27 }
0x30b5   :  { %v2473_v24 = vpop.permute.xlu1 %2472 }
0x30b6   :  { %v2475_v21 = vadd.f32 %v2473_v24, %v2465_v16 }
0x30b8   :  { %5365 = vtanh.f32 %v2475_v21 }
0x30c2   :  { %v5366_v17 = vpop.eup %5365 }
0x30c3   :  { %2478 = vrot.lane.b32.xlu0 %v5366_v17, %s5516_s18 }
0x3135   :  { %v2479_v18 = vpop.permute.xlu0 %2478 }
0x3136   :  { %v2481_v19 = vmul.f32 %v5364_v11, %v2479_v18 }
0x3138   :  { %2483 = vrot.lane.b32.xlu1 %v2481_v19, %s5517_s27 }
0x31aa   :  { %v6146_v54 = vpop.permute.xlu1 %2483 }
0x31ab   :  { %4769 = vmatmul.mubr.msk.f32.vlgmr.msra.gmra.mrb[38].mxu0 %vm243_vm2, %v6146_v54 }
0x31ac   :  { %5110 = vmatpush3.bf16.msra.mxu0 %v6044_v39  ;;  %4790 = vmatprep.mubr.msk.f32.mxu0 %vm5514_vm0, %v5515_v1 }
0x31ad   :  { %5111 = vmatprep.subr.bf16.mxu0 %v5513_v0 }
0x31b0   :  { %5113 = vmatpush3.bf16.msra.mxu0 %v6054_v42 }
0x31b1   :  { %5121 = vmatprep.subr.bf16.mxu0 %v5120_v23 }
0x327e   :  { %v2553_v33 = vpop.f32.mrb[38].mxu0 }
0x327f   :  { %v2557_v49 = vadd.f32 %v2553_v33, %v2069_v12  ;;  %v4770_v31 = vpop.f32.mrb[39].mxu0 }
0x3280   :  { %v2886_v31 = vld [vmem:[%s6441_s11] sm:$0xff] }
0x3281   :  { %5367 = vtanh.f32 %v2557_v49  ;;  %v4219_v28 = vmul.f32 -1.442695, %v2557_v49 }
0x3283   :  { %5369 = vpow2.f32 %v4219_v28 }
0x328b   :  { %v5368_v27 = vpop.eup %5367 }
0x328c   :  { %2567 = vrot.lane.b32.xlu0 %v5368_v27, %s5516_s18  ;;  %v2887_v27 = vld [vmem:[%s6441_s11 + $0x8] sm:$0xff] }
0x328d   :  { %v5370_v29 = vpop.eup %5369  ;;  %v6222_v28 = vpack.c.bf16 %v2887_v27, %v2886_v31 }
0x328e   :  { %v2561_v63 = vadd.f32 1.0, %v5370_v29  ;;  %v2888_v29 = vld [vmem:[%s6441_s11 + $0x10] sm:$0xff] }
0x3290   :  { %5371 = vrcp.f32 %v2561_v63  ;;  %v2889_v63 = vld [vmem:[%s6441_s11 + $0x18] sm:$0xff] }
0x329a   :  { %v5372_v22 = vpop.eup %5371 }
0x329b   :  { %v2565_v62 = vmul.f32 %v5372_v22, %v2475_v21 }
0x32fe   :  { %v2568_v20 = vpop.permute.xlu0 %2567 }
0x32ff   :  { %v2570_v36 = vmul.f32 %v5372_v22, %v2568_v20 }
0x3301   :  { %2572 = vrot.lane.b32.xlu1 %v2570_v36, %s5517_s27 }
0x3373   :  { %v2573_v37 = vpop.permute.xlu1 %2572 }
0x3374   :  { %v2575_v26 = vadd.f32 %v2573_v37, %v2565_v62  ;;  %v2084_v37 = vadd.f32 %v6108_v40, %v6079_v52 }
0x3376   :  { %5373 = vtanh.f32 %v2575_v26 }
0x3380   :  { %v5374_v38 = vpop.eup %5373 }
0x3381   :  { %2578 = vrot.lane.b32.xlu0 %v5374_v38, %s5516_s18 }
0x33f3   :  { %v2579_v30 = vpop.permute.xlu0 %2578 }
0x33f4   :  { %v2581_v43 = vmul.f32 %v5372_v22, %v2579_v30  ;;  %v6232_v22 = vpack.c.bf16 %v2889_v63, %v2888_v29 }
0x33f6   :  { %2583 = vrot.lane.b32.xlu1 %v2581_v43, %s5517_s27  ;;  %v6257_v43 = vld [vmem:[%s6442_s12] ss:$0 sm:$0xff] }
0x3468   :  { %v2584_v44 = vpop.permute.xlu1 %2583 }
0x3469   :  { %4780 = vmatmul.mubr.msk.f32.vlgmr.msra.gmra.mrb[26].mxu1 %vm243_vm2, %v2584_v44 }
0x346a   :  { %5116 = vmatpush3.bf16.msra.mxu1 %v6044_v39  ;;  %4801 = vmatprep.mubr.msk.f32.mxu1 %vm5514_vm0, %v5515_v1 }
0x346b   :  { %5117 = vmatprep.subr.bf16.mxu1 %v5513_v0 }
0x346e   :  { %5119 = vmatpush3.bf16.msra.mxu1 %v6054_v42 }
0x346f   :  { %5128 = vmatprep.subr.bf16.mxu1 %v5513_v0 }
0x353c   :  { %v2653_v46 = vpop.f32.mrb[26].mxu1 }
0x353d   :  { %v2657_v51 = vadd.f32 %v2653_v46, %v2074_v35  ;;  %v4781_v53 = vpop.f32.mrb[27].mxu1 }
0x353f   :  { %5375 = vtanh.f32 %v2657_v51  ;;  %v4221_v39 = vmul.f32 -1.442695, %v2657_v51 }
0x3541   :  { %5377 = vpow2.f32 %v4221_v39 }
0x3549   :  { %v5376_v55 = vpop.eup %5375 }
0x354a   :  { %2667 = vrot.lane.b32.xlu0 %v5376_v55, %s5516_s18 }
0x354b   :  { %v5378_v56 = vpop.eup %5377 }
0x354c   :  { %v2661_v57 = vadd.f32 1.0, %v5378_v56 }
0x354e   :  { %5379 = vrcp.f32 %v2661_v57 }
0x3558   :  { %v5380_v60 = vpop.eup %5379 }
0x3559   :  { %v2665_v58 = vmul.f32 %v5380_v60, %v2575_v26 }
0x35bc   :  { %v2668_v2 = vpop.permute.xlu0 %2667 }
0x35bd   :  { %v2670_v42 = vmul.f32 %v5380_v60, %v2668_v2 }
0x35bf   :  { %2672 = vrot.lane.b32.xlu1 %v2670_v42, %s5517_s27 }
0x3631   :  { %v2673_v48 = vpop.permute.xlu1 %2672 }
0x3632   :  { %v2675_v25 = vadd.f32 %v2673_v48, %v2665_v58 }
0x3634   :  { %5381 = vtanh.f32 %v2675_v25 }
0x363e   :  { %v5382_v4 = vpop.eup %5381 }
0x363f   :  { %2678 = vrot.lane.b32.xlu0 %v5382_v4, %s5516_s18 }
0x36b1   :  { %v2679_v5 = vpop.permute.xlu0 %2678 }
0x36b2   :  { %v2681_v6 = vmul.f32 %v5380_v60, %v2679_v5 }
0x36b4   :  { %2683 = vrot.lane.b32.xlu1 %v2681_v6, %s5517_s27 }
0x3726   :  { %v2684_v8 = vpop.permute.xlu1 %2683 }
0x3727   :  { %4791 = vmatmul.mubr.msk.f32.vlgmr.msra.gmra.mrb[40].mxu0 %vm243_vm2, %v2684_v8 }
0x3728   :  { %5123 = vmatpush3.bf16.msra.mxu0 %v5120_v23  ;;  %4812 = vmatprep.mubr.msk.f32.mxu0 %vm243_vm2, %v6088_v15  ;;  %v2079_v15 = vadd.f32 %v6079_v52, %v6110_v41 }
0x3729   :  { %5125 = vmatprep.subr.bf16.mxu0 %v5124_v34 }
0x372c   :  { %5127 = vmatpush3.bf16.msra.mxu0 %v5124_v34 }
0x372d   :  { %5140 = vmatprep.subr.bf16.mxu0 %v5513_v0 }
0x372f   :  { %4813 = vmatmul.mubr.msk.f32.vlgmr.msra.gmra.mrb[42].mxu0 %vm243_vm2, %v6114_v45 }
0x3730   :  { %4815 = vmatprep.mubr.msk.f32.mxu0 %vm243_vm2, %v6130_v50  ;;  %5142 = vmatpush3.bf16.msra.mxu0 %v6222_v28 }
0x3731   :  { %5143 = vmatprep.subr.bf16.mxu0 %v5513_v0 }
0x3733   :  { %4816 = vmatmul.mubr.msk.f32.gmra.mrb[44].mxu0 %vm243_vm2, %v6146_v54 }
0x3734   :  { %4818 = vmatprep.mubr.msk.f32.mxu0 %vm243_vm2, %v2584_v44  ;;  %5145 = vmatpush3.bf16.msra.mxu0 %v6232_v22 }
0x3735   :  { %5152 = vmatprep.subr.bf16.mxu0 %v5513_v0 }
0x3737   :  { %4819 = vmatmul.mubr.msk.f32.gmra.mrb[46].mxu0 %vm243_vm2, %v2684_v8 }
0x37fa   :  { %v2753_v7 = vpop.f32.mrb[40].mxu0 }
0x37fb   :  { %v2757_v32 = vadd.f32 %v2753_v7, %v2079_v15  ;;  %v4792_v9 = vpop.f32.mrb[41].mxu0 }
0x37fd   :  { %5383 = vtanh.f32 %v2757_v32  ;;  %v4223_v24 = vmul.f32 -1.442695, %v2757_v32 }
0x37ff   :  { %5385 = vpow2.f32 %v4223_v24 }
0x3802   :  { %v6200_v10 = vpop.f32.mrb[42].mxu0 }
0x3803   :  { %v2968_v45 = vpop.f32.mrb[43].mxu0 }
0x3804   :  { %v2969_v44 = vadd.f32 %v6257_v43, %v2968_v45  ;;  %v2974_v45 = vadd.f32 %v6200_v10, %v6257_v43 }
0x3806   :  { %v6202_v11 = vpop.f32.mrb[44].mxu0 }
0x3807   :  { %v5384_v50 = vpop.eup %5383  ;;  %v6204_v14 = vpop.f32.mrb[45].mxu0 }
0x3808   :  { %2767 = vrot.lane.b32.xlu0 %v5384_v50, %s5516_s18 }
0x3809   :  { %v5386_v41 = vpop.eup %5385 }
0x380a   :  { %v6207_v59 = vpop.f32.mrb[46].mxu0  ;;  %v2761_v21 = vadd.f32 1.0, %v5386_v41 }
0x380b   :  { %v6209_v16 = vpop.f32.mrb[47].mxu0 }
0x380c   :  { %5387 = vrcp.f32 %v2761_v21 }
0x3816   :  { %v5388_v17 = vpop.eup %5387 }
0x3817   :  { %v2765_v54 = vmul.f32 %v5388_v17, %v2675_v25 }
0x387a   :  { %v2768_v18 = vpop.permute.xlu0 %2767 }
0x387b   :  { %v2770_v19 = vmul.f32 %v5388_v17, %v2768_v18 }
0x387d   :  { %2772 = vrot.lane.b32.xlu1 %v2770_v19, %s5517_s27 }
0x38ef   :  { %v2773_v12 = vpop.permute.xlu1 %2772 }
0x38f0   :  { %v6212_v33 = vadd.f32 %v2773_v12, %v2765_v54 }
0x38f2   :  { %5389 = vtanh.f32 %v6212_v33 }
0x38fc   :  { %v5390_v49 = vpop.eup %5389 }
0x38fd   :  { %2778 = vrot.lane.b32.xlu0 %v5390_v49, %s5516_s18 }
0x396f   :  { %v2779_v20 = vpop.permute.xlu0 %2778 }
0x3970   :  { %v2781_v36 = vmul.f32 %v5388_v17, %v2779_v20 }
0x3972   :  { %2783 = vrot.lane.b32.xlu1 %v2781_v36, %s5517_s27 }
0x39e4   :  { %v2784_v62 = vpop.permute.xlu1 %2783 }
0x39e5   :  { %4802 = vmatmul.mubr.msk.f32.vlgmr.msra.gmra.mrb[28].mxu1 %vm243_vm2, %v2784_v62  ;;  %4821 = vmatprep.mubr.msk.f32.mxu0 %vm243_vm2, %v2784_v62 }
0x39e6   :  { %5130 = vmatpush3.bf16.msra.mxu1 %v6222_v28  ;;  %4832 = vmatprep.mubr.msk.f32.mxu1 %vm5514_vm0, %v5515_v1 }
0x39e7   :  { %5131 = vmatprep.subr.bf16.mxu1 %v5513_v0 }
0x39ea   :  { %5133 = vmatpush3.bf16.msra.mxu1 %v6232_v22 }
0x39eb   :  { %5134 = vmatprep.subr.bf16.mxu1 %v5513_v0 }
0x39ed   :  { %4833 = vmatmul.mubr.f32.vlgmr.msra.gmra.mrb[30].mxu1 %v5515_v1 }
0x39ee   :  { %5136 = vmatpush3.bf16.msra.mxu1 %v6222_v28  ;;  %4843 = vmatprep.mubr.msk.f32.mxu1 %vm5514_vm0, %v5515_v1 }
0x39ef   :  { %5137 = vmatprep.subr.bf16.mxu1 %v5513_v0 }
0x39f2   :  { %5139 = vmatpush3.bf16.msra.mxu1 %v6232_v22 }
0x39f3   :  { %5146 = vmatprep.subr.bf16.mxu1 %v5513_v0 }
0x3ab8   :  { %v2853_v26 = vpop.f32.mrb[28].mxu1 }
0x3ab9   :  { %v2857_v38 = vadd.f32 %v2853_v26, %v2084_v37  ;;  %v4803_v30 = vpop.f32.mrb[29].mxu1  ;;  %v2979_v26 = vadd.f32 %v6257_v43, %v6204_v14 }
0x3abb   :  { %v4225_v25 = vmul.f32 -1.442695, %v2857_v38 }
0x3ac0   :  { %v3073_v35 = vpop.f32.mrb[30].mxu1 }
0x3ac1   :  { %v3077_v46 = vadd.f32 %v3073_v35, %v2969_v44  ;;  %v4834_v51 = vpop.f32.mrb[31].mxu1 }
0x3ac3   :  { %5391 = vtanh.f32 %v3077_v46  ;;  %v4235_v55 = vmul.f32 -1.442695, %v3077_v46 }
0x3ac5   :  { %5393 = vpow2.f32 %v4235_v55 }
0x3acd   :  { %v5392_v53 = vpop.eup %5391 }
0x3ace   :  { %3087 = vrot.lane.b32.xlu0 %v5392_v53, %s5516_s18 }
0x3acf   :  { %v5394_v52 = vpop.eup %5393 }
0x3ad0   :  { %v3081_v40 = vadd.f32 1.0, %v5394_v52 }
0x3ad2   :  { %5395 = vrcp.f32 %v3081_v40 }
0x3adc   :  { %v5396_v39 = vpop.eup %5395 }
0x3add   :  { %v3085_v60 = vmul.f32 0.0, %v5396_v39 }
0x3b40   :  { %v3088_v56 = vpop.permute.xlu0 %3087 }
0x3b41   :  { %v3090_v57 = vmul.f32 %v5396_v39, %v3088_v56 }
0x3b43   :  { %3092 = vrot.lane.b32.xlu1 %v3090_v57, %s5517_s27 }
0x3bb5   :  { %v3093_v2 = vpop.permute.xlu1 %3092 }
0x3bb6   :  { %v3095_v42 = vadd.f32 %v3093_v2, %v3085_v60 }
0x3bb8   :  { %5397 = vtanh.f32 %v3095_v42 }
0x3bb9   :  { %5399 = vtanh.f32 %v2857_v38 }
0x3bba   :  { %5401 = vpow2.f32 %v4225_v25 }
0x3bc2   :  { %v5398_v58 = vpop.eup %5397 }
0x3bc3   :  { %3098 = vrot.lane.b32.xlu0 %v5398_v58, %s5516_s18  ;;  %v5400_v48 = vpop.eup %5399  ;;  %v2984_v58 = vadd.f32 %v6202_v11, %v6257_v43 }
0x3bc4   :  { %v5402_v47 = vpop.eup %5401 }
0x3bc5   :  { %v2861_v3 = vadd.f32 1.0, %v5402_v47 }
0x3bc7   :  { %2867 = vrot.lane.b32.xlu0 %v5400_v48, %s5516_s18  ;;  %5403 = vrcp.f32 %v2861_v3 }
0x3bd1   :  { %v5404_v5 = vpop.eup %5403 }
0x3bd2   :  { %v2865_v34 = vmul.f32 %v5404_v5, %v6212_v33 }
0x3c35   :  { %v3099_v23 = vpop.permute.xlu0 %3098 }
0x3c36   :  { %v3101_v4 = vmul.f32 %v5396_v39, %v3099_v23 }
0x3c38   :  { %3103 = vrot.lane.b32.xlu1 %v3101_v4, %s5517_s27 }
0x3c39   :  { %v2868_v6 = vpop.permute.xlu0 %2867 }
0x3c3a   :  { %v2870_v13 = vmul.f32 %v5404_v5, %v2868_v6 }
0x3c3c   :  { %2872 = vrot.lane.b32.xlu0 %v2870_v13, %s5517_s27 }
0x3caa   :  { %v3104_v61 = vpop.permute.xlu1 %3103 }
0x3cab   :  { %4844 = vmatmul.mubr.msk.f32.vlgmr.msra.gmra.mrb[32].mxu1 %vm243_vm2, %v3104_v61 }
0x3cac   :  { %5148 = vmatpush3.bf16.msra.mxu1 %v6222_v28  ;;  %4865 = vmatprep.mubr.msk.f32.mxu1 %vm5514_vm0, %v5515_v1 }
0x3cad   :  { %5149 = vmatprep.subr.bf16.mxu1 %v5513_v0 }
0x3cae   :  { %v2873_v8 = vpop.permute.xlu0 %2872 }
0x3caf   :  { %v2875_v15 = vadd.f32 %v2873_v8, %v2865_v34 }
0x3cb0   :  { %5151 = vmatpush3.bf16.msra.mxu1 %v6232_v22 }
0x3cb1   :  { %5405 = vtanh.f32 %v2875_v15  ;;  %5158 = vmatprep.subr.bf16.mxu1 %v5513_v0 }
0x3cbb   :  { %v5406_v7 = vpop.eup %5405 }
0x3cbc   :  { %2878 = vrot.lane.b32.xlu0 %v5406_v7, %s5516_s18 }
0x3d2e   :  { %v2879_v32 = vpop.permute.xlu0 %2878 }
0x3d2f   :  { %v2881_v9 = vmul.f32 %v5404_v5, %v2879_v32 }
0x3d31   :  { %2898 = vrot.lane.b32.xlu0 %v2881_v9, %s5517_s27 }
0x3d7e   :  { %v3173_v50 = vpop.f32.mrb[32].mxu1 }
0x3d7f   :  { %v3177_v24 = vadd.f32 %v3173_v50, %v2974_v45  ;;  %v4845_v41 = vpop.f32.mrb[33].mxu1  ;;  %v2989_v45 = vadd.f32 %v6257_v43, %v6209_v16 }
0x3d81   :  { %5407 = vtanh.f32 %v3177_v24  ;;  %v4237_v18 = vmul.f32 -1.442695, %v3177_v24 }
0x3d83   :  { %5409 = vpow2.f32 %v4237_v18 }
0x3d8b   :  { %v5408_v21 = vpop.eup %5407 }
0x3d8c   :  { %3187 = vrot.lane.b32.xlu1 %v5408_v21, %s5516_s18 }
0x3d8d   :  { %v5410_v19 = vpop.eup %5409 }
0x3d8e   :  { %v3181_v54 = vadd.f32 1.0, %v5410_v19 }
0x3d90   :  { %5411 = vrcp.f32 %v3181_v54 }
0x3d9a   :  { %v5412_v12 = vpop.eup %5411 }
0x3d9b   :  { %v3185_v49 = vmul.f32 %v5412_v12, %v3095_v42 }
0x3da3   :  { %v2899_v17 = vpop.permute.xlu0 %2898 }
0x3da4   :  { %4822 = vmatmul.mubr.msk.f32.gmra.mrb[48].mxu0 %vm243_vm2, %v2899_v17 }
0x3da5   :  { %4854 = vmatprep.mubr.msk.f32.mxu0 %vm5514_vm0, %v5515_v1 }
0x3dfe   :  { %v3188_v10 = vpop.permute.xlu1 %3187 }
0x3dff   :  { %v3190_v33 = vmul.f32 %v5412_v12, %v3188_v10 }
0x3e01   :  { %3192 = vrot.lane.b32.xlu1 %v3190_v33, %s5517_s27 }
0x3e73   :  { %v3193_v31 = vpop.permute.xlu1 %3192 }
0x3e74   :  { %v3195_v27 = vadd.f32 %v3193_v31, %v3185_v49 }
0x3e76   :  { %5413 = vtanh.f32 %v3195_v27 }
0x3e77   :  { %v6283_v29 = vpop.f32.mrb[48].mxu0 }
0x3e78   :  { %v6285_v63 = vpop.f32.mrb[49].mxu0 }
0x3e80   :  { %v5414_v20 = vpop.eup %5413 }
0x3e81   :  { %3198 = vrot.lane.b32.xlu1 %v5414_v20, %s5516_s18 }
0x3ef3   :  { %v3199_v36 = vpop.permute.xlu1 %3198 }
0x3ef4   :  { %v3201_v62 = vmul.f32 %v5412_v12, %v3199_v36 }
0x3ef6   :  { %3203 = vrot.lane.b32.xlu1 %v3201_v62, %s5517_s27  ;;  %v2994_v62 = vadd.f32 %v6207_v59, %v6257_v43 }
0x3f68   :  { %v3204_v37 = vpop.permute.xlu1 %3203 }
0x3f69   :  { %4855 = vmatmul.mubr.msk.f32.vlgmr.msra.gmra.mrb[50].mxu0 %vm243_vm2, %v3204_v37 }
0x3f6a   :  { %5154 = vmatpush3.bf16.msra.mxu0 %v6222_v28  ;;  %4876 = vmatprep.mubr.msk.f32.mxu0 %vm5514_vm0, %v5515_v1 }
0x3f6b   :  { %5155 = vmatprep.subr.bf16.mxu0 %v5513_v0 }
0x3f6e   :  { %5157 = vmatpush3.bf16.msra.mxu0 %v6232_v22 }
0x3f6f   :  { %5164 = vmatprep.subr.bf16.mxu0 %v5513_v0 }
0x403c   :  { %v3273_v38 = vpop.f32.mrb[50].mxu0 }
0x403d   :  { %v3277_v30 = vadd.f32 %v3273_v38, %v2979_v26  ;;  %v4856_v44 = vpop.f32.mrb[51].mxu0 }
0x403f   :  { %5415 = vtanh.f32 %v3277_v30  ;;  %v4239_v46 = vmul.f32 -1.442695, %v3277_v30 }
0x4041   :  { %5417 = vpow2.f32 %v4239_v46 }
0x4049   :  { %v5416_v35 = vpop.eup %5415 }
0x404a   :  { %3287 = vrot.lane.b32.xlu0 %v5416_v35, %s5516_s18 }
0x404b   :  { %v5418_v51 = vpop.eup %5417 }
0x404c   :  { %v3281_v53 = vadd.f32 1.0, %v5418_v51 }
0x404e   :  { %5419 = vrcp.f32 %v3281_v53 }
0x4058   :  { %v5420_v55 = vpop.eup %5419 }
0x4059   :  { %v3285_v39 = vmul.f32 %v5420_v55, %v3195_v27 }
0x40bc   :  { %v3288_v52 = vpop.permute.xlu0 %3287 }
0x40bd   :  { %v3290_v40 = vmul.f32 %v5420_v55, %v3288_v52 }
0x40bf   :  { %3292 = vrot.lane.b32.xlu1 %v3290_v40, %s5517_s27 }
0x4131   :  { %v3293_v56 = vpop.permute.xlu1 %3292 }
0x4132   :  { %v3295_v14 = vadd.f32 %v3293_v56, %v3285_v39 }
0x4134   :  { %5421 = vtanh.f32 %v3295_v14 }
0x413e   :  { %v5422_v57 = vpop.eup %5421 }
0x413f   :  { %3298 = vrot.lane.b32.xlu0 %v5422_v57, %s5516_s18 }
0x41b1   :  { %v3299_v60 = vpop.permute.xlu0 %3298 }
0x41b2   :  { %v3301_v2 = vmul.f32 %v5420_v55, %v3299_v60 }
0x41b4   :  { %3303 = vrot.lane.b32.xlu1 %v3301_v2, %s5517_s27 }
0x4226   :  { %v3304_v42 = vpop.permute.xlu1 %3303 }
0x4227   :  { %4866 = vmatmul.mubr.msk.f32.vlgmr.msra.gmra.mrb[34].mxu1 %vm243_vm2, %v3304_v42 }
0x4228   :  { %5160 = vmatpush3.bf16.msra.mxu1 %v6222_v28  ;;  %4887 = vmatprep.mubr.msk.f32.mxu1 %vm5514_vm0, %v5515_v1 }
0x4229   :  { %5161 = vmatprep.subr.bf16.mxu1 %v5513_v0 }
0x422c   :  { %5163 = vmatpush3.bf16.msra.mxu1 %v6232_v22 }
0x422d   :  { %5170 = vmatprep.subr.bf16.mxu1 %v5513_v0 }
0x42fa   :  { %v3373_v48 = vpop.f32.mrb[34].mxu1 }
0x42fb   :  { %v3377_v25 = vadd.f32 %v3373_v48, %v2984_v58  ;;  %v4867_v47 = vpop.f32.mrb[35].mxu1 }
0x42fd   :  { %5423 = vtanh.f32 %v3377_v25  ;;  %v4241_v23 = vmul.f32 -1.442695, %v3377_v25 }
0x42ff   :  { %5425 = vpow2.f32 %v4241_v23 }
0x4307   :  { %v5424_v3 = vpop.eup %5423 }
0x4308   :  { %3387 = vrot.lane.b32.xlu0 %v5424_v3, %s5516_s18 }
0x4309   :  { %v5426_v4 = vpop.eup %5425 }
0x430a   :  { %v3381_v5 = vadd.f32 1.0, %v5426_v4 }
0x430c   :  { %5427 = vrcp.f32 %v3381_v5 }
0x4316   :  { %v5428_v6 = vpop.eup %5427 }
0x4317   :  { %v3385_v34 = vmul.f32 %v5428_v6, %v3295_v14  ;;  %v2999_v14 = vadd.f32 %v6257_v43, %v6285_v63 }
0x437a   :  { %v3388_v13 = vpop.permute.xlu0 %3387 }
0x437b   :  { %v3390_v61 = vmul.f32 %v5428_v6, %v3388_v13 }
0x437d   :  { %3392 = vrot.lane.b32.xlu1 %v3390_v61, %s5517_s27 }
0x43ef   :  { %v3393_v8 = vpop.permute.xlu1 %3392 }
0x43f0   :  { %v3395_v11 = vadd.f32 %v3393_v8, %v3385_v34  ;;  %v3004_v8 = vadd.f32 %v6283_v29, %v6257_v43  ;;  %v3802_v29 = vld [vmem:[%s6443_s13] sm:$0xff] }
0x43f2   :  { %5429 = vtanh.f32 %v3395_v11 }
0x43fc   :  { %v5430_v15 = vpop.eup %5429 }
0x43fd   :  { %3398 = vrot.lane.b32.xlu0 %v5430_v15, %s5516_s18 }
0x446f   :  { %v3399_v7 = vpop.permute.xlu0 %3398 }
0x4470   :  { %v3401_v32 = vmul.f32 %v5428_v6, %v3399_v7 }
0x4472   :  { %3403 = vrot.lane.b32.xlu1 %v3401_v32, %s5517_s27 }
0x44e4   :  { %v3404_v9 = vpop.permute.xlu1 %3403 }
0x44e5   :  { %4877 = vmatmul.mubr.msk.f32.vlgmr.msra.gmra.mrb[52].mxu0 %vm243_vm2, %v3404_v9 }
0x44e6   :  { %5166 = vmatpush3.bf16.msra.mxu0 %v6222_v28  ;;  %4898 = vmatprep.mubr.msk.f32.mxu0 %vm5514_vm0, %v5515_v1 }
0x44e7   :  { %5167 = vmatprep.subr.bf16.mxu0 %v5513_v0 }
0x44ea   :  { %5169 = vmatpush3.bf16.msra.mxu0 %v6232_v22 }
0x44eb   :  { %5176 = vmatprep.subr.bf16.mxu0 %v5513_v0 }
0x45b8   :  { %v3473_v50 = vpop.f32.mrb[52].mxu0 }
0x45b9   :  { %v3477_v24 = vadd.f32 %v3473_v50, %v2989_v45  ;;  %v4878_v41 = vpop.f32.mrb[53].mxu0 }
0x45bb   :  { %5431 = vtanh.f32 %v3477_v24  ;;  %v4243_v17 = vmul.f32 -1.442695, %v3477_v24 }
0x45bd   :  { %5433 = vpow2.f32 %v4243_v17 }
0x45c5   :  { %v5432_v21 = vpop.eup %5431 }
0x45c6   :  { %3487 = vrot.lane.b32.xlu0 %v5432_v21, %s5516_s18 }
0x45c7   :  { %v5434_v18 = vpop.eup %5433 }
0x45c8   :  { %v3481_v19 = vadd.f32 1.0, %v5434_v18 }
0x45ca   :  { %5435 = vrcp.f32 %v3481_v19  ;;  %v3803_v19 = vld [vmem:[%s6443_s13 + $0x8] sm:$0xff] }
0x45d4   :  { %v5436_v54 = vpop.eup %5435 }
0x45d5   :  { %v3485_v33 = vmul.f32 %v5436_v54, %v3395_v11 }
0x4638   :  { %v3488_v12 = vpop.permute.xlu0 %3487 }
0x4639   :  { %v3490_v10 = vmul.f32 %v5436_v54, %v3488_v12  ;;  %v5177_v12 = vpack.c.bf16 %v3803_v19, %v3802_v29 }
0x463b   :  { %3492 = vrot.lane.b32.xlu1 %v3490_v10, %s5517_s27  ;;  %v3805_v10 = vld [vmem:[%s6443_s13 + $0x18] sm:$0xff] }
0x46ad   :  { %v3493_v49 = vpop.permute.xlu1 %3492 }
0x46ae   :  { %v3495_v16 = vadd.f32 %v3493_v49, %v3485_v33 }
0x46b0   :  { %5437 = vtanh.f32 %v3495_v16 }
0x46ba   :  { %v5438_v31 = vpop.eup %5437 }
0x46bb   :  { %3498 = vrot.lane.b32.xlu0 %v5438_v31, %s5516_s18  ;;  %v3892_v31 = vld [vmem:[%s6445_s15 + $0x8] sm:$0xff] }
0x472d   :  { %v3499_v27 = vpop.permute.xlu0 %3498 }
0x472e   :  { %v3501_v20 = vmul.f32 %v5436_v54, %v3499_v27  ;;  %v3804_v54 = vld [vmem:[%s6443_s13 + $0x10] sm:$0xff] }
0x472f   :  { %v5180_v33 = vpack.c.bf16 %v3805_v10, %v3804_v54 }
0x4730   :  { %3503 = vrot.lane.b32.xlu1 %v3501_v20, %s5517_s27 }
0x47a2   :  { %v3504_v36 = vpop.permute.xlu1 %3503 }
0x47a3   :  { %4888 = vmatmul.mubr.msk.f32.vlgmr.msra.gmra.mrb[36].mxu1 %vm243_vm2, %v3504_v36 }
0x47a4   :  { %5172 = vmatpush3.bf16.msra.mxu1 %v6222_v28  ;;  %4909 = vmatprep.mubr.msk.f32.mxu1 %vm5514_vm0, %v5515_v1 }
0x47a5   :  { %5173 = vmatprep.subr.bf16.mxu1 %v5513_v0 }
0x47a8   :  { %5175 = vmatpush3.bf16.msra.mxu1 %v6232_v22 }
0x47a9   :  { %5182 = vmatprep.subr.bf16.mxu1 %v5513_v0 }
0x4876   :  { %v3573_v37 = vpop.f32.mrb[36].mxu1 }
0x4877   :  { %v3577_v26 = vadd.f32 %v3573_v37, %v2994_v62  ;;  %v4889_v38 = vpop.f32.mrb[37].mxu1  ;;  %v3893_v37 = vld [vmem:[%s6445_s15 + $0x10] sm:$0xff] }
0x4879   :  { %5439 = vtanh.f32 %v3577_v26  ;;  %v4245_v28 = vmul.f32 -1.442695, %v3577_v26  ;;  %v3894_v26 = vld [vmem:[%s6445_s15 + $0x18] sm:$0xff] }
0x487a   :  { %v5186_v38 = vpack.c.bf16 %v3894_v26, %v3893_v37 }
0x487b   :  { %5441 = vpow2.f32 %v4245_v28  ;;  %v3979_v28 = vld [vmem:[%s6447_s17 + $0x8] sm:$0xff] }
0x4883   :  { %v5440_v30 = vpop.eup %5439 }
0x4884   :  { %3587 = vrot.lane.b32.xlu0 %v5440_v30, %s5516_s18  ;;  %v3978_v30 = vld [vmem:[%s6447_s17] sm:$0xff] }
0x4885   :  { %v5442_v44 = vpop.eup %5441 }
0x4886   :  { %v3581_v35 = vadd.f32 1.0, %v5442_v44  ;;  %v5189_v44 = vpack.c.bf16 %v3979_v28, %v3978_v30 }
0x4888   :  { %5443 = vrcp.f32 %v3581_v35  ;;  %v4250_v35 = vld [vmem:[%s6444_s14] ss:$0 sm:$0xff] }
0x4892   :  { %v5444_v46 = vpop.eup %5443 }
0x4893   :  { %v3585_v53 = vmul.f32 %v5444_v46, %v3495_v16  ;;  %v3891_v16 = vld [vmem:[%s6445_s15] sm:$0xff] }
0x4894   :  { %v5183_v27 = vpack.c.bf16 %v3892_v31, %v3891_v16 }
0x48f6   :  { %v3588_v51 = vpop.permute.xlu0 %3587 }
0x48f7   :  { %v3590_v22 = vmul.f32 %v5444_v46, %v3588_v51 }
0x48f9   :  { %3592 = vrot.lane.b32.xlu1 %v3590_v22, %s5517_s27 }
0x496b   :  { %v3593_v55 = vpop.permute.xlu1 %3592 }
0x496c   :  { %v3595_v59 = vadd.f32 %v3593_v55, %v3585_v53 }
0x496e   :  { %5445 = vtanh.f32 %v3595_v59 }
0x4978   :  { %v5446_v52 = vpop.eup %5445 }
0x4979   :  { %3598 = vrot.lane.b32.xlu0 %v5446_v52, %s5516_s18  ;;  %v3981_v52 = vld [vmem:[%s6447_s17 + $0x18] sm:$0xff] }
0x49eb   :  { %v3599_v40 = vpop.permute.xlu0 %3598 }
0x49ec   :  { %v3601_v39 = vmul.f32 %v5444_v46, %v3599_v40 }
0x49ee   :  { %3603 = vrot.lane.b32.xlu1 %v3601_v39, %s5517_s27  ;;  %v4063_v39 = vld [vmem:[%s6449_s19] sm:$0xff] }
0x4a60   :  { %v3604_v56 = vpop.permute.xlu1 %3603 }
0x4a61   :  { %4899 = vmatmul.mubr.msk.f32.vlgmr.msra.gmra.mrb[54].mxu0 %vm243_vm2, %v3604_v56  ;;  %v4064_v56 = vld [vmem:[%s6449_s19 + $0x8] sm:$0xff] }
0x4a62   :  { %4920 = vmatprep.mubr.msk.f32.mxu0 %vm5514_vm0, %v5515_v1  ;;  %5178 = vmatpush3.bf16.msra.mxu0 %v5177_v12 }
0x4a63   :  { %5179 = vmatprep.subr.bf16.mxu0 %v5513_v0 }
0x4a66   :  { %5181 = vmatpush3.bf16.msra.mxu0 %v5180_v33 }
0x4a67   :  { %5188 = vmatprep.subr.bf16.mxu0 %v5513_v0 }
0x4b34   :  { %v3673_v57 = vpop.f32.mrb[54].mxu0 }
0x4b35   :  { %v3677_v60 = vadd.f32 %v3673_v57, %v2999_v14  ;;  %v4900_v2 = vpop.f32.mrb[55].mxu0  ;;  %v5195_v14 = vpack.c.bf16 %v4064_v56, %v4063_v39 }
0x4b37   :  { %5447 = vtanh.f32 %v3677_v60  ;;  %v4247_v58 = vmul.f32 -1.442695, %v3677_v60 }
0x4b39   :  { %5449 = vpow2.f32 %v4247_v58 }
0x4b41   :  { %v5448_v42 = vpop.eup %5447 }
0x4b42   :  { %3687 = vrot.lane.b32.xlu0 %v5448_v42, %s5516_s18 }
0x4b43   :  { %v5450_v48 = vpop.eup %5449 }
0x4b44   :  { %v3681_v25 = vadd.f32 1.0, %v5450_v48  ;;  %v4065_v48 = vld [vmem:[%s6449_s19 + $0x10] sm:$0xff] }
0x4b46   :  { %5451 = vrcp.f32 %v3681_v25  ;;  %v4066_v25 = vld [vmem:[%s6449_s19 + $0x18] sm:$0xff] }
0x4b50   :  { %v5452_v47 = vpop.eup %5451 }
0x4b51   :  { %v3685_v4 = vmul.f32 %v5452_v47, %v3595_v59  ;;  %v3980_v59 = vld [vmem:[%s6447_s17 + $0x10] sm:$0xff] }
0x4b52   :  { %v5192_v40 = vpack.c.bf16 %v3981_v52, %v3980_v59 }
0x4bb4   :  { %v3688_v3 = vpop.permute.xlu0 %3687 }
0x4bb5   :  { %v3690_v23 = vmul.f32 %v5452_v47, %v3688_v3 }
0x4bb7   :  { %3692 = vrot.lane.b32.xlu1 %v3690_v23, %s5517_s27 }
0x4c29   :  { %v3693_v5 = vpop.permute.xlu1 %3692 }
0x4c2a   :  { %v3695_v63 = vadd.f32 %v3693_v5, %v3685_v4 }
0x4c2c   :  { %5453 = vtanh.f32 %v3695_v63 }
0x4c36   :  { %v5454_v6 = vpop.eup %5453 }
0x4c37   :  { %3698 = vrot.lane.b32.xlu0 %v5454_v6, %s5516_s18 }
0x4ca9   :  { %v3699_v13 = vpop.permute.xlu0 %3698 }
0x4caa   :  { %v3701_v61 = vmul.f32 %v5452_v47, %v3699_v13  ;;  %v5198_v47 = vpack.c.bf16 %v4066_v25, %v4065_v48 }
0x4cac   :  { %3703 = vrot.lane.b32.xlu1 %v3701_v61, %s5517_s27 }
0x4d1e   :  { %v3704_v34 = vpop.permute.xlu1 %3703 }
0x4d1f   :  { %4910 = vmatmul.mubr.msk.f32.vlgmr.msra.gmra.mrb[38].mxu1 %vm243_vm2, %v3704_v34 }
0x4d20   :  { %4931 = vmatprep.mubr.msk.f32.mxu1 %vm5514_vm0, %v5515_v1  ;;  %5184 = vmatpush3.bf16.msra.mxu1 %v5183_v27 }
0x4d21   :  { %5185 = vmatprep.subr.bf16.mxu1 %v5513_v0 }
0x4d24   :  { %5187 = vmatpush3.bf16.msra.mxu1 %v5186_v38 }
0x4d25   :  { %5194 = vmatprep.subr.bf16.mxu1 %v5513_v0 }
0x4df2   :  { %v3773_v11 = vpop.f32.mrb[38].mxu1 }
0x4df3   :  { %v3777_v15 = vadd.f32 %v3773_v11, %v3004_v8  ;;  %v4911_v7 = vpop.f32.mrb[39].mxu1 }
0x4df5   :  { %5455 = vtanh.f32 %v3777_v15  ;;  %v4249_v9 = vmul.f32 -1.442695, %v3777_v15 }
0x4df7   :  { %5457 = vpow2.f32 %v4249_v9 }
0x4dff   :  { %v5456_v32 = vpop.eup %5455 }
0x4e00   :  { %3787 = vrot.lane.b32.xlu0 %v5456_v32, %s5516_s18 }
0x4e01   :  { %v5458_v45 = vpop.eup %5457 }
0x4e02   :  { %v3781_v50 = vadd.f32 1.0, %v5458_v45 }
0x4e04   :  { %5459 = vrcp.f32 %v3781_v50 }
0x4e0e   :  { %v5460_v24 = vpop.eup %5459 }
0x4e0f   :  { %v3785_v17 = vmul.f32 %v5460_v24, %v3695_v63  ;;  %v4256_v63 = vld [vmem:[%s6450_s20] ss:$0 sm:$0xff] }
0x4e72   :  { %v3788_v41 = vpop.permute.xlu0 %3787 }
0x4e73   :  { %v3790_v21 = vmul.f32 %v5460_v24, %v3788_v41 }
0x4e75   :  { %3792 = vrot.lane.b32.xlu1 %v3790_v21, %s5517_s27 }
0x4ee7   :  { %v3793_v18 = vpop.permute.xlu1 %3792 }
0x4ee8   :  { %v3795_v43 = vadd.f32 %v3793_v18, %v3785_v17 }
0x4eea   :  { %5461 = vtanh.f32 %v3795_v43 }
0x4ef4   :  { %v5462_v49 = vpop.eup %5461 }
0x4ef5   :  { %3798 = vrot.lane.b32.xlu0 %v5462_v49, %s5516_s18 }
0x4f67   :  { %v3799_v20 = vpop.permute.xlu0 %3798 }
0x4f68   :  { %v3801_v36 = vmul.f32 %v5460_v24, %v3799_v20 }
0x4f6a   :  { %3814 = vrot.lane.b32.xlu1 %v3801_v36, %s5517_s27 }
0x4fdc   :  { %v3815_v62 = vpop.permute.xlu1 %3814 }
0x4fdd   :  { %4921 = vmatmul.mubr.msk.f32.vlgmr.msra.gmra.mrb[56].mxu0 %vm243_vm2, %v3815_v62 }
0x4fde   :  { %4942 = vmatprep.mubr.msk.f32.mxu0 %vm5514_vm0, %v5515_v1  ;;  %5190 = vmatpush3.bf16.msra.mxu0 %v5189_v44 }
0x4fdf   :  { %5191 = vmatprep.subr.bf16.mxu0 %v5513_v0 }
0x4fe2   :  { %5193 = vmatpush3.bf16.msra.mxu0 %v5192_v40 }
0x50b0   :  { %v3884_v46 = vpop.f32.mrb[56].mxu0 }
0x50b1   :  { %v3885_v51 = vadd.f32 %v4250_v35, %v3884_v46  ;;  %v4922_v22 = vpop.f32.mrb[57].mxu0 }
0x50b3   :  { %vm3888_vm3 = vcmp.gt.f32.partialorder %v3885_v51, 0.0  ;;  %v3889_v53 = vmul.f32 0.01, %v3885_v51 }
0x50b5   :  { %v3890_v55 = vsel %vm3888_vm3, %v3885_v51, %v3889_v53 }
0x50b6   :  { %4932 = vmatmul.mubr.msk.f32.vlgmr.msra.gmra.mrb[40].mxu1 %vm243_vm2, %v3890_v55 }
0x50b7   :  { %4953 = vmatprep.mubr.msk.f32.mxu1 %vm5514_vm0, %v5515_v1  ;;  %5196 = vmatpush3.bf16.msra.mxu1 %v5195_v14  ;;  %v4252_v1 = vld [vmem:[#allocation2] ss:$0 sm:$0xff] }
0x50b8   :  { %5197 = vmatprep.subr.bf16.mxu1 %v5513_v0  ;;  %v4254_v0 = vld [vmem:[#allocation4] ss:$0 sm:$0xff] }
0x50bb   :  { %5199 = vmatpush3.bf16.msra.mxu1 %v5198_v47 }
0x5189   :  { %v3971_v57 = vpop.f32.mrb[40].mxu1 }
0x518a   :  { %v3972_v60 = vadd.f32 %v4252_v1, %v3971_v57  ;;  %v4933_v2 = vpop.f32.mrb[41].mxu1 }
0x518c   :  { %vm3975_vm4 = vcmp.gt.f32.partialorder %v3972_v60, 0.0  ;;  %v3976_v42 = vmul.f32 0.01, %v3972_v60 }
0x518e   :  { %v3977_v58 = vsel %vm3975_vm4, %v3972_v60, %v3976_v42 }
0x518f   :  { %4943 = vmatmul.mubr.msk.f32.vlgmr.msra.gmra.mrb[58].mxu0 %vm243_vm2, %v3977_v58 }
0x5262   :  { %v4058_v3 = vpop.f32.mrb[58].mxu0 }
0x5263   :  { %v4059_v23 = vadd.f32 %v4254_v0, %v4058_v3  ;;  %v4944_v4 = vpop.f32.mrb[59].mxu0 }
0x5265   :  { %v4062_v5 = vmax.f32 %v4059_v23, 0.0 }
0x5267   :  { %4954 = vmatmul.mubr.msk.f32.vlgmr.msra.gmra.mrb[42].mxu1 %vm243_vm2, %v4062_v5 }
0x533a   :  { %v4143_v6 = vpop.f32.mrb[42].mxu1 }
0x533b   :  { %v4144_v13 = vadd.f32 %v4256_v63, %v4143_v6  ;;  %v4955_v61 = vpop.f32.mrb[43].mxu1 }
0x533d   :  { %4147 = vst [vmem:[%s6451_s21] sm:$0xff] %v4144_v13 }
0x533e   :  { %4152 = vsyncpa [#allocation3], 1 }
0x533f   :  { %4153 = vsyncpa [#allocation5], 1 }

</bundles_post_ra>
